<compile_context>
chip_gen: v7x
topology: tpu7x:2x2x1
jax: 0.10.0
libtpu: 0.0.40
codegen_flags: <defaults>
</compile_context>

<pallas_src>
import jax
import jax.numpy as jnp
from jax import lax
from jax.experimental import pallas as pl
from jax.experimental.pallas import tpu as pltpu

_LANE = 128


def _round_up(x, m):
    return (x + m - 1) // m * m


def gru_recurrence_kernel(gx_ref, wzr_ref, whh_ref, hout_ref, h_scr):
    """Sequential GRU recurrence over a chunk of T timesteps.

    gx_ref:   (T, batch, 3*Hp) bf16 — lane-dense input-gate pre-activations
              (gate order z | r | h along the lane axis; biases folded in).
    wzr_ref:  (Hp, 2*Hp) bf16 — fused [W_hz | W_hr], zero-padded to Hp.
    whh_ref:  (Hp, Hp)  bf16 — W_hh, zero-padded to Hp.
    hout_ref: (T, batch, Hp) bf16 — per-step hidden state (output projection is
              applied outside the kernel as one lane-dense matmul).
    h_scr:    (batch, Hp) f32 scratch — recurrent state, persists across grid steps.
    """
    @pl.when(pl.program_id(0) == 0)
    def _():
        h_scr[...] = jnp.zeros_like(h_scr)

    n_hp = h_scr.shape[-1]
    t_chunk = gx_ref.shape[0]

    def step(t, h):
        # Static 128-aligned lane slices of the lane-dense gate block.
        gx_t = gx_ref[t].astype(jnp.float32)            # (batch, 3*Hp)
        gz = gx_t[:, 0 * n_hp:1 * n_hp]
        gr = gx_t[:, 1 * n_hp:2 * n_hp]
        gh = gx_t[:, 2 * n_hp:3 * n_hp]

        # Fused z/r recurrent matmul on the MXU: bf16 inputs, f32 accumulate.
        zr = jnp.dot(h.astype(jnp.bfloat16), wzr_ref[...],
                     preferred_element_type=jnp.float32)        # (batch, 2*Hp)
        z = jax.nn.sigmoid(gz + zr[:, :n_hp])
        r = jax.nn.sigmoid(gr + zr[:, n_hp:])

        h_tilda = jnp.tanh(
            gh + jnp.dot((r * h).astype(jnp.bfloat16), whh_ref[...],
                         preferred_element_type=jnp.float32))
        # One fewer VPU op than z*h + (1-z)*h_tilda.
        h_new = h_tilda + z * (h - h_tilda)
        hout_ref[t] = h_new.astype(hout_ref.dtype)
        return h_new

    # Partial unroll: enough for LLO cross-step MXU/EUP/DMA interleave without
    # blowing vreg pressure at realistic batch/H.
    h_scr[...] = lax.fori_loop(0, t_chunk, step, h_scr[...],
                               unroll=min(8, t_chunk))


def _pick_chunk(seq, batch, n_hp, max_chunk=32,
                vmem_budget_bytes=40 * 1024 * 1024):
    """Timesteps per grid step, bounded by a v7x-safe (64 MiB) VMEM budget."""
    # bf16 gx chunk + bf16 hout chunk, each double-buffered by the pipeline.
    bytes_per_step = 2 * (batch * 3 * n_hp * 2) + 2 * (batch * n_hp * 2)
    t = max(1, min(max_chunk, vmem_budget_bytes // max(bytes_per_step, 1)))
    return int(min(t, seq))


def _pad_cols(w, n_cols):
    pad = n_cols - w.shape[1]
    return w if pad == 0 else jnp.pad(w, ((0, 0), (0, pad)))


def _pad_rows(w, n_rows):
    pad = n_rows - w.shape[0]
    return w if pad == 0 else jnp.pad(w, ((0, pad), (0, 0)))


def _build_recurrence_call(seq_p, batch, n_hp, t_chunk, vmem_limit_bytes,
                           single_buffer_weights):
    w_kwargs = {}
    if single_buffer_weights:
        # Weights never change block index -> no need to double-buffer them.
        w_kwargs = dict(pipeline_mode=pl.Buffered(1))
    return pl.pallas_call(
        gru_recurrence_kernel,
        out_shape=jax.ShapeDtypeStruct((seq_p, batch, n_hp), jnp.bfloat16),
        grid_spec=pltpu.PrefetchScalarGridSpec(
            num_scalar_prefetch=0,
            grid=(seq_p // t_chunk,),
            in_specs=[
                pl.BlockSpec((t_chunk, batch, 3 * n_hp), lambda i: (i, 0, 0)),
                pl.BlockSpec((n_hp, 2 * n_hp), lambda i: (0, 0), **w_kwargs),
                pl.BlockSpec((n_hp, n_hp), lambda i: (0, 0), **w_kwargs),
            ],
            out_specs=pl.BlockSpec((t_chunk, batch, n_hp), lambda i: (i, 0, 0)),
            scratch_shapes=[pltpu.VMEM((batch, n_hp), jnp.float32)],
        ),
        compiler_params=pltpu.CompilerParams(
            # The recurrence is inherently serial along time.
            # TODO(synk): for multi-sequence / large-batch workloads on v7x, add
            # a leading "parallel" shard axis so the second TensorCore runs an
            # independent recurrence (gate the h_scr reset on the TIME axis id).
            dimension_semantics=("arbitrary",),
            vmem_limit_bytes=int(vmem_limit_bytes),
        ),
    )


def unit_gru_forward(x, params, max_chunk=32):
    """x: (seq, batch, num_inputs) f32. Returns (seq*batch, num_outputs) f32."""
    seq, batch, num_inputs = x.shape
    n_h = params["W_hz"].shape[0]
    n_hp = _round_up(n_h, _LANE)      # lane-dense hidden width (MXU/vst friendly)

    # ---- Hoisted input projection: one fused bf16 matmul over all timesteps,
    # laid out lane-dense as (seq, batch, 3*Hp), gate order z | r | h.
    w_x = jnp.concatenate(
        [_pad_cols(params["W_xz"], n_hp),
         _pad_cols(params["W_xr"], n_hp),
         _pad_cols(params["W_xh"], n_hp)], axis=1)                 # (in, 3*Hp)
    b_x = jnp.concatenate(
        [_pad_cols(params["b_z"], n_hp),
         _pad_cols(params["b_r"], n_hp),
         _pad_cols(params["b_h"], n_hp)], axis=1)                  # (1, 3*Hp)
    gx = jnp.dot(x.reshape(seq * batch, num_inputs).astype(jnp.bfloat16),
                 w_x.astype(jnp.bfloat16),
                 preferred_element_type=jnp.float32) + b_x
    gx = gx.reshape(seq, batch, 3 * n_hp).astype(jnp.bfloat16)     # bf16 stream

    # ---- Fused / zero-padded recurrent gate weights; bf16 MXU inputs.
    w_h_zr = jnp.concatenate(
        [_pad_cols(_pad_rows(params["W_hz"], n_hp), n_hp),
         _pad_cols(_pad_rows(params["W_hr"], n_hp), n_hp)],
        axis=1).astype(jnp.bfloat16)                               # (Hp, 2*Hp)
    w_hh = _pad_cols(_pad_rows(params["W_hh"], n_hp),
                     n_hp).astype(jnp.bfloat16)                    # (Hp, Hp)

    # ---- Chunk the time axis; pad seq so awkward lengths never degenerate to
    # t_chunk == 1 (one grid step per timestep = ~0.35 us overhead each).
    t_chunk = _pick_chunk(seq, batch, n_hp, max_chunk)
    seq_p = _round_up(seq, t_chunk)
    if seq_p != seq:
        gx = jnp.pad(gx, ((0, seq_p - seq), (0, 0), (0, 0)))

    bytes_needed = (2 * t_chunk * batch * 3 * n_hp * 2      # gx double-buffer
                    + 2 * t_chunk * batch * n_hp * 2        # hout double-buffer
                    + 2 * (n_hp * 2 * n_hp + n_hp * n_hp) * 2   # weights
                    + batch * n_hp * 4)                     # h scratch
    vmem_limit = min(max(2 * bytes_needed, 16 << 20), 48 << 20)

    try:
        h_seq = _build_recurrence_call(seq_p, batch, n_hp, t_chunk, vmem_limit,
                                       single_buffer_weights=True)(
            gx, w_h_zr, w_hh)
        h_seq = jax.block_until_ready(h_seq)
    except Exception:
        # Fallback if pl.Buffered(1) is not supported by this jax/libtpu combo.
        h_seq = _build_recurrence_call(seq_p, batch, n_hp, t_chunk, vmem_limit,
                                       single_buffer_weights=False)(
            gx, w_h_zr, w_hh)

    # ---- Hoisted output projection: one lane-dense bf16 matmul for all steps.
    w_hq = _pad_rows(params["W_hq"], n_hp).astype(jnp.bfloat16)    # (Hp, out)
    h_flat = h_seq[:seq].reshape(seq * batch, n_hp)
    y = jnp.dot(h_flat, w_hq, preferred_element_type=jnp.float32) + params["b_q"]
    return y


def unit_gru_reference(x, params):
    """Plain-JAX f32 reference of the same GRU recurrence."""
    seq, batch, _ = x.shape
    n_h = params["W_hz"].shape[0]
    hi = jax.lax.Precision.HIGHEST

    def step(h, xt):
        z = jax.nn.sigmoid(jnp.dot(xt, params["W_xz"], precision=hi)
                           + jnp.dot(h, params["W_hz"], precision=hi) + params["b_z"])
        r = jax.nn.sigmoid(jnp.dot(xt, params["W_xr"], precision=hi)
                           + jnp.dot(h, params["W_hr"], precision=hi) + params["b_r"])
        h_tilda = jnp.tanh(jnp.dot(xt, params["W_xh"], precision=hi)
                           + jnp.dot(r * h, params["W_hh"], precision=hi) + params["b_h"])
        h_new = z * h + (1.0 - z) * h_tilda
        y = jnp.dot(h_new, params["W_hq"], precision=hi) + params["b_q"]
        return h_new, y

    h0 = jnp.zeros((batch, n_h), jnp.float32)
    _, ys = jax.lax.scan(step, h0, x)
    return ys.reshape(seq * batch, -1)


def make_params(key, num_inputs, num_hiddens, num_outputs):
    ks = jax.random.split(key, 12)
    s = 0.1
    return {
        "W_xz": s * jax.random.normal(ks[0], (num_inputs, num_hiddens), jnp.float32),
        "W_hz": s * jax.random.normal(ks[1], (num_hiddens, num_hiddens), jnp.float32),
        "b_z":  s * jax.random.normal(ks[2], (1, num_hiddens), jnp.float32),
        "W_xr": s * jax.random.normal(ks[3], (num_inputs, num_hiddens), jnp.float32),
        "W_hr": s * jax.random.normal(ks[4], (num_hiddens, num_hiddens), jnp.float32),
        "b_r":  s * jax.random.normal(ks[5], (1, num_hiddens), jnp.float32),
        "W_xh": s * jax.random.normal(ks[6], (num_inputs, num_hiddens), jnp.float32),
        "W_hh": s * jax.random.normal(ks[7], (num_hiddens, num_hiddens), jnp.float32),
        "b_h":  s * jax.random.normal(ks[8], (1, num_hiddens), jnp.float32),
        "W_hq": s * jax.random.normal(ks[9], (num_hiddens, num_outputs), jnp.float32),
        "b_q":  s * jax.random.normal(ks[10], (1, num_outputs), jnp.float32),
    }


if __name__ == "__main__":
    seq, batch, num_inputs, num_hiddens, num_outputs = 8, 2, 4, 32, 16

    key = jax.random.PRNGKey(0)
    kx, kp = jax.random.split(key)
    x = jax.random.normal(kx, (seq, batch, num_inputs), jnp.float32)
    params = make_params(kp, num_inputs, num_hiddens, num_outputs)

    y = unit_gru_forward(x, params)
    y = jax.block_until_ready(y)

    y_ref = unit_gru_reference(x, params)
    assert y.shape == (seq * batch, num_outputs)
    # bf16 streaming + bf16 MXU inputs -> slightly loosened tolerance vs f32 ref.
    assert jnp.allclose(y, y_ref, atol=3e-2, rtol=3e-2), (
        "mismatch vs reference: max abs err = "
        f"{float(jnp.max(jnp.abs(y - y_ref)))}")

    print("KERNEL_OK")
</pallas_src>

<mosaic_0001>
module attributes {stable_mosaic.version = 11 : i64} {
  func.func @gru_recurrence_kernel(%arg0: i32, %arg1: memref<8x2x384xbf16, #tpu.memory_space<vmem>>, %arg2: memref<128x256xbf16, #tpu.memory_space<vmem>>, %arg3: memref<128x128xbf16, #tpu.memory_space<vmem>>, %arg4: memref<8x2x128xbf16, #tpu.memory_space<vmem>>, %arg5: memref<2x128xf32, #tpu.memory_space<vmem>>) attributes {dimension_semantics = [#tpu.dimension_semantics<arbitrary>], iteration_bounds = array<i64: 1>, scalar_prefetch = 0 : i64, scratch_operands = 1 : i64, tpu.core_type = #tpu.core_type<tc>, window_params = [{transform_indices = @transform_0, window_bounds = array<i64: 8, 2, 384>}, {pipeline_mode = #tpu.pipeline_mode<synchronous>, transform_indices = @transform_1, window_bounds = array<i64: 128, 256>}, {pipeline_mode = #tpu.pipeline_mode<synchronous>, transform_indices = @transform_2, window_bounds = array<i64: 128, 128>}, {transform_indices = @transform_3, window_bounds = array<i64: 8, 2, 128>}]} {
    %c0_i32 = arith.constant 0 : i32
    %0 = arith.cmpi eq, %arg0, %c0_i32 : i32
    %1 = arith.extui %0 : i1 to i32
    %c0_i32_0 = arith.constant 0 : i32
    %2 = arith.cmpi ne, %1, %c0_i32_0 : i32
    scf.if %2 {
      %cst_100 = arith.constant 0.000000e+00 : f32
      %309 = vector.broadcast %cst_100 : f32 to vector<2x128xf32>
      %c0_101 = arith.constant 0 : index
      %c0_102 = arith.constant 0 : index
      %310 = vector.load %arg5[%c0_101, %c0_102] : memref<2x128xf32, #tpu.memory_space<vmem>>, vector<2x128xf32>
      tpu.vector_store %arg5[%c0_101, %c0_102], %309 {strides = array<i32>} : memref<2x128xf32, #tpu.memory_space<vmem>>, vector<2x128xf32>,
    } else {
    }
    %c0 = arith.constant 0 : index
    %c0_1 = arith.constant 0 : index
    %3 = vector.load %arg5[%c0, %c0_1] : memref<2x128xf32, #tpu.memory_space<vmem>>, vector<2x128xf32>
    %c0_i32_2 = arith.constant 0 : i32
    %4 = arith.index_cast %c0_i32_2 : i32 to index
    %c0_3 = arith.constant 0 : index
    %c0_4 = arith.constant 0 : index
    %5 = vector.load %arg1[%4, %c0_3, %c0_4] : memref<8x2x384xbf16, #tpu.memory_space<vmem>>, vector<1x2x384xbf16>
    %6 = vector.shape_cast %5 : vector<1x2x384xbf16> to vector<2x384xbf16>
    %7 = arith.extf %6 : vector<2x384xbf16> to vector<2x384xf32>
    %8 = vector.extract_strided_slice %7 {offsets = [0, 0], sizes = [2, 128], strides = [1, 1]} : vector<2x384xf32> to vector<2x128xf32>
    %9 = vector.extract_strided_slice %7 {offsets = [0, 128], sizes = [2, 128], strides = [1, 1]} : vector<2x384xf32> to vector<2x128xf32>
    %10 = vector.extract_strided_slice %7 {offsets = [0, 256], sizes = [2, 128], strides = [1, 1]} : vector<2x384xf32> to vector<2x128xf32>
    %11 = arith.truncf %3 : vector<2x128xf32> to vector<2x128xbf16>
    %c0_5 = arith.constant 0 : index
    %c0_6 = arith.constant 0 : index
    %12 = vector.load %arg2[%c0_5, %c0_6] : memref<128x256xbf16, #tpu.memory_space<vmem>>, vector<128x256xbf16>
    %cst = arith.constant dense<0.000000e+00> : vector<2x256xf32>
    %13 = tpu.matmul %11, %12, %cst {dimension_numbers = #tpu.dot_dimension_numbers<[1], [0], [0], [1], [0, 0, 1, 1], [], []>} : vector<2x128xbf16>, vector<128x256xbf16>, vector<2x256xf32> -> vector<2x256xf32>
    %14 = vector.extract_strided_slice %13 {offsets = [0, 0], sizes = [2, 128], strides = [1, 1]} : vector<2x256xf32> to vector<2x128xf32>
    %15 = arith.addf %8, %14 : vector<2x128xf32>
    %16 = arith.negf %15 : vector<2x128xf32>
    %17 = math.exp %16 : vector<2x128xf32>
    %cst_7 = arith.constant 1.000000e+00 : f32
    %18 = vector.broadcast %cst_7 : f32 to vector<2x128xf32>
    %19 = arith.addf %18, %17 : vector<2x128xf32>
    %20 = arith.divf %18, %19 : vector<2x128xf32>
    %21 = vector.extract_strided_slice %13 {offsets = [0, 128], sizes = [2, 128], strides = [1, 1]} : vector<2x256xf32> to vector<2x128xf32>
    %22 = arith.addf %9, %21 : vector<2x128xf32>
    %23 = arith.negf %22 : vector<2x128xf32>
    %24 = math.exp %23 : vector<2x128xf32>
    %cst_8 = arith.constant 1.000000e+00 : f32
    %25 = vector.broadcast %cst_8 : f32 to vector<2x128xf32>
    %26 = arith.addf %25, %24 : vector<2x128xf32>
    %27 = arith.divf %25, %26 : vector<2x128xf32>
    %28 = arith.mulf %27, %3 : vector<2x128xf32>
    %29 = arith.truncf %28 : vector<2x128xf32> to vector<2x128xbf16>
    %c0_9 = arith.constant 0 : index
    %c0_10 = arith.constant 0 : index
    %30 = vector.load %arg3[%c0_9, %c0_10] : memref<128x128xbf16, #tpu.memory_space<vmem>>, vector<128x128xbf16>
    %cst_11 = arith.constant dense<0.000000e+00> : vector<2x128xf32>
    %31 = tpu.matmul %29, %30, %cst_11 {dimension_numbers = #tpu.dot_dimension_numbers<[1], [0], [0], [1], [0, 0, 1, 1], [], []>} : vector<2x128xbf16>, vector<128x128xbf16>, vector<2x128xf32> -> vector<2x128xf32>
    %32 = arith.addf %10, %31 : vector<2x128xf32>
    %33 = math.tanh %32 : vector<2x128xf32>
    %34 = arith.subf %3, %33 : vector<2x128xf32>
    %35 = arith.mulf %20, %34 : vector<2x128xf32>
    %36 = arith.addf %33, %35 : vector<2x128xf32>
    %37 = arith.truncf %36 : vector<2x128xf32> to vector<2x128xbf16>
    %38 = arith.index_cast %c0_i32_2 : i32 to index
    %c0_12 = arith.constant 0 : index
    %c0_13 = arith.constant 0 : index
    %39 = vector.load %arg4[%38, %c0_12, %c0_13] : memref<8x2x128xbf16, #tpu.memory_space<vmem>>, vector<1x2x128xbf16>
    %40 = vector.shape_cast %39 : vector<1x2x128xbf16> to vector<2x128xbf16>
    %41 = vector.shape_cast %37 : vector<2x128xbf16> to vector<1x2x128xbf16>
    tpu.vector_store %arg4[%38, %c0_12, %c0_13], %41 {strides = array<i32>} : memref<8x2x128xbf16, #tpu.memory_space<vmem>>, vector<1x2x128xbf16>,
    %c1_i32 = arith.constant 1 : i32
    %42 = arith.index_cast %c1_i32 : i32 to index
    %c0_14 = arith.constant 0 : index
    %c0_15 = arith.constant 0 : index
    %43 = vector.load %arg1[%42, %c0_14, %c0_15] : memref<8x2x384xbf16, #tpu.memory_space<vmem>>, vector<1x2x384xbf16>
    %44 = vector.shape_cast %43 : vector<1x2x384xbf16> to vector<2x384xbf16>
    %45 = arith.extf %44 : vector<2x384xbf16> to vector<2x384xf32>
    %46 = vector.extract_strided_slice %45 {offsets = [0, 0], sizes = [2, 128], strides = [1, 1]} : vector<2x384xf32> to vector<2x128xf32>
    %47 = vector.extract_strided_slice %45 {offsets = [0, 128], sizes = [2, 128], strides = [1, 1]} : vector<2x384xf32> to vector<2x128xf32>
    %48 = vector.extract_strided_slice %45 {offsets = [0, 256], sizes = [2, 128], strides = [1, 1]} : vector<2x384xf32> to vector<2x128xf32>
    %49 = arith.truncf %36 : vector<2x128xf32> to vector<2x128xbf16>
    %c0_16 = arith.constant 0 : index
    %c0_17 = arith.constant 0 : index
    %50 = vector.load %arg2[%c0_16, %c0_17] : memref<128x256xbf16, #tpu.memory_space<vmem>>, vector<128x256xbf16>
    %cst_18 = arith.constant dense<0.000000e+00> : vector<2x256xf32>
    %51 = tpu.matmul %49, %50, %cst_18 {dimension_numbers = #tpu.dot_dimension_numbers<[1], [0], [0], [1], [0, 0, 1, 1], [], []>} : vector<2x128xbf16>, vector<128x256xbf16>, vector<2x256xf32> -> vector<2x256xf32>
    %52 = vector.extract_strided_slice %51 {offsets = [0, 0], sizes = [2, 128], strides = [1, 1]} : vector<2x256xf32> to vector<2x128xf32>
    %53 = arith.addf %46, %52 : vector<2x128xf32>
    %54 = arith.negf %53 : vector<2x128xf32>
    %55 = math.exp %54 : vector<2x128xf32>
    %cst_19 = arith.constant 1.000000e+00 : f32
    %56 = vector.broadcast %cst_19 : f32 to vector<2x128xf32>
    %57 = arith.addf %56, %55 : vector<2x128xf32>
    %58 = arith.divf %56, %57 : vector<2x128xf32>
    %59 = vector.extract_strided_slice %51 {offsets = [0, 128], sizes = [2, 128], strides = [1, 1]} : vector<2x256xf32> to vector<2x128xf32>
    %60 = arith.addf %47, %59 : vector<2x128xf32>
    %61 = arith.negf %60 : vector<2x128xf32>
    %62 = math.exp %61 : vector<2x128xf32>
    %cst_20 = arith.constant 1.000000e+00 : f32
    %63 = vector.broadcast %cst_20 : f32 to vector<2x128xf32>
    %64 = arith.addf %63, %62 : vector<2x128xf32>
    %65 = arith.divf %63, %64 : vector<2x128xf32>
    %66 = arith.mulf %65, %36 : vector<2x128xf32>
    %67 = arith.truncf %66 : vector<2x128xf32> to vector<2x128xbf16>
    %c0_21 = arith.constant 0 : index
    %c0_22 = arith.constant 0 : index
    %68 = vector.load %arg3[%c0_21, %c0_22] : memref<128x128xbf16, #tpu.memory_space<vmem>>, vector<128x128xbf16>
    %cst_23 = arith.constant dense<0.000000e+00> : vector<2x128xf32>
    %69 = tpu.matmul %67, %68, %cst_23 {dimension_numbers = #tpu.dot_dimension_numbers<[1], [0], [0], [1], [0, 0, 1, 1], [], []>} : vector<2x128xbf16>, vector<128x128xbf16>, vector<2x128xf32> -> vector<2x128xf32>
    %70 = arith.addf %48, %69 : vector<2x128xf32>
    %71 = math.tanh %70 : vector<2x128xf32>
    %72 = arith.subf %36, %71 : vector<2x128xf32>
    %73 = arith.mulf %58, %72 : vector<2x128xf32>
    %74 = arith.addf %71, %73 : vector<2x128xf32>
    %75 = arith.truncf %74 : vector<2x128xf32> to vector<2x128xbf16>
    %76 = arith.index_cast %c1_i32 : i32 to index
    %c0_24 = arith.constant 0 : index
    %c0_25 = arith.constant 0 : index
    %77 = vector.load %arg4[%76, %c0_24, %c0_25] : memref<8x2x128xbf16, #tpu.memory_space<vmem>>, vector<1x2x128xbf16>
    %78 = vector.shape_cast %77 : vector<1x2x128xbf16> to vector<2x128xbf16>
    %79 = vector.shape_cast %75 : vector<2x128xbf16> to vector<1x2x128xbf16>
    tpu.vector_store %arg4[%76, %c0_24, %c0_25], %79 {strides = array<i32>} : memref<8x2x128xbf16, #tpu.memory_space<vmem>>, vector<1x2x128xbf16>,
    %c2_i32 = arith.constant 2 : i32
    %80 = arith.index_cast %c2_i32 : i32 to index
    %c0_26 = arith.constant 0 : index
    %c0_27 = arith.constant 0 : index
    %81 = vector.load %arg1[%80, %c0_26, %c0_27] : memref<8x2x384xbf16, #tpu.memory_space<vmem>>, vector<1x2x384xbf16>
    %82 = vector.shape_cast %81 : vector<1x2x384xbf16> to vector<2x384xbf16>
    %83 = arith.extf %82 : vector<2x384xbf16> to vector<2x384xf32>
    %84 = vector.extract_strided_slice %83 {offsets = [0, 0], sizes = [2, 128], strides = [1, 1]} : vector<2x384xf32> to vector<2x128xf32>
    %85 = vector.extract_strided_slice %83 {offsets = [0, 128], sizes = [2, 128], strides = [1, 1]} : vector<2x384xf32> to vector<2x128xf32>
    %86 = vector.extract_strided_slice %83 {offsets = [0, 256], sizes = [2, 128], strides = [1, 1]} : vector<2x384xf32> to vector<2x128xf32>
    %87 = arith.truncf %74 : vector<2x128xf32> to vector<2x128xbf16>
    %c0_28 = arith.constant 0 : index
    %c0_29 = arith.constant 0 : index
    %88 = vector.load %arg2[%c0_28, %c0_29] : memref<128x256xbf16, #tpu.memory_space<vmem>>, vector<128x256xbf16>
    %cst_30 = arith.constant dense<0.000000e+00> : vector<2x256xf32>
    %89 = tpu.matmul %87, %88, %cst_30 {dimension_numbers = #tpu.dot_dimension_numbers<[1], [0], [0], [1], [0, 0, 1, 1], [], []>} : vector<2x128xbf16>, vector<128x256xbf16>, vector<2x256xf32> -> vector<2x256xf32>
    %90 = vector.extract_strided_slice %89 {offsets = [0, 0], sizes = [2, 128], strides = [1, 1]} : vector<2x256xf32> to vector<2x128xf32>
    %91 = arith.addf %84, %90 : vector<2x128xf32>
    %92 = arith.negf %91 : vector<2x128xf32>
    %93 = math.exp %92 : vector<2x128xf32>
    %cst_31 = arith.constant 1.000000e+00 : f32
    %94 = vector.broadcast %cst_31 : f32 to vector<2x128xf32>
    %95 = arith.addf %94, %93 : vector<2x128xf32>
    %96 = arith.divf %94, %95 : vector<2x128xf32>
    %97 = vector.extract_strided_slice %89 {offsets = [0, 128], sizes = [2, 128], strides = [1, 1]} : vector<2x256xf32> to vector<2x128xf32>
    %98 = arith.addf %85, %97 : vector<2x128xf32>
    %99 = arith.negf %98 : vector<2x128xf32>
    %100 = math.exp %99 : vector<2x128xf32>
    %cst_32 = arith.constant 1.000000e+00 : f32
    %101 = vector.broadcast %cst_32 : f32 to vector<2x128xf32>
    %102 = arith.addf %101, %100 : vector<2x128xf32>
    %103 = arith.divf %101, %102 : vector<2x128xf32>
    %104 = arith.mulf %103, %74 : vector<2x128xf32>
    %105 = arith.truncf %104 : vector<2x128xf32> to vector<2x128xbf16>
    %c0_33 = arith.constant 0 : index
    %c0_34 = arith.constant 0 : index
    %106 = vector.load %arg3[%c0_33, %c0_34] : memref<128x128xbf16, #tpu.memory_space<vmem>>, vector<128x128xbf16>
    %cst_35 = arith.constant dense<0.000000e+00> : vector<2x128xf32>
    %107 = tpu.matmul %105, %106, %cst_35 {dimension_numbers = #tpu.dot_dimension_numbers<[1], [0], [0], [1], [0, 0, 1, 1], [], []>} : vector<2x128xbf16>, vector<128x128xbf16>, vector<2x128xf32> -> vector<2x128xf32>
    %108 = arith.addf %86, %107 : vector<2x128xf32>
    %109 = math.tanh %108 : vector<2x128xf32>
    %110 = arith.subf %74, %109 : vector<2x128xf32>
    %111 = arith.mulf %96, %110 : vector<2x128xf32>
    %112 = arith.addf %109, %111 : vector<2x128xf32>
    %113 = arith.truncf %112 : vector<2x128xf32> to vector<2x128xbf16>
    %114 = arith.index_cast %c2_i32 : i32 to index
    %c0_36 = arith.constant 0 : index
    %c0_37 = arith.constant 0 : index
    %115 = vector.load %arg4[%114, %c0_36, %c0_37] : memref<8x2x128xbf16, #tpu.memory_space<vmem>>, vector<1x2x128xbf16>
    %116 = vector.shape_cast %115 : vector<1x2x128xbf16> to vector<2x128xbf16>
    %117 = vector.shape_cast %113 : vector<2x128xbf16> to vector<1x2x128xbf16>
    tpu.vector_store %arg4[%114, %c0_36, %c0_37], %117 {strides = array<i32>} : memref<8x2x128xbf16, #tpu.memory_space<vmem>>, vector<1x2x128xbf16>,
    %c3_i32 = arith.constant 3 : i32
    %118 = arith.index_cast %c3_i32 : i32 to index
    %c0_38 = arith.constant 0 : index
    %c0_39 = arith.constant 0 : index
    %119 = vector.load %arg1[%118, %c0_38, %c0_39] : memref<8x2x384xbf16, #tpu.memory_space<vmem>>, vector<1x2x384xbf16>
    %120 = vector.shape_cast %119 : vector<1x2x384xbf16> to vector<2x384xbf16>
    %121 = arith.extf %120 : vector<2x384xbf16> to vector<2x384xf32>
    %122 = vector.extract_strided_slice %121 {offsets = [0, 0], sizes = [2, 128], strides = [1, 1]} : vector<2x384xf32> to vector<2x128xf32>
    %123 = vector.extract_strided_slice %121 {offsets = [0, 128], sizes = [2, 128], strides = [1, 1]} : vector<2x384xf32> to vector<2x128xf32>
    %124 = vector.extract_strided_slice %121 {offsets = [0, 256], sizes = [2, 128], strides = [1, 1]} : vector<2x384xf32> to vector<2x128xf32>
    %125 = arith.truncf %112 : vector<2x128xf32> to vector<2x128xbf16>
    %c0_40 = arith.constant 0 : index
    %c0_41 = arith.constant 0 : index
    %126 = vector.load %arg2[%c0_40, %c0_41] : memref<128x256xbf16, #tpu.memory_space<vmem>>, vector<128x256xbf16>
    %cst_42 = arith.constant dense<0.000000e+00> : vector<2x256xf32>
    %127 = tpu.matmul %125, %126, %cst_42 {dimension_numbers = #tpu.dot_dimension_numbers<[1], [0], [0], [1], [0, 0, 1, 1], [], []>} : vector<2x128xbf16>, vector<128x256xbf16>, vector<2x256xf32> -> vector<2x256xf32>
    %128 = vector.extract_strided_slice %127 {offsets = [0, 0], sizes = [2, 128], strides = [1, 1]} : vector<2x256xf32> to vector<2x128xf32>
    %129 = arith.addf %122, %128 : vector<2x128xf32>
    %130 = arith.negf %129 : vector<2x128xf32>
    %131 = math.exp %130 : vector<2x128xf32>
    %cst_43 = arith.constant 1.000000e+00 : f32
    %132 = vector.broadcast %cst_43 : f32 to vector<2x128xf32>
    %133 = arith.addf %132, %131 : vector<2x128xf32>
    %134 = arith.divf %132, %133 : vector<2x128xf32>
    %135 = vector.extract_strided_slice %127 {offsets = [0, 128], sizes = [2, 128], strides = [1, 1]} : vector<2x256xf32> to vector<2x128xf32>
    %136 = arith.addf %123, %135 : vector<2x128xf32>
    %137 = arith.negf %136 : vector<2x128xf32>
    %138 = math.exp %137 : vector<2x128xf32>
    %cst_44 = arith.constant 1.000000e+00 : f32
    %139 = vector.broadcast %cst_44 : f32 to vector<2x128xf32>
    %140 = arith.addf %139, %138 : vector<2x128xf32>
    %141 = arith.divf %139, %140 : vector<2x128xf32>
    %142 = arith.mulf %141, %112 : vector<2x128xf32>
    %143 = arith.truncf %142 : vector<2x128xf32> to vector<2x128xbf16>
    %c0_45 = arith.constant 0 : index
    %c0_46 = arith.constant 0 : index
    %144 = vector.load %arg3[%c0_45, %c0_46] : memref<128x128xbf16, #tpu.memory_space<vmem>>, vector<128x128xbf16>
    %cst_47 = arith.constant dense<0.000000e+00> : vector<2x128xf32>
    %145 = tpu.matmul %143, %144, %cst_47 {dimension_numbers = #tpu.dot_dimension_numbers<[1], [0], [0], [1], [0, 0, 1, 1], [], []>} : vector<2x128xbf16>, vector<128x128xbf16>, vector<2x128xf32> -> vector<2x128xf32>
    %146 = arith.addf %124, %145 : vector<2x128xf32>
    %147 = math.tanh %146 : vector<2x128xf32>
    %148 = arith.subf %112, %147 : vector<2x128xf32>
    %149 = arith.mulf %134, %148 : vector<2x128xf32>
    %150 = arith.addf %147, %149 : vector<2x128xf32>
    %151 = arith.truncf %150 : vector<2x128xf32> to vector<2x128xbf16>
    %152 = arith.index_cast %c3_i32 : i32 to index
    %c0_48 = arith.constant 0 : index
    %c0_49 = arith.constant 0 : index
    %153 = vector.load %arg4[%152, %c0_48, %c0_49] : memref<8x2x128xbf16, #tpu.memory_space<vmem>>, vector<1x2x128xbf16>
    %154 = vector.shape_cast %153 : vector<1x2x128xbf16> to vector<2x128xbf16>
    %155 = vector.shape_cast %151 : vector<2x128xbf16> to vector<1x2x128xbf16>
    tpu.vector_store %arg4[%152, %c0_48, %c0_49], %155 {strides = array<i32>} : memref<8x2x128xbf16, #tpu.memory_space<vmem>>, vector<1x2x128xbf16>,
    %c4_i32 = arith.constant 4 : i32
    %156 = arith.index_cast %c4_i32 : i32 to index
    %c0_50 = arith.constant 0 : index
    %c0_51 = arith.constant 0 : index
    %157 = vector.load %arg1[%156, %c0_50, %c0_51] : memref<8x2x384xbf16, #tpu.memory_space<vmem>>, vector<1x2x384xbf16>
    %158 = vector.shape_cast %157 : vector<1x2x384xbf16> to vector<2x384xbf16>
    %159 = arith.extf %158 : vector<2x384xbf16> to vector<2x384xf32>
    %160 = vector.extract_strided_slice %159 {offsets = [0, 0], sizes = [2, 128], strides = [1, 1]} : vector<2x384xf32> to vector<2x128xf32>
    %161 = vector.extract_strided_slice %159 {offsets = [0, 128], sizes = [2, 128], strides = [1, 1]} : vector<2x384xf32> to vector<2x128xf32>
    %162 = vector.extract_strided_slice %159 {offsets = [0, 256], sizes = [2, 128], strides = [1, 1]} : vector<2x384xf32> to vector<2x128xf32>
    %163 = arith.truncf %150 : vector<2x128xf32> to vector<2x128xbf16>
    %c0_52 = arith.constant 0 : index
    %c0_53 = arith.constant 0 : index
    %164 = vector.load %arg2[%c0_52, %c0_53] : memref<128x256xbf16, #tpu.memory_space<vmem>>, vector<128x256xbf16>
    %cst_54 = arith.constant dense<0.000000e+00> : vector<2x256xf32>
    %165 = tpu.matmul %163, %164, %cst_54 {dimension_numbers = #tpu.dot_dimension_numbers<[1], [0], [0], [1], [0, 0, 1, 1], [], []>} : vector<2x128xbf16>, vector<128x256xbf16>, vector<2x256xf32> -> vector<2x256xf32>
    %166 = vector.extract_strided_slice %165 {offsets = [0, 0], sizes = [2, 128], strides = [1, 1]} : vector<2x256xf32> to vector<2x128xf32>
    %167 = arith.addf %160, %166 : vector<2x128xf32>
    %168 = arith.negf %167 : vector<2x128xf32>
    %169 = math.exp %168 : vector<2x128xf32>
    %cst_55 = arith.constant 1.000000e+00 : f32
    %170 = vector.broadcast %cst_55 : f32 to vector<2x128xf32>
    %171 = arith.addf %170, %169 : vector<2x128xf32>
    %172 = arith.divf %170, %171 : vector<2x128xf32>
    %173 = vector.extract_strided_slice %165 {offsets = [0, 128], sizes = [2, 128], strides = [1, 1]} : vector<2x256xf32> to vector<2x128xf32>
    %174 = arith.addf %161, %173 : vector<2x128xf32>
    %175 = arith.negf %174 : vector<2x128xf32>
    %176 = math.exp %175 : vector<2x128xf32>
    %cst_56 = arith.constant 1.000000e+00 : f32
    %177 = vector.broadcast %cst_56 : f32 to vector<2x128xf32>
    %178 = arith.addf %177, %176 : vector<2x128xf32>
    %179 = arith.divf %177, %178 : vector<2x128xf32>
    %180 = arith.mulf %179, %150 : vector<2x128xf32>
    %181 = arith.truncf %180 : vector<2x128xf32> to vector<2x128xbf16>
    %c0_57 = arith.constant 0 : index
    %c0_58 = arith.constant 0 : index
    %182 = vector.load %arg3[%c0_57, %c0_58] : memref<128x128xbf16, #tpu.memory_space<vmem>>, vector<128x128xbf16>
    %cst_59 = arith.constant dense<0.000000e+00> : vector<2x128xf32>
    %183 = tpu.matmul %181, %182, %cst_59 {dimension_numbers = #tpu.dot_dimension_numbers<[1], [0], [0], [1], [0, 0, 1, 1], [], []>} : vector<2x128xbf16>, vector<128x128xbf16>, vector<2x128xf32> -> vector<2x128xf32>
    %184 = arith.addf %162, %183 : vector<2x128xf32>
    %185 = math.tanh %184 : vector<2x128xf32>
    %186 = arith.subf %150, %185 : vector<2x128xf32>
    %187 = arith.mulf %172, %186 : vector<2x128xf32>
    %188 = arith.addf %185, %187 : vector<2x128xf32>
    %189 = arith.truncf %188 : vector<2x128xf32> to vector<2x128xbf16>
    %190 = arith.index_cast %c4_i32 : i32 to index
    %c0_60 = arith.constant 0 : index
    %c0_61 = arith.constant 0 : index
    %191 = vector.load %arg4[%190, %c0_60, %c0_61] : memref<8x2x128xbf16, #tpu.memory_space<vmem>>, vector<1x2x128xbf16>
    %192 = vector.shape_cast %191 : vector<1x2x128xbf16> to vector<2x128xbf16>
    %193 = vector.shape_cast %189 : vector<2x128xbf16> to vector<1x2x128xbf16>
    tpu.vector_store %arg4[%190, %c0_60, %c0_61], %193 {strides = array<i32>} : memref<8x2x128xbf16, #tpu.memory_space<vmem>>, vector<1x2x128xbf16>,
    %c5_i32 = arith.constant 5 : i32
    %194 = arith.index_cast %c5_i32 : i32 to index
    %c0_62 = arith.constant 0 : index
    %c0_63 = arith.constant 0 : index
    %195 = vector.load %arg1[%194, %c0_62, %c0_63] : memref<8x2x384xbf16, #tpu.memory_space<vmem>>, vector<1x2x384xbf16>
    %196 = vector.shape_cast %195 : vector<1x2x384xbf16> to vector<2x384xbf16>
    %197 = arith.extf %196 : vector<2x384xbf16> to vector<2x384xf32>
    %198 = vector.extract_strided_slice %197 {offsets = [0, 0], sizes = [2, 128], strides = [1, 1]} : vector<2x384xf32> to vector<2x128xf32>
    %199 = vector.extract_strided_slice %197 {offsets = [0, 128], sizes = [2, 128], strides = [1, 1]} : vector<2x384xf32> to vector<2x128xf32>
    %200 = vector.extract_strided_slice %197 {offsets = [0, 256], sizes = [2, 128], strides = [1, 1]} : vector<2x384xf32> to vector<2x128xf32>
    %201 = arith.truncf %188 : vector<2x128xf32> to vector<2x128xbf16>
    %c0_64 = arith.constant 0 : index
    %c0_65 = arith.constant 0 : index
    %202 = vector.load %arg2[%c0_64, %c0_65] : memref<128x256xbf16, #tpu.memory_space<vmem>>, vector<128x256xbf16>
    %cst_66 = arith.constant dense<0.000000e+00> : vector<2x256xf32>
    %203 = tpu.matmul %201, %202, %cst_66 {dimension_numbers = #tpu.dot_dimension_numbers<[1], [0], [0], [1], [0, 0, 1, 1], [], []>} : vector<2x128xbf16>, vector<128x256xbf16>, vector<2x256xf32> -> vector<2x256xf32>
    %204 = vector.extract_strided_slice %203 {offsets = [0, 0], sizes = [2, 128], strides = [1, 1]} : vector<2x256xf32> to vector<2x128xf32>
    %205 = arith.addf %198, %204 : vector<2x128xf32>
    %206 = arith.negf %205 : vector<2x128xf32>
    %207 = math.exp %206 : vector<2x128xf32>
    %cst_67 = arith.constant 1.000000e+00 : f32
    %208 = vector.broadcast %cst_67 : f32 to vector<2x128xf32>
    %209 = arith.addf %208, %207 : vector<2x128xf32>
    %210 = arith.divf %208, %209 : vector<2x128xf32>
    %211 = vector.extract_strided_slice %203 {offsets = [0, 128], sizes = [2, 128], strides = [1, 1]} : vector<2x256xf32> to vector<2x128xf32>
    %212 = arith.addf %199, %211 : vector<2x128xf32>
    %213 = arith.negf %212 : vector<2x128xf32>
    %214 = math.exp %213 : vector<2x128xf32>
    %cst_68 = arith.constant 1.000000e+00 : f32
    %215 = vector.broadcast %cst_68 : f32 to vector<2x128xf32>
    %216 = arith.addf %215, %214 : vector<2x128xf32>
    %217 = arith.divf %215, %216 : vector<2x128xf32>
    %218 = arith.mulf %217, %188 : vector<2x128xf32>
    %219 = arith.truncf %218 : vector<2x128xf32> to vector<2x128xbf16>
    %c0_69 = arith.constant 0 : index
    %c0_70 = arith.constant 0 : index
    %220 = vector.load %arg3[%c0_69, %c0_70] : memref<128x128xbf16, #tpu.memory_space<vmem>>, vector<128x128xbf16>
    %cst_71 = arith.constant dense<0.000000e+00> : vector<2x128xf32>
    %221 = tpu.matmul %219, %220, %cst_71 {dimension_numbers = #tpu.dot_dimension_numbers<[1], [0], [0], [1], [0, 0, 1, 1], [], []>} : vector<2x128xbf16>, vector<128x128xbf16>, vector<2x128xf32> -> vector<2x128xf32>
    %222 = arith.addf %200, %221 : vector<2x128xf32>
    %223 = math.tanh %222 : vector<2x128xf32>
    %224 = arith.subf %188, %223 : vector<2x128xf32>
    %225 = arith.mulf %210, %224 : vector<2x128xf32>
    %226 = arith.addf %223, %225 : vector<2x128xf32>
    %227 = arith.truncf %226 : vector<2x128xf32> to vector<2x128xbf16>
    %228 = arith.index_cast %c5_i32 : i32 to index
    %c0_72 = arith.constant 0 : index
    %c0_73 = arith.constant 0 : index
    %229 = vector.load %arg4[%228, %c0_72, %c0_73] : memref<8x2x128xbf16, #tpu.memory_space<vmem>>, vector<1x2x128xbf16>
    %230 = vector.shape_cast %229 : vector<1x2x128xbf16> to vector<2x128xbf16>
    %231 = vector.shape_cast %227 : vector<2x128xbf16> to vector<1x2x128xbf16>
    tpu.vector_store %arg4[%228, %c0_72, %c0_73], %231 {strides = array<i32>} : memref<8x2x128xbf16, #tpu.memory_space<vmem>>, vector<1x2x128xbf16>,
    %c6_i32 = arith.constant 6 : i32
    %232 = arith.index_cast %c6_i32 : i32 to index
    %c0_74 = arith.constant 0 : index
    %c0_75 = arith.constant 0 : index
    %233 = vector.load %arg1[%232, %c0_74, %c0_75] : memref<8x2x384xbf16, #tpu.memory_space<vmem>>, vector<1x2x384xbf16>
    %234 = vector.shape_cast %233 : vector<1x2x384xbf16> to vector<2x384xbf16>
    %235 = arith.extf %234 : vector<2x384xbf16> to vector<2x384xf32>
    %236 = vector.extract_strided_slice %235 {offsets = [0, 0], sizes = [2, 128], strides = [1, 1]} : vector<2x384xf32> to vector<2x128xf32>
    %237 = vector.extract_strided_slice %235 {offsets = [0, 128], sizes = [2, 128], strides = [1, 1]} : vector<2x384xf32> to vector<2x128xf32>
    %238 = vector.extract_strided_slice %235 {offsets = [0, 256], sizes = [2, 128], strides = [1, 1]} : vector<2x384xf32> to vector<2x128xf32>
    %239 = arith.truncf %226 : vector<2x128xf32> to vector<2x128xbf16>
    %c0_76 = arith.constant 0 : index
    %c0_77 = arith.constant 0 : index
    %240 = vector.load %arg2[%c0_76, %c0_77] : memref<128x256xbf16, #tpu.memory_space<vmem>>, vector<128x256xbf16>
    %cst_78 = arith.constant dense<0.000000e+00> : vector<2x256xf32>
    %241 = tpu.matmul %239, %240, %cst_78 {dimension_numbers = #tpu.dot_dimension_numbers<[1], [0], [0], [1], [0, 0, 1, 1], [], []>} : vector<2x128xbf16>, vector<128x256xbf16>, vector<2x256xf32> -> vector<2x256xf32>
    %242 = vector.extract_strided_slice %241 {offsets = [0, 0], sizes = [2, 128], strides = [1, 1]} : vector<2x256xf32> to vector<2x128xf32>
    %243 = arith.addf %236, %242 : vector<2x128xf32>
    %244 = arith.negf %243 : vector<2x128xf32>
    %245 = math.exp %244 : vector<2x128xf32>
    %cst_79 = arith.constant 1.000000e+00 : f32
    %246 = vector.broadcast %cst_79 : f32 to vector<2x128xf32>
    %247 = arith.addf %246, %245 : vector<2x128xf32>
    %248 = arith.divf %246, %247 : vector<2x128xf32>
    %249 = vector.extract_strided_slice %241 {offsets = [0, 128], sizes = [2, 128], strides = [1, 1]} : vector<2x256xf32> to vector<2x128xf32>
    %250 = arith.addf %237, %249 : vector<2x128xf32>
    %251 = arith.negf %250 : vector<2x128xf32>
    %252 = math.exp %251 : vector<2x128xf32>
    %cst_80 = arith.constant 1.000000e+00 : f32
    %253 = vector.broadcast %cst_80 : f32 to vector<2x128xf32>
    %254 = arith.addf %253, %252 : vector<2x128xf32>
    %255 = arith.divf %253, %254 : vector<2x128xf32>
    %256 = arith.mulf %255, %226 : vector<2x128xf32>
    %257 = arith.truncf %256 : vector<2x128xf32> to vector<2x128xbf16>
    %c0_81 = arith.constant 0 : index
    %c0_82 = arith.constant 0 : index
    %258 = vector.load %arg3[%c0_81, %c0_82] : memref<128x128xbf16, #tpu.memory_space<vmem>>, vector<128x128xbf16>
    %cst_83 = arith.constant dense<0.000000e+00> : vector<2x128xf32>
    %259 = tpu.matmul %257, %258, %cst_83 {dimension_numbers = #tpu.dot_dimension_numbers<[1], [0], [0], [1], [0, 0, 1, 1], [], []>} : vector<2x128xbf16>, vector<128x128xbf16>, vector<2x128xf32> -> vector<2x128xf32>
    %260 = arith.addf %238, %259 : vector<2x128xf32>
    %261 = math.tanh %260 : vector<2x128xf32>
    %262 = arith.subf %226, %261 : vector<2x128xf32>
    %263 = arith.mulf %248, %262 : vector<2x128xf32>
    %264 = arith.addf %261, %263 : vector<2x128xf32>
    %265 = arith.truncf %264 : vector<2x128xf32> to vector<2x128xbf16>
    %266 = arith.index_cast %c6_i32 : i32 to index
    %c0_84 = arith.constant 0 : index
    %c0_85 = arith.constant 0 : index
    %267 = vector.load %arg4[%266, %c0_84, %c0_85] : memref<8x2x128xbf16, #tpu.memory_space<vmem>>, vector<1x2x128xbf16>
    %268 = vector.shape_cast %267 : vector<1x2x128xbf16> to vector<2x128xbf16>
    %269 = vector.shape_cast %265 : vector<2x128xbf16> to vector<1x2x128xbf16>
    tpu.vector_store %arg4[%266, %c0_84, %c0_85], %269 {strides = array<i32>} : memref<8x2x128xbf16, #tpu.memory_space<vmem>>, vector<1x2x128xbf16>,
    %c7_i32 = arith.constant 7 : i32
    %270 = arith.index_cast %c7_i32 : i32 to index
    %c0_86 = arith.constant 0 : index
    %c0_87 = arith.constant 0 : index
    %271 = vector.load %arg1[%270, %c0_86, %c0_87] : memref<8x2x384xbf16, #tpu.memory_space<vmem>>, vector<1x2x384xbf16>
    %272 = vector.shape_cast %271 : vector<1x2x384xbf16> to vector<2x384xbf16>
    %273 = arith.extf %272 : vector<2x384xbf16> to vector<2x384xf32>
    %274 = vector.extract_strided_slice %273 {offsets = [0, 0], sizes = [2, 128], strides = [1, 1]} : vector<2x384xf32> to vector<2x128xf32>
    %275 = vector.extract_strided_slice %273 {offsets = [0, 128], sizes = [2, 128], strides = [1, 1]} : vector<2x384xf32> to vector<2x128xf32>
    %276 = vector.extract_strided_slice %273 {offsets = [0, 256], sizes = [2, 128], strides = [1, 1]} : vector<2x384xf32> to vector<2x128xf32>
    %277 = arith.truncf %264 : vector<2x128xf32> to vector<2x128xbf16>
    %c0_88 = arith.constant 0 : index
    %c0_89 = arith.constant 0 : index
    %278 = vector.load %arg2[%c0_88, %c0_89] : memref<128x256xbf16, #tpu.memory_space<vmem>>, vector<128x256xbf16>
    %cst_90 = arith.constant dense<0.000000e+00> : vector<2x256xf32>
    %279 = tpu.matmul %277, %278, %cst_90 {dimension_numbers = #tpu.dot_dimension_numbers<[1], [0], [0], [1], [0, 0, 1, 1], [], []>} : vector<2x128xbf16>, vector<128x256xbf16>, vector<2x256xf32> -> vector<2x256xf32>
    %280 = vector.extract_strided_slice %279 {offsets = [0, 0], sizes = [2, 128], strides = [1, 1]} : vector<2x256xf32> to vector<2x128xf32>
    %281 = arith.addf %274, %280 : vector<2x128xf32>
    %282 = arith.negf %281 : vector<2x128xf32>
    %283 = math.exp %282 : vector<2x128xf32>
    %cst_91 = arith.constant 1.000000e+00 : f32
    %284 = vector.broadcast %cst_91 : f32 to vector<2x128xf32>
    %285 = arith.addf %284, %283 : vector<2x128xf32>
    %286 = arith.divf %284, %285 : vector<2x128xf32>
    %287 = vector.extract_strided_slice %279 {offsets = [0, 128], sizes = [2, 128], strides = [1, 1]} : vector<2x256xf32> to vector<2x128xf32>
    %288 = arith.addf %275, %287 : vector<2x128xf32>
    %289 = arith.negf %288 : vector<2x128xf32>
    %290 = math.exp %289 : vector<2x128xf32>
    %cst_92 = arith.constant 1.000000e+00 : f32
    %291 = vector.broadcast %cst_92 : f32 to vector<2x128xf32>
    %292 = arith.addf %291, %290 : vector<2x128xf32>
    %293 = arith.divf %291, %292 : vector<2x128xf32>
    %294 = arith.mulf %293, %264 : vector<2x128xf32>
    %295 = arith.truncf %294 : vector<2x128xf32> to vector<2x128xbf16>
    %c0_93 = arith.constant 0 : index
    %c0_94 = arith.constant 0 : index
    %296 = vector.load %arg3[%c0_93, %c0_94] : memref<128x128xbf16, #tpu.memory_space<vmem>>, vector<128x128xbf16>
    %cst_95 = arith.constant dense<0.000000e+00> : vector<2x128xf32>
    %297 = tpu.matmul %295, %296, %cst_95 {dimension_numbers = #tpu.dot_dimension_numbers<[1], [0], [0], [1], [0, 0, 1, 1], [], []>} : vector<2x128xbf16>, vector<128x128xbf16>, vector<2x128xf32> -> vector<2x128xf32>
    %298 = arith.addf %276, %297 : vector<2x128xf32>
    %299 = math.tanh %298 : vector<2x128xf32>
    %300 = arith.subf %264, %299 : vector<2x128xf32>
    %301 = arith.mulf %286, %300 : vector<2x128xf32>
    %302 = arith.addf %299, %301 : vector<2x128xf32>
    %303 = arith.truncf %302 : vector<2x128xf32> to vector<2x128xbf16>
    %304 = arith.index_cast %c7_i32 : i32 to index
    %c0_96 = arith.constant 0 : index
    %c0_97 = arith.constant 0 : index
    %305 = vector.load %arg4[%304, %c0_96, %c0_97] : memref<8x2x128xbf16, #tpu.memory_space<vmem>>, vector<1x2x128xbf16>
    %306 = vector.shape_cast %305 : vector<1x2x128xbf16> to vector<2x128xbf16>
    %307 = vector.shape_cast %303 : vector<2x128xbf16> to vector<1x2x128xbf16>
    tpu.vector_store %arg4[%304, %c0_96, %c0_97], %307 {strides = array<i32>} : memref<8x2x128xbf16, #tpu.memory_space<vmem>>, vector<1x2x128xbf16>,
    %c8_i32 = arith.constant 8 : i32
    %c0_98 = arith.constant 0 : index
    %c0_99 = arith.constant 0 : index
    %308 = vector.load %arg5[%c0_98, %c0_99] : memref<2x128xf32, #tpu.memory_space<vmem>>, vector<2x128xf32>
    tpu.vector_store %arg5[%c0_98, %c0_99], %302 {strides = array<i32>} : memref<2x128xf32, #tpu.memory_space<vmem>>, vector<2x128xf32>,
    return
  }
  func.func @transform_0(%arg0: i32) -> (i32, i32, i32) {
    %c0_i32 = arith.constant 0 : i32
    %c0_i32_0 = arith.constant 0 : i32
    %c0_i32_1 = arith.constant 0 : i32
    return %arg0, %c0_i32, %c0_i32_0 : i32, i32, i32
  }
  func.func @transform_1(%arg0: i32) -> (i32, i32) {
    %c0_i32 = arith.constant 0 : i32
    %c0_i32_0 = arith.constant 0 : i32
    %c0_i32_1 = arith.constant 0 : i32
    return %c0_i32, %c0_i32_0 : i32, i32
  }
  func.func @transform_2(%arg0: i32) -> (i32, i32) {
    %c0_i32 = arith.constant 0 : i32
    %c0_i32_0 = arith.constant 0 : i32
    %c0_i32_1 = arith.constant 0 : i32
    return %c0_i32, %c0_i32_0 : i32, i32
  }
  func.func @transform_3(%arg0: i32) -> (i32, i32, i32) {
    %c0_i32 = arith.constant 0 : i32
    %c0_i32_0 = arith.constant 0 : i32
    %c0_i32_1 = arith.constant 0 : i32
    return %arg0, %c0_i32, %c0_i32_0 : i32, i32, i32
  }
}

module attributes {stable_mosaic.version = 11 : i64} {
  func.func @gru_recurrence_kernel(%arg0: i32, %arg1: memref<8x2x384xbf16, #tpu.memory_space<vmem>>, %arg2: memref<128x256xbf16, #tpu.memory_space<vmem>>, %arg3: memref<128x128xbf16, #tpu.memory_space<vmem>>, %arg4: memref<8x2x128xbf16, #tpu.memory_space<vmem>>, %arg5: memref<2x128xf32, #tpu.memory_space<vmem>>) attributes {dimension_semantics = [#tpu.dimension_semantics<arbitrary>], iteration_bounds = array<i64: 1>, scalar_prefetch = 0 : i64, scratch_operands = 1 : i64, tpu.core_type = #tpu.core_type<tc>, window_params = [{transform_indices = @transform_0, window_bounds = array<i64: 8, 2, 384>}, {pipeline_mode = #tpu.pipeline_mode<synchronous>, transform_indices = @transform_1, window_bounds = array<i64: 128, 256>}, {pipeline_mode = #tpu.pipeline_mode<synchronous>, transform_indices = @transform_2, window_bounds = array<i64: 128, 128>}, {transform_indices = @transform_3, window_bounds = array<i64: 8, 2, 128>}]} {
    %c0_i32 = arith.constant 0 : i32
    %0 = arith.cmpi eq, %arg0, %c0_i32 : i32
    %1 = arith.extui %0 : i1 to i32
    %c0_i32_0 = arith.constant 0 : i32
    %2 = arith.cmpi ne, %1, %c0_i32_0 : i32
    scf.if %2 {
      %cst_100 = arith.constant 0.000000e+00 : f32
      %309 = vector.broadcast %cst_100 : f32 to vector<2x128xf32>
      %c0_101 = arith.constant 0 : index
      %c0_102 = arith.constant 0 : index
      %310 = vector.load %arg5[%c0_101, %c0_102] : memref<2x128xf32, #tpu.memory_space<vmem>>, vector<2x128xf32>
      tpu.vector_store %arg5[%c0_101, %c0_102], %309 {strides = array<i32>} : memref<2x128xf32, #tpu.memory_space<vmem>>, vector<2x128xf32>,
    } else {
    }
    %c0 = arith.constant 0 : index
    %c0_1 = arith.constant 0 : index
    %3 = vector.load %arg5[%c0, %c0_1] : memref<2x128xf32, #tpu.memory_space<vmem>>, vector<2x128xf32>
    %c0_i32_2 = arith.constant 0 : i32
    %4 = arith.index_cast %c0_i32_2 : i32 to index
    %c0_3 = arith.constant 0 : index
    %c0_4 = arith.constant 0 : index
    %5 = vector.load %arg1[%4, %c0_3, %c0_4] : memref<8x2x384xbf16, #tpu.memory_space<vmem>>, vector<1x2x384xbf16>
    %6 = vector.shape_cast %5 : vector<1x2x384xbf16> to vector<2x384xbf16>
    %7 = arith.extf %6 : vector<2x384xbf16> to vector<2x384xf32>
    %8 = vector.extract_strided_slice %7 {offsets = [0, 0], sizes = [2, 128], strides = [1, 1]} : vector<2x384xf32> to vector<2x128xf32>
    %9 = vector.extract_strided_slice %7 {offsets = [0, 128], sizes = [2, 128], strides = [1, 1]} : vector<2x384xf32> to vector<2x128xf32>
    %10 = vector.extract_strided_slice %7 {offsets = [0, 256], sizes = [2, 128], strides = [1, 1]} : vector<2x384xf32> to vector<2x128xf32>
    %11 = arith.truncf %3 : vector<2x128xf32> to vector<2x128xbf16>
    %c0_5 = arith.constant 0 : index
    %c0_6 = arith.constant 0 : index
    %12 = vector.load %arg2[%c0_5, %c0_6] : memref<128x256xbf16, #tpu.memory_space<vmem>>, vector<128x256xbf16>
    %cst = arith.constant dense<0.000000e+00> : vector<2x256xf32>
    %13 = tpu.matmul %11, %12, %cst {dimension_numbers = #tpu.dot_dimension_numbers<[1], [0], [0], [1], [0, 0, 1, 1], [], []>} : vector<2x128xbf16>, vector<128x256xbf16>, vector<2x256xf32> -> vector<2x256xf32>
    %14 = vector.extract_strided_slice %13 {offsets = [0, 0], sizes = [2, 128], strides = [1, 1]} : vector<2x256xf32> to vector<2x128xf32>
    %15 = arith.addf %8, %14 : vector<2x128xf32>
    %16 = arith.negf %15 : vector<2x128xf32>
    %17 = math.exp %16 : vector<2x128xf32>
    %cst_7 = arith.constant 1.000000e+00 : f32
    %18 = vector.broadcast %cst_7 : f32 to vector<2x128xf32>
    %19 = arith.addf %18, %17 : vector<2x128xf32>
    %20 = arith.divf %18, %19 : vector<2x128xf32>
    %21 = vector.extract_strided_slice %13 {offsets = [0, 128], sizes = [2, 128], strides = [1, 1]} : vector<2x256xf32> to vector<2x128xf32>
    %22 = arith.addf %9, %21 : vector<2x128xf32>
    %23 = arith.negf %22 : vector<2x128xf32>
    %24 = math.exp %23 : vector<2x128xf32>
    %cst_8 = arith.constant 1.000000e+00 : f32
    %25 = vector.broadcast %cst_8 : f32 to vector<2x128xf32>
    %26 = arith.addf %25, %24 : vector<2x128xf32>
    %27 = arith.divf %25, %26 : vector<2x128xf32>
    %28 = arith.mulf %27, %3 : vector<2x128xf32>
    %29 = arith.truncf %28 : vector<2x128xf32> to vector<2x128xbf16>
    %c0_9 = arith.constant 0 : index
    %c0_10 = arith.constant 0 : index
    %30 = vector.load %arg3[%c0_9, %c0_10] : memref<128x128xbf16, #tpu.memory_space<vmem>>, vector<128x128xbf16>
    %cst_11 = arith.constant dense<0.000000e+00> : vector<2x128xf32>
    %31 = tpu.matmul %29, %30, %cst_11 {dimension_numbers = #tpu.dot_dimension_numbers<[1], [0], [0], [1], [0, 0, 1, 1], [], []>} : vector<2x128xbf16>, vector<128x128xbf16>, vector<2x128xf32> -> vector<2x128xf32>
    %32 = arith.addf %10, %31 : vector<2x128xf32>
    %33 = math.tanh %32 : vector<2x128xf32>
    %34 = arith.subf %3, %33 : vector<2x128xf32>
    %35 = arith.mulf %20, %34 : vector<2x128xf32>
    %36 = arith.addf %33, %35 : vector<2x128xf32>
    %37 = arith.truncf %36 : vector<2x128xf32> to vector<2x128xbf16>
    %38 = arith.index_cast %c0_i32_2 : i32 to index
    %c0_12 = arith.constant 0 : index
    %c0_13 = arith.constant 0 : index
    %39 = vector.load %arg4[%38, %c0_12, %c0_13] : memref<8x2x128xbf16, #tpu.memory_space<vmem>>, vector<1x2x128xbf16>
    %40 = vector.shape_cast %39 : vector<1x2x128xbf16> to vector<2x128xbf16>
    %41 = vector.shape_cast %37 : vector<2x128xbf16> to vector<1x2x128xbf16>
    tpu.vector_store %arg4[%38, %c0_12, %c0_13], %41 {strides = array<i32>} : memref<8x2x128xbf16, #tpu.memory_space<vmem>>, vector<1x2x128xbf16>,
    %c1_i32 = arith.constant 1 : i32
    %42 = arith.index_cast %c1_i32 : i32 to index
    %c0_14 = arith.constant 0 : index
    %c0_15 = arith.constant 0 : index
    %43 = vector.load %arg1[%42, %c0_14, %c0_15] : memref<8x2x384xbf16, #tpu.memory_space<vmem>>, vector<1x2x384xbf16>
    %44 = vector.shape_cast %43 : vector<1x2x384xbf16> to vector<2x384xbf16>
    %45 = arith.extf %44 : vector<2x384xbf16> to vector<2x384xf32>
    %46 = vector.extract_strided_slice %45 {offsets = [0, 0], sizes = [2, 128], strides = [1, 1]} : vector<2x384xf32> to vector<2x128xf32>
    %47 = vector.extract_strided_slice %45 {offsets = [0, 128], sizes = [2, 128], strides = [1, 1]} : vector<2x384xf32> to vector<2x128xf32>
    %48 = vector.extract_strided_slice %45 {offsets = [0, 256], sizes = [2, 128], strides = [1, 1]} : vector<2x384xf32> to vector<2x128xf32>
    %49 = arith.truncf %36 : vector<2x128xf32> to vector<2x128xbf16>
    %c0_16 = arith.constant 0 : index
    %c0_17 = arith.constant 0 : index
    %50 = vector.load %arg2[%c0_16, %c0_17] : memref<128x256xbf16, #tpu.memory_space<vmem>>, vector<128x256xbf16>
    %cst_18 = arith.constant dense<0.000000e+00> : vector<2x256xf32>
    %51 = tpu.matmul %49, %50, %cst_18 {dimension_numbers = #tpu.dot_dimension_numbers<[1], [0], [0], [1], [0, 0, 1, 1], [], []>} : vector<2x128xbf16>, vector<128x256xbf16>, vector<2x256xf32> -> vector<2x256xf32>
    %52 = vector.extract_strided_slice %51 {offsets = [0, 0], sizes = [2, 128], strides = [1, 1]} : vector<2x256xf32> to vector<2x128xf32>
    %53 = arith.addf %46, %52 : vector<2x128xf32>
    %54 = arith.negf %53 : vector<2x128xf32>
    %55 = math.exp %54 : vector<2x128xf32>
    %cst_19 = arith.constant 1.000000e+00 : f32
    %56 = vector.broadcast %cst_19 : f32 to vector<2x128xf32>
    %57 = arith.addf %56, %55 : vector<2x128xf32>
    %58 = arith.divf %56, %57 : vector<2x128xf32>
    %59 = vector.extract_strided_slice %51 {offsets = [0, 128], sizes = [2, 128], strides = [1, 1]} : vector<2x256xf32> to vector<2x128xf32>
    %60 = arith.addf %47, %59 : vector<2x128xf32>
    %61 = arith.negf %60 : vector<2x128xf32>
    %62 = math.exp %61 : vector<2x128xf32>
    %cst_20 = arith.constant 1.000000e+00 : f32
    %63 = vector.broadcast %cst_20 : f32 to vector<2x128xf32>
    %64 = arith.addf %63, %62 : vector<2x128xf32>
    %65 = arith.divf %63, %64 : vector<2x128xf32>
    %66 = arith.mulf %65, %36 : vector<2x128xf32>
    %67 = arith.truncf %66 : vector<2x128xf32> to vector<2x128xbf16>
    %c0_21 = arith.constant 0 : index
    %c0_22 = arith.constant 0 : index
    %68 = vector.load %arg3[%c0_21, %c0_22] : memref<128x128xbf16, #tpu.memory_space<vmem>>, vector<128x128xbf16>
    %cst_23 = arith.constant dense<0.000000e+00> : vector<2x128xf32>
    %69 = tpu.matmul %67, %68, %cst_23 {dimension_numbers = #tpu.dot_dimension_numbers<[1], [0], [0], [1], [0, 0, 1, 1], [], []>} : vector<2x128xbf16>, vector<128x128xbf16>, vector<2x128xf32> -> vector<2x128xf32>
    %70 = arith.addf %48, %69 : vector<2x128xf32>
    %71 = math.tanh %70 : vector<2x128xf32>
    %72 = arith.subf %36, %71 : vector<2x128xf32>
    %73 = arith.mulf %58, %72 : vector<2x128xf32>
    %74 = arith.addf %71, %73 : vector<2x128xf32>
    %75 = arith.truncf %74 : vector<2x128xf32> to vector<2x128xbf16>
    %76 = arith.index_cast %c1_i32 : i32 to index
    %c0_24 = arith.constant 0 : index
    %c0_25 = arith.constant 0 : index
    %77 = vector.load %arg4[%76, %c0_24, %c0_25] : memref<8x2x128xbf16, #tpu.memory_space<vmem>>, vector<1x2x128xbf16>
    %78 = vector.shape_cast %77 : vector<1x2x128xbf16> to vector<2x128xbf16>
    %79 = vector.shape_cast %75 : vector<2x128xbf16> to vector<1x2x128xbf16>
    tpu.vector_store %arg4[%76, %c0_24, %c0_25], %79 {strides = array<i32>} : memref<8x2x128xbf16, #tpu.memory_space<vmem>>, vector<1x2x128xbf16>,
    %c2_i32 = arith.constant 2 : i32
    %80 = arith.index_cast %c2_i32 : i32 to index
    %c0_26 = arith.constant 0 : index
    %c0_27 = arith.constant 0 : index
    %81 = vector.load %arg1[%80, %c0_26, %c0_27] : memref<8x2x384xbf16, #tpu.memory_space<vmem>>, vector<1x2x384xbf16>
    %82 = vector.shape_cast %81 : vector<1x2x384xbf16> to vector<2x384xbf16>
    %83 = arith.extf %82 : vector<2x384xbf16> to vector<2x384xf32>
    %84 = vector.extract_strided_slice %83 {offsets = [0, 0], sizes = [2, 128], strides = [1, 1]} : vector<2x384xf32> to vector<2x128xf32>
    %85 = vector.extract_strided_slice %83 {offsets = [0, 128], sizes = [2, 128], strides = [1, 1]} : vector<2x384xf32> to vector<2x128xf32>
    %86 = vector.extract_strided_slice %83 {offsets = [0, 256], sizes = [2, 128], strides = [1, 1]} : vector<2x384xf32> to vector<2x128xf32>
    %87 = arith.truncf %74 : vector<2x128xf32> to vector<2x128xbf16>
    %c0_28 = arith.constant 0 : index
    %c0_29 = arith.constant 0 : index
    %88 = vector.load %arg2[%c0_28, %c0_29] : memref<128x256xbf16, #tpu.memory_space<vmem>>, vector<128x256xbf16>
    %cst_30 = arith.constant dense<0.000000e+00> : vector<2x256xf32>
    %89 = tpu.matmul %87, %88, %cst_30 {dimension_numbers = #tpu.dot_dimension_numbers<[1], [0], [0], [1], [0, 0, 1, 1], [], []>} : vector<2x128xbf16>, vector<128x256xbf16>, vector<2x256xf32> -> vector<2x256xf32>
    %90 = vector.extract_strided_slice %89 {offsets = [0, 0], sizes = [2, 128], strides = [1, 1]} : vector<2x256xf32> to vector<2x128xf32>
    %91 = arith.addf %84, %90 : vector<2x128xf32>
    %92 = arith.negf %91 : vector<2x128xf32>
    %93 = math.exp %92 : vector<2x128xf32>
    %cst_31 = arith.constant 1.000000e+00 : f32
    %94 = vector.broadcast %cst_31 : f32 to vector<2x128xf32>
    %95 = arith.addf %94, %93 : vector<2x128xf32>
    %96 = arith.divf %94, %95 : vector<2x128xf32>
    %97 = vector.extract_strided_slice %89 {offsets = [0, 128], sizes = [2, 128], strides = [1, 1]} : vector<2x256xf32> to vector<2x128xf32>
    %98 = arith.addf %85, %97 : vector<2x128xf32>
    %99 = arith.negf %98 : vector<2x128xf32>
    %100 = math.exp %99 : vector<2x128xf32>
    %cst_32 = arith.constant 1.000000e+00 : f32
    %101 = vector.broadcast %cst_32 : f32 to vector<2x128xf32>
    %102 = arith.addf %101, %100 : vector<2x128xf32>
    %103 = arith.divf %101, %102 : vector<2x128xf32>
    %104 = arith.mulf %103, %74 : vector<2x128xf32>
    %105 = arith.truncf %104 : vector<2x128xf32> to vector<2x128xbf16>
    %c0_33 = arith.constant 0 : index
    %c0_34 = arith.constant 0 : index
    %106 = vector.load %arg3[%c0_33, %c0_34] : memref<128x128xbf16, #tpu.memory_space<vmem>>, vector<128x128xbf16>
    %cst_35 = arith.constant dense<0.000000e+00> : vector<2x128xf32>
    %107 = tpu.matmul %105, %106, %cst_35 {dimension_numbers = #tpu.dot_dimension_numbers<[1], [0], [0], [1], [0, 0, 1, 1], [], []>} : vector<2x128xbf16>, vector<128x128xbf16>, vector<2x128xf32> -> vector<2x128xf32>
    %108 = arith.addf %86, %107 : vector<2x128xf32>
    %109 = math.tanh %108 : vector<2x128xf32>
    %110 = arith.subf %74, %109 : vector<2x128xf32>
    %111 = arith.mulf %96, %110 : vector<2x128xf32>
    %112 = arith.addf %109, %111 : vector<2x128xf32>
    %113 = arith.truncf %112 : vector<2x128xf32> to vector<2x128xbf16>
    %114 = arith.index_cast %c2_i32 : i32 to index
    %c0_36 = arith.constant 0 : index
    %c0_37 = arith.constant 0 : index
    %115 = vector.load %arg4[%114, %c0_36, %c0_37] : memref<8x2x128xbf16, #tpu.memory_space<vmem>>, vector<1x2x128xbf16>
    %116 = vector.shape_cast %115 : vector<1x2x128xbf16> to vector<2x128xbf16>
    %117 = vector.shape_cast %113 : vector<2x128xbf16> to vector<1x2x128xbf16>
    tpu.vector_store %arg4[%114, %c0_36, %c0_37], %117 {strides = array<i32>} : memref<8x2x128xbf16, #tpu.memory_space<vmem>>, vector<1x2x128xbf16>,
    %c3_i32 = arith.constant 3 : i32
    %118 = arith.index_cast %c3_i32 : i32 to index
    %c0_38 = arith.constant 0 : index
    %c0_39 = arith.constant 0 : index
    %119 = vector.load %arg1[%118, %c0_38, %c0_39] : memref<8x2x384xbf16, #tpu.memory_space<vmem>>, vector<1x2x384xbf16>
    %120 = vector.shape_cast %119 : vector<1x2x384xbf16> to vector<2x384xbf16>
    %121 = arith.extf %120 : vector<2x384xbf16> to vector<2x384xf32>
    %122 = vector.extract_strided_slice %121 {offsets = [0, 0], sizes = [2, 128], strides = [1, 1]} : vector<2x384xf32> to vector<2x128xf32>
    %123 = vector.extract_strided_slice %121 {offsets = [0, 128], sizes = [2, 128], strides = [1, 1]} : vector<2x384xf32> to vector<2x128xf32>
    %124 = vector.extract_strided_slice %121 {offsets = [0, 256], sizes = [2, 128], strides = [1, 1]} : vector<2x384xf32> to vector<2x128xf32>
    %125 = arith.truncf %112 : vector<2x128xf32> to vector<2x128xbf16>
    %c0_40 = arith.constant 0 : index
    %c0_41 = arith.constant 0 : index
    %126 = vector.load %arg2[%c0_40, %c0_41] : memref<128x256xbf16, #tpu.memory_space<vmem>>, vector<128x256xbf16>
    %cst_42 = arith.constant dense<0.000000e+00> : vector<2x256xf32>
    %127 = tpu.matmul %125, %126, %cst_42 {dimension_numbers = #tpu.dot_dimension_numbers<[1], [0], [0], [1], [0, 0, 1, 1], [], []>} : vector<2x128xbf16>, vector<128x256xbf16>, vector<2x256xf32> -> vector<2x256xf32>
    %128 = vector.extract_strided_slice %127 {offsets = [0, 0], sizes = [2, 128], strides = [1, 1]} : vector<2x256xf32> to vector<2x128xf32>
    %129 = arith.addf %122, %128 : vector<2x128xf32>
    %130 = arith.negf %129 : vector<2x128xf32>
    %131 = math.exp %130 : vector<2x128xf32>
    %cst_43 = arith.constant 1.000000e+00 : f32
    %132 = vector.broadcast %cst_43 : f32 to vector<2x128xf32>
    %133 = arith.addf %132, %131 : vector<2x128xf32>
    %134 = arith.divf %132, %133 : vector<2x128xf32>
    %135 = vector.extract_strided_slice %127 {offsets = [0, 128], sizes = [2, 128], strides = [1, 1]} : vector<2x256xf32> to vector<2x128xf32>
    %136 = arith.addf %123, %135 : vector<2x128xf32>
    %137 = arith.negf %136 : vector<2x128xf32>
    %138 = math.exp %137 : vector<2x128xf32>
    %cst_44 = arith.constant 1.000000e+00 : f32
    %139 = vector.broadcast %cst_44 : f32 to vector<2x128xf32>
    %140 = arith.addf %139, %138 : vector<2x128xf32>
    %141 = arith.divf %139, %140 : vector<2x128xf32>
    %142 = arith.mulf %141, %112 : vector<2x128xf32>
    %143 = arith.truncf %142 : vector<2x128xf32> to vector<2x128xbf16>
    %c0_45 = arith.constant 0 : index
    %c0_46 = arith.constant 0 : index
    %144 = vector.load %arg3[%c0_45, %c0_46] : memref<128x128xbf16, #tpu.memory_space<vmem>>, vector<128x128xbf16>
    %cst_47 = arith.constant dense<0.000000e+00> : vector<2x128xf32>
    %145 = tpu.matmul %143, %144, %cst_47 {dimension_numbers = #tpu.dot_dimension_numbers<[1], [0], [0], [1], [0, 0, 1, 1], [], []>} : vector<2x128xbf16>, vector<128x128xbf16>, vector<2x128xf32> -> vector<2x128xf32>
    %146 = arith.addf %124, %145 : vector<2x128xf32>
    %147 = math.tanh %146 : vector<2x128xf32>
    %148 = arith.subf %112, %147 : vector<2x128xf32>
    %149 = arith.mulf %134, %148 : vector<2x128xf32>
    %150 = arith.addf %147, %149 : vector<2x128xf32>
    %151 = arith.truncf %150 : vector<2x128xf32> to vector<2x128xbf16>
    %152 = arith.index_cast %c3_i32 : i32 to index
    %c0_48 = arith.constant 0 : index
    %c0_49 = arith.constant 0 : index
    %153 = vector.load %arg4[%152, %c0_48, %c0_49] : memref<8x2x128xbf16, #tpu.memory_space<vmem>>, vector<1x2x128xbf16>
    %154 = vector.shape_cast %153 : vector<1x2x128xbf16> to vector<2x128xbf16>
    %155 = vector.shape_cast %151 : vector<2x128xbf16> to vector<1x2x128xbf16>
    tpu.vector_store %arg4[%152, %c0_48, %c0_49], %155 {strides = array<i32>} : memref<8x2x128xbf16, #tpu.memory_space<vmem>>, vector<1x2x128xbf16>,
    %c4_i32 = arith.constant 4 : i32
    %156 = arith.index_cast %c4_i32 : i32 to index
    %c0_50 = arith.constant 0 : index
    %c0_51 = arith.constant 0 : index
    %157 = vector.load %arg1[%156, %c0_50, %c0_51] : memref<8x2x384xbf16, #tpu.memory_space<vmem>>, vector<1x2x384xbf16>
    %158 = vector.shape_cast %157 : vector<1x2x384xbf16> to vector<2x384xbf16>
    %159 = arith.extf %158 : vector<2x384xbf16> to vector<2x384xf32>
    %160 = vector.extract_strided_slice %159 {offsets = [0, 0], sizes = [2, 128], strides = [1, 1]} : vector<2x384xf32> to vector<2x128xf32>
    %161 = vector.extract_strided_slice %159 {offsets = [0, 128], sizes = [2, 128], strides = [1, 1]} : vector<2x384xf32> to vector<2x128xf32>
    %162 = vector.extract_strided_slice %159 {offsets = [0, 256], sizes = [2, 128], strides = [1, 1]} : vector<2x384xf32> to vector<2x128xf32>
    %163 = arith.truncf %150 : vector<2x128xf32> to vector<2x128xbf16>
    %c0_52 = arith.constant 0 : index
    %c0_53 = arith.constant 0 : index
    %164 = vector.load %arg2[%c0_52, %c0_53] : memref<128x256xbf16, #tpu.memory_space<vmem>>, vector<128x256xbf16>
    %cst_54 = arith.constant dense<0.000000e+00> : vector<2x256xf32>
    %165 = tpu.matmul %163, %164, %cst_54 {dimension_numbers = #tpu.dot_dimension_numbers<[1], [0], [0], [1], [0, 0, 1, 1], [], []>} : vector<2x128xbf16>, vector<128x256xbf16>, vector<2x256xf32> -> vector<2x256xf32>
    %166 = vector.extract_strided_slice %165 {offsets = [0, 0], sizes = [2, 128], strides = [1, 1]} : vector<2x256xf32> to vector<2x128xf32>
    %167 = arith.addf %160, %166 : vector<2x128xf32>
    %168 = arith.negf %167 : vector<2x128xf32>
    %169 = math.exp %168 : vector<2x128xf32>
    %cst_55 = arith.constant 1.000000e+00 : f32
    %170 = vector.broadcast %cst_55 : f32 to vector<2x128xf32>
    %171 = arith.addf %170, %169 : vector<2x128xf32>
    %172 = arith.divf %170, %171 : vector<2x128xf32>
    %173 = vector.extract_strided_slice %165 {offsets = [0, 128], sizes = [2, 128], strides = [1, 1]} : vector<2x256xf32> to vector<2x128xf32>
    %174 = arith.addf %161, %173 : vector<2x128xf32>
    %175 = arith.negf %174 : vector<2x128xf32>
    %176 = math.exp %175 : vector<2x128xf32>
    %cst_56 = arith.constant 1.000000e+00 : f32
    %177 = vector.broadcast %cst_56 : f32 to vector<2x128xf32>
    %178 = arith.addf %177, %176 : vector<2x128xf32>
    %179 = arith.divf %177, %178 : vector<2x128xf32>
    %180 = arith.mulf %179, %150 : vector<2x128xf32>
    %181 = arith.truncf %180 : vector<2x128xf32> to vector<2x128xbf16>
    %c0_57 = arith.constant 0 : index
    %c0_58 = arith.constant 0 : index
    %182 = vector.load %arg3[%c0_57, %c0_58] : memref<128x128xbf16, #tpu.memory_space<vmem>>, vector<128x128xbf16>
    %cst_59 = arith.constant dense<0.000000e+00> : vector<2x128xf32>
    %183 = tpu.matmul %181, %182, %cst_59 {dimension_numbers = #tpu.dot_dimension_numbers<[1], [0], [0], [1], [0, 0, 1, 1], [], []>} : vector<2x128xbf16>, vector<128x128xbf16>, vector<2x128xf32> -> vector<2x128xf32>
    %184 = arith.addf %162, %183 : vector<2x128xf32>
    %185 = math.tanh %184 : vector<2x128xf32>
    %186 = arith.subf %150, %185 : vector<2x128xf32>
    %187 = arith.mulf %172, %186 : vector<2x128xf32>
    %188 = arith.addf %185, %187 : vector<2x128xf32>
    %189 = arith.truncf %188 : vector<2x128xf32> to vector<2x128xbf16>
    %190 = arith.index_cast %c4_i32 : i32 to index
    %c0_60 = arith.constant 0 : index
    %c0_61 = arith.constant 0 : index
    %191 = vector.load %arg4[%190, %c0_60, %c0_61] : memref<8x2x128xbf16, #tpu.memory_space<vmem>>, vector<1x2x128xbf16>
    %192 = vector.shape_cast %191 : vector<1x2x128xbf16> to vector<2x128xbf16>
    %193 = vector.shape_cast %189 : vector<2x128xbf16> to vector<1x2x128xbf16>
    tpu.vector_store %arg4[%190, %c0_60, %c0_61], %193 {strides = array<i32>} : memref<8x2x128xbf16, #tpu.memory_space<vmem>>, vector<1x2x128xbf16>,
    %c5_i32 = arith.constant 5 : i32
    %194 = arith.index_cast %c5_i32 : i32 to index
    %c0_62 = arith.constant 0 : index
    %c0_63 = arith.constant 0 : index
    %195 = vector.load %arg1[%194, %c0_62, %c0_63] : memref<8x2x384xbf16, #tpu.memory_space<vmem>>, vector<1x2x384xbf16>
    %196 = vector.shape_cast %195 : vector<1x2x384xbf16> to vector<2x384xbf16>
    %197 = arith.extf %196 : vector<2x384xbf16> to vector<2x384xf32>
    %198 = vector.extract_strided_slice %197 {offsets = [0, 0], sizes = [2, 128], strides = [1, 1]} : vector<2x384xf32> to vector<2x128xf32>
    %199 = vector.extract_strided_slice %197 {offsets = [0, 128], sizes = [2, 128], strides = [1, 1]} : vector<2x384xf32> to vector<2x128xf32>
    %200 = vector.extract_strided_slice %197 {offsets = [0, 256], sizes = [2, 128], strides = [1, 1]} : vector<2x384xf32> to vector<2x128xf32>
    %201 = arith.truncf %188 : vector<2x128xf32> to vector<2x128xbf16>
    %c0_64 = arith.constant 0 : index
    %c0_65 = arith.constant 0 : index
    %202 = vector.load %arg2[%c0_64, %c0_65] : memref<128x256xbf16, #tpu.memory_space<vmem>>, vector<128x256xbf16>
    %cst_66 = arith.constant dense<0.000000e+00> : vector<2x256xf32>
    %203 = tpu.matmul %201, %202, %cst_66 {dimension_numbers = #tpu.dot_dimension_numbers<[1], [0], [0], [1], [0, 0, 1, 1], [], []>} : vector<2x128xbf16>, vector<128x256xbf16>, vector<2x256xf32> -> vector<2x256xf32>
    %204 = vector.extract_strided_slice %203 {offsets = [0, 0], sizes = [2, 128], strides = [1, 1]} : vector<2x256xf32> to vector<2x128xf32>
    %205 = arith.addf %198, %204 : vector<2x128xf32>
    %206 = arith.negf %205 : vector<2x128xf32>
    %207 = math.exp %206 : vector<2x128xf32>
    %cst_67 = arith.constant 1.000000e+00 : f32
    %208 = vector.broadcast %cst_67 : f32 to vector<2x128xf32>
    %209 = arith.addf %208, %207 : vector<2x128xf32>
    %210 = arith.divf %208, %209 : vector<2x128xf32>
    %211 = vector.extract_strided_slice %203 {offsets = [0, 128], sizes = [2, 128], strides = [1, 1]} : vector<2x256xf32> to vector<2x128xf32>
    %212 = arith.addf %199, %211 : vector<2x128xf32>
    %213 = arith.negf %212 : vector<2x128xf32>
    %214 = math.exp %213 : vector<2x128xf32>
    %cst_68 = arith.constant 1.000000e+00 : f32
    %215 = vector.broadcast %cst_68 : f32 to vector<2x128xf32>
    %216 = arith.addf %215, %214 : vector<2x128xf32>
    %217 = arith.divf %215, %216 : vector<2x128xf32>
    %218 = arith.mulf %217, %188 : vector<2x128xf32>
    %219 = arith.truncf %218 : vector<2x128xf32> to vector<2x128xbf16>
    %c0_69 = arith.constant 0 : index
    %c0_70 = arith.constant 0 : index
    %220 = vector.load %arg3[%c0_69, %c0_70] : memref<128x128xbf16, #tpu.memory_space<vmem>>, vector<128x128xbf16>
    %cst_71 = arith.constant dense<0.000000e+00> : vector<2x128xf32>
    %221 = tpu.matmul %219, %220, %cst_71 {dimension_numbers = #tpu.dot_dimension_numbers<[1], [0], [0], [1], [0, 0, 1, 1], [], []>} : vector<2x128xbf16>, vector<128x128xbf16>, vector<2x128xf32> -> vector<2x128xf32>
    %222 = arith.addf %200, %221 : vector<2x128xf32>
    %223 = math.tanh %222 : vector<2x128xf32>
    %224 = arith.subf %188, %223 : vector<2x128xf32>
    %225 = arith.mulf %210, %224 : vector<2x128xf32>
    %226 = arith.addf %223, %225 : vector<2x128xf32>
    %227 = arith.truncf %226 : vector<2x128xf32> to vector<2x128xbf16>
    %228 = arith.index_cast %c5_i32 : i32 to index
    %c0_72 = arith.constant 0 : index
    %c0_73 = arith.constant 0 : index
    %229 = vector.load %arg4[%228, %c0_72, %c0_73] : memref<8x2x128xbf16, #tpu.memory_space<vmem>>, vector<1x2x128xbf16>
    %230 = vector.shape_cast %229 : vector<1x2x128xbf16> to vector<2x128xbf16>
    %231 = vector.shape_cast %227 : vector<2x128xbf16> to vector<1x2x128xbf16>
    tpu.vector_store %arg4[%228, %c0_72, %c0_73], %231 {strides = array<i32>} : memref<8x2x128xbf16, #tpu.memory_space<vmem>>, vector<1x2x128xbf16>,
    %c6_i32 = arith.constant 6 : i32
    %232 = arith.index_cast %c6_i32 : i32 to index
    %c0_74 = arith.constant 0 : index
    %c0_75 = arith.constant 0 : index
    %233 = vector.load %arg1[%232, %c0_74, %c0_75] : memref<8x2x384xbf16, #tpu.memory_space<vmem>>, vector<1x2x384xbf16>
    %234 = vector.shape_cast %233 : vector<1x2x384xbf16> to vector<2x384xbf16>
    %235 = arith.extf %234 : vector<2x384xbf16> to vector<2x384xf32>
    %236 = vector.extract_strided_slice %235 {offsets = [0, 0], sizes = [2, 128], strides = [1, 1]} : vector<2x384xf32> to vector<2x128xf32>
    %237 = vector.extract_strided_slice %235 {offsets = [0, 128], sizes = [2, 128], strides = [1, 1]} : vector<2x384xf32> to vector<2x128xf32>
    %238 = vector.extract_strided_slice %235 {offsets = [0, 256], sizes = [2, 128], strides = [1, 1]} : vector<2x384xf32> to vector<2x128xf32>
    %239 = arith.truncf %226 : vector<2x128xf32> to vector<2x128xbf16>
    %c0_76 = arith.constant 0 : index
    %c0_77 = arith.constant 0 : index
    %240 = vector.load %arg2[%c0_76, %c0_77] : memref<128x256xbf16, #tpu.memory_space<vmem>>, vector<128x256xbf16>
    %cst_78 = arith.constant dense<0.000000e+00> : vector<2x256xf32>
    %241 = tpu.matmul %239, %240, %cst_78 {dimension_numbers = #tpu.dot_dimension_numbers<[1], [0], [0], [1], [0, 0, 1, 1], [], []>} : vector<2x128xbf16>, vector<128x256xbf16>, vector<2x256xf32> -> vector<2x256xf32>
    %242 = vector.extract_strided_slice %241 {offsets = [0, 0], sizes = [2, 128], strides = [1, 1]} : vector<2x256xf32> to vector<2x128xf32>
    %243 = arith.addf %236, %242 : vector<2x128xf32>
    %244 = arith.negf %243 : vector<2x128xf32>
    %245 = math.exp %244 : vector<2x128xf32>
    %cst_79 = arith.constant 1.000000e+00 : f32
    %246 = vector.broadcast %cst_79 : f32 to vector<2x128xf32>
    %247 = arith.addf %246, %245 : vector<2x128xf32>
    %248 = arith.divf %246, %247 : vector<2x128xf32>
    %249 = vector.extract_strided_slice %241 {offsets = [0, 128], sizes = [2, 128], strides = [1, 1]} : vector<2x256xf32> to vector<2x128xf32>
    %250 = arith.addf %237, %249 : vector<2x128xf32>
    %251 = arith.negf %250 : vector<2x128xf32>
    %252 = math.exp %251 : vector<2x128xf32>
    %cst_80 = arith.constant 1.000000e+00 : f32
    %253 = vector.broadcast %cst_80 : f32 to vector<2x128xf32>
    %254 = arith.addf %253, %252 : vector<2x128xf32>
    %255 = arith.divf %253, %254 : vector<2x128xf32>
    %256 = arith.mulf %255, %226 : vector<2x128xf32>
    %257 = arith.truncf %256 : vector<2x128xf32> to vector<2x128xbf16>
    %c0_81 = arith.constant 0 : index
    %c0_82 = arith.constant 0 : index
    %258 = vector.load %arg3[%c0_81, %c0_82] : memref<128x128xbf16, #tpu.memory_space<vmem>>, vector<128x128xbf16>
    %cst_83 = arith.constant dense<0.000000e+00> : vector<2x128xf32>
    %259 = tpu.matmul %257, %258, %cst_83 {dimension_numbers = #tpu.dot_dimension_numbers<[1], [0], [0], [1], [0, 0, 1, 1], [], []>} : vector<2x128xbf16>, vector<128x128xbf16>, vector<2x128xf32> -> vector<2x128xf32>
    %260 = arith.addf %238, %259 : vector<2x128xf32>
    %261 = math.tanh %260 : vector<2x128xf32>
    %262 = arith.subf %226, %261 : vector<2x128xf32>
    %263 = arith.mulf %248, %262 : vector<2x128xf32>
    %264 = arith.addf %261, %263 : vector<2x128xf32>
    %265 = arith.truncf %264 : vector<2x128xf32> to vector<2x128xbf16>
    %266 = arith.index_cast %c6_i32 : i32 to index
    %c0_84 = arith.constant 0 : index
    %c0_85 = arith.constant 0 : index
    %267 = vector.load %arg4[%266, %c0_84, %c0_85] : memref<8x2x128xbf16, #tpu.memory_space<vmem>>, vector<1x2x128xbf16>
    %268 = vector.shape_cast %267 : vector<1x2x128xbf16> to vector<2x128xbf16>
    %269 = vector.shape_cast %265 : vector<2x128xbf16> to vector<1x2x128xbf16>
    tpu.vector_store %arg4[%266, %c0_84, %c0_85], %269 {strides = array<i32>} : memref<8x2x128xbf16, #tpu.memory_space<vmem>>, vector<1x2x128xbf16>,
    %c7_i32 = arith.constant 7 : i32
    %270 = arith.index_cast %c7_i32 : i32 to index
    %c0_86 = arith.constant 0 : index
    %c0_87 = arith.constant 0 : index
    %271 = vector.load %arg1[%270, %c0_86, %c0_87] : memref<8x2x384xbf16, #tpu.memory_space<vmem>>, vector<1x2x384xbf16>
    %272 = vector.shape_cast %271 : vector<1x2x384xbf16> to vector<2x384xbf16>
    %273 = arith.extf %272 : vector<2x384xbf16> to vector<2x384xf32>
    %274 = vector.extract_strided_slice %273 {offsets = [0, 0], sizes = [2, 128], strides = [1, 1]} : vector<2x384xf32> to vector<2x128xf32>
    %275 = vector.extract_strided_slice %273 {offsets = [0, 128], sizes = [2, 128], strides = [1, 1]} : vector<2x384xf32> to vector<2x128xf32>
    %276 = vector.extract_strided_slice %273 {offsets = [0, 256], sizes = [2, 128], strides = [1, 1]} : vector<2x384xf32> to vector<2x128xf32>
    %277 = arith.truncf %264 : vector<2x128xf32> to vector<2x128xbf16>
    %c0_88 = arith.constant 0 : index
    %c0_89 = arith.constant 0 : index
    %278 = vector.load %arg2[%c0_88, %c0_89] : memref<128x256xbf16, #tpu.memory_space<vmem>>, vector<128x256xbf16>
    %cst_90 = arith.constant dense<0.000000e+00> : vector<2x256xf32>
    %279 = tpu.matmul %277, %278, %cst_90 {dimension_numbers = #tpu.dot_dimension_numbers<[1], [0], [0], [1], [0, 0, 1, 1], [], []>} : vector<2x128xbf16>, vector<128x256xbf16>, vector<2x256xf32> -> vector<2x256xf32>
    %280 = vector.extract_strided_slice %279 {offsets = [0, 0], sizes = [2, 128], strides = [1, 1]} : vector<2x256xf32> to vector<2x128xf32>
    %281 = arith.addf %274, %280 : vector<2x128xf32>
    %282 = arith.negf %281 : vector<2x128xf32>
    %283 = math.exp %282 : vector<2x128xf32>
    %cst_91 = arith.constant 1.000000e+00 : f32
    %284 = vector.broadcast %cst_91 : f32 to vector<2x128xf32>
    %285 = arith.addf %284, %283 : vector<2x128xf32>
    %286 = arith.divf %284, %285 : vector<2x128xf32>
    %287 = vector.extract_strided_slice %279 {offsets = [0, 128], sizes = [2, 128], strides = [1, 1]} : vector<2x256xf32> to vector<2x128xf32>
    %288 = arith.addf %275, %287 : vector<2x128xf32>
    %289 = arith.negf %288 : vector<2x128xf32>
    %290 = math.exp %289 : vector<2x128xf32>
    %cst_92 = arith.constant 1.000000e+00 : f32
    %291 = vector.broadcast %cst_92 : f32 to vector<2x128xf32>
    %292 = arith.addf %291, %290 : vector<2x128xf32>
    %293 = arith.divf %291, %292 : vector<2x128xf32>
    %294 = arith.mulf %293, %264 : vector<2x128xf32>
    %295 = arith.truncf %294 : vector<2x128xf32> to vector<2x128xbf16>
    %c0_93 = arith.constant 0 : index
    %c0_94 = arith.constant 0 : index
    %296 = vector.load %arg3[%c0_93, %c0_94] : memref<128x128xbf16, #tpu.memory_space<vmem>>, vector<128x128xbf16>
    %cst_95 = arith.constant dense<0.000000e+00> : vector<2x128xf32>
    %297 = tpu.matmul %295, %296, %cst_95 {dimension_numbers = #tpu.dot_dimension_numbers<[1], [0], [0], [1], [0, 0, 1, 1], [], []>} : vector<2x128xbf16>, vector<128x128xbf16>, vector<2x128xf32> -> vector<2x128xf32>
    %298 = arith.addf %276, %297 : vector<2x128xf32>
    %299 = math.tanh %298 : vector<2x128xf32>
    %300 = arith.subf %264, %299 : vector<2x128xf32>
    %301 = arith.mulf %286, %300 : vector<2x128xf32>
    %302 = arith.addf %299, %301 : vector<2x128xf32>
    %303 = arith.truncf %302 : vector<2x128xf32> to vector<2x128xbf16>
    %304 = arith.index_cast %c7_i32 : i32 to index
    %c0_96 = arith.constant 0 : index
    %c0_97 = arith.constant 0 : index
    %305 = vector.load %arg4[%304, %c0_96, %c0_97] : memref<8x2x128xbf16, #tpu.memory_space<vmem>>, vector<1x2x128xbf16>
    %306 = vector.shape_cast %305 : vector<1x2x128xbf16> to vector<2x128xbf16>
    %307 = vector.shape_cast %303 : vector<2x128xbf16> to vector<1x2x128xbf16>
    tpu.vector_store %arg4[%304, %c0_96, %c0_97], %307 {strides = array<i32>} : memref<8x2x128xbf16, #tpu.memory_space<vmem>>, vector<1x2x128xbf16>,
    %c8_i32 = arith.constant 8 : i32
    %c0_98 = arith.constant 0 : index
    %c0_99 = arith.constant 0 : index
    %308 = vector.load %arg5[%c0_98, %c0_99] : memref<2x128xf32, #tpu.memory_space<vmem>>, vector<2x128xf32>
    tpu.vector_store %arg5[%c0_98, %c0_99], %302 {strides = array<i32>} : memref<2x128xf32, #tpu.memory_space<vmem>>, vector<2x128xf32>,
    return
  }
  func.func @transform_0(%arg0: i32) -> (i32, i32, i32) {
    %c0_i32 = arith.constant 0 : i32
    %c0_i32_0 = arith.constant 0 : i32
    %c0_i32_1 = arith.constant 0 : i32
    return %arg0, %c0_i32, %c0_i32_0 : i32, i32, i32
  }
  func.func @transform_1(%arg0: i32) -> (i32, i32) {
    %c0_i32 = arith.constant 0 : i32
    %c0_i32_0 = arith.constant 0 : i32
    %c0_i32_1 = arith.constant 0 : i32
    return %c0_i32, %c0_i32_0 : i32, i32
  }
  func.func @transform_2(%arg0: i32) -> (i32, i32) {
    %c0_i32 = arith.constant 0 : i32
    %c0_i32_0 = arith.constant 0 : i32
    %c0_i32_1 = arith.constant 0 : i32
    return %c0_i32, %c0_i32_0 : i32, i32
  }
  func.func @transform_3(%arg0: i32) -> (i32, i32, i32) {
    %c0_i32 = arith.constant 0 : i32
    %c0_i32_0 = arith.constant 0 : i32
    %c0_i32_1 = arith.constant 0 : i32
    return %arg0, %c0_i32, %c0_i32_0 : i32, i32, i32
  }
}

</mosaic_0001>

<bundles_post_ra>
// kernel: tpu_custom_call.1
= control target key start
LH: loop header
LB: loop body
LE: loop exit
PB: predicated region body
PF: predicated region fallthrough
CT: control target
= control target key end

     0   :  { %8 = vsyncpa [#allocation4], 0  ;;  %s3412_s0 = inlined_call_operand.hbm [shape: bf16[8,2,384], index: 0, kind: input, shape index: {}]   ;;  %s3413_s1 = inlined_call_operand.hbm [shape: bf16[128,256], index: 1, kind: input, shape index: {}]   ;;  %s3414_s2 = inlined_call_operand.hbm [shape: bf16[128,128], index: 2, kind: input, shape index: {}]   ;;  %s3415_s3 = inlined_call_operand.hbm [shape: bf16[8,2,128], index: 3, kind: output, shape index: {}]  }
   0x1   :  { %9 = vsyncpa [#allocation7], 0 }
   0x2   :  { %10 = vsyncpa [#allocation5], 0  ;;  %s3006_s12 = smov [#allocation6]   ;;  %s2912_s16 = scalar_lea.hbm %s3413_s1, 2048 }
   0x3   :  { %s28_s13 = sshll.u32 %s3006_s12, 4  ;;  %p2913_p0 = scmp.ne.s32.totalorder %s3413_s1, %s2912_s16  ;;  %s29_s13 = int_to_ptr.vmem [resolvable:$true] %s28_s13 }
   0x4   :  { %p2916_p1 = scmp.lt.u32.totalorder %s2912_s16, %s3413_s1 }
   0x6   :  { %p2918_p2 = pnand %p2916_p1, %p2913_p0 }
   0x8   :  { %2921 = shalt.err (!%p2918_p2)
}
   0x9   :  { %s2922_s21 = scalar_lea.vmem %s29_s13, 2048  ;;  %p2927_p4 = scmp.lt.s32.totalorder %s29_s13, %s29_s13 }
   0xa   :  { %p2923_p3 = scmp.ne.s32.totalorder %s29_s13, %s2922_s21  ;;  %p2928_p5 = scmp.lt.s32.totalorder %s2922_s21, %s2922_s21 }
   0xc   :  { %p2929_p6 = por %p2928_p5, %p2927_p4 }
   0xe   :  { %p2930_p7 = pnand %p2929_p6, %p2923_p3 }
  0x10   :  { %2933 = shalt.err (!%p2930_p7)
}
  0x11   :  { %s3007_s22 = smov 128   ;;  %s3008_s23 = smov 8  }
  0x12   :  { %34 = dma.hbm_to_vmem [thread:$0]  %s3413_s1, 2048, %s29_s13, [#allocation7], %s3007_s22, %s3007_s22, %s3008_s23  }
  0x13   :  { %s3009_s26 = smov [#allocation3]   ;;  %s2934_s30 = scalar_lea.hbm %s3412_s0, 384 }
  0x14   :  { %s16_s27 = sshll.u32 %s3009_s26, 4  ;;  %p2935_p8 = scmp.ne.s32.totalorder %s3412_s0, %s2934_s30  ;;  %s17_s27 = int_to_ptr.vmem [resolvable:$true] %s16_s27 }
  0x15   :  { %p2938_p9 = scmp.lt.u32.totalorder %s2934_s30, %s3412_s0 }
  0x17   :  { %p2940_p10 = pnand %p2938_p9, %p2935_p8 }
  0x19   :  { %2943 = shalt.err (!%p2940_p10)
}
  0x1a   :  { %s2944_s8 = scalar_lea.vmem %s17_s27, 384  ;;  %p2949_p12 = scmp.lt.s32.totalorder %s17_s27, %s17_s27 }
  0x1b   :  { %p2945_p11 = scmp.ne.s32.totalorder %s17_s27, %s2944_s8  ;;  %p2950_p13 = scmp.lt.s32.totalorder %s2944_s8, %s2944_s8 }
  0x1d   :  { %p2951_p0 = por %p2950_p13, %p2949_p12 }
  0x1f   :  { %p2952_p1 = pnand %p2951_p0, %p2945_p11 }
  0x21   :  { %2955 = shalt.err (!%p2952_p1)
}
  0x22   :  { %s3010_s1 = smov 48   ;;  %s3011_s9 = smov 3  }
  0x23   :  { %22 = dma.hbm_to_vmem [thread:$0]  %s3412_s0, 384, %s17_s27, [#allocation4], %s3010_s1, %s3010_s1, %s3011_s9  }
  0x24   :  { %s3012_s12 = smov [#allocation8]   ;;  %s2956_s16 = scalar_lea.hbm %s3414_s2, 1024 }
  0x25   :  { %s40_s13 = sshll.u32 %s3012_s12, 4  ;;  %p2957_p2 = scmp.ne.s32.totalorder %s3414_s2, %s2956_s16  ;;  %s41_s13 = int_to_ptr.vmem [resolvable:$true] %s40_s13 }
  0x26   :  { %p2960_p3 = scmp.lt.u32.totalorder %s2956_s16, %s3414_s2 }
  0x28   :  { %p2962_p4 = pnand %p2960_p3, %p2957_p2 }
  0x2a   :  { %2965 = shalt.err (!%p2962_p4)
}
  0x2b   :  { %s2966_s21 = scalar_lea.vmem %s41_s13, 1024  ;;  %p2971_p6 = scmp.lt.s32.totalorder %s41_s13, %s41_s13 }
  0x2c   :  { %p2967_p5 = scmp.ne.s32.totalorder %s41_s13, %s2966_s21  ;;  %p2972_p7 = scmp.lt.s32.totalorder %s2966_s21, %s2966_s21 }
  0x2e   :  { %p2973_p8 = por %p2972_p7, %p2971_p6 }
  0x30   :  { %p2974_p9 = pnand %p2973_p8, %p2967_p5 }
  0x32   :  { %2977 = shalt.err (!%p2974_p9)
}
  0x33   :  { %s3013_s0 = smov 64   ;;  %s3014_s22 = smov 4  }
  0x34   :  { %46 = dma.hbm_to_vmem [thread:$0]  %s3414_s2, 1024, %s41_s13, [#allocation7], %s3013_s0, %s3013_s0, %s3014_s22  }
  0x35   :  { %3000 = dma.done.wait [#allocation4], 384  }
  0x36   :  { %3001 = vsyncadd [#allocation4], 4294966912 }
  0x37   :  { %3002 = dma.done.wait [#allocation7], 3072  }
  0x38   :  { %3003 = vsyncadd [#allocation7], 4294964224  ;;  %v3015_v0 = vmov 0   ;;  %v3016_v1 = vmov 0.0   ;;  %v3080_v2 = vld [vmem:[#allocation6 + $0x4] ss:$8 sps:$4 sm:$0xff]  }
  0x39   :  { %194 = vmatprep.mubr.bf16.mxu0 %v3015_v0  ;;  %61 = vst [vmem:[#allocation2] sm:$0x3] %v3016_v1  ;;  %2545 = vmatprep.subr.bf16.mxu1 %v3016_v1  ;;  %v3082_v3 = vld [vmem:[#allocation6] ss:$8 sps:$4 sm:$0xff]   ;;  %v3085_v4 = vld [vmem:[#allocation6 + $0x14] ss:$8 sps:$4 sm:$0xff]  }
  0x3a   :  { %162 = vmatprep.subr.bf16.mxu0 %v3080_v2  ;;  %v3088_v5 = vld [vmem:[#allocation6 + $0x10] ss:$8 sps:$4 sm:$0xff]   ;;  %v3091_v6 = vld [vmem:[#allocation6 + $0x24] ss:$8 sps:$4 sm:$0xff]   ;;  %v3094_v7 = vld [vmem:[#allocation6 + $0x20] ss:$8 sps:$4 sm:$0xff]  }
  0x3b   :  { %163 = vmatpush1.bf16.msra.mxu0 %v3082_v3  ;;  %v3097_v8 = vld [vmem:[#allocation6 + $0x34] ss:$8 sps:$4 sm:$0xff]   ;;  %v3099_v9 = vld [vmem:[#allocation6 + $0x30] ss:$8 sps:$4 sm:$0xff]   ;;  %v3102_v10 = vld [vmem:[#allocation6 + $0x44] ss:$8 sps:$4 sm:$0xff]  }
  0x3c   :  { %164 = vmatprep.subr.bf16.mxu0 %v3085_v4  ;;  %v3105_v11 = vld [vmem:[#allocation6 + $0x40] ss:$8 sps:$4 sm:$0xff]   ;;  %v3107_v12 = vld [vmem:[#allocation6 + $0x54] ss:$8 sps:$4 sm:$0xff]   ;;  %v3111_v13 = vld [vmem:[#allocation6 + $0x50] ss:$8 sps:$4 sm:$0xff]  }
  0x3d   :  { %v3113_v14 = vld [vmem:[#allocation6 + $0x64] ss:$8 sps:$4 sm:$0xff]   ;;  %v3117_v15 = vld [vmem:[#allocation6 + $0x60] ss:$8 sps:$4 sm:$0xff]   ;;  %v3119_v16 = vld [vmem:[#allocation6 + $0x74] ss:$8 sps:$4 sm:$0xff]  }
  0x3e   :  { %v3123_v17 = vld [vmem:[#allocation6 + $0x70] ss:$8 sps:$4 sm:$0xff]   ;;  %v2744_v20 = vld [vmem:[#allocation8] sm:$0xff]   ;;  %v2745_v21 = vld [vmem:[#allocation8 + $0x8] sm:$0xff]   ;;  %vm3017_vm0 = vmmov 0   ;;  %s3018_s2 = smov [#allocation9]  }
  0x3f   :  { %165 = vmatpush1.bf16.msra.mxu0 %v3088_v5  ;;  %2546 = vmatpush3.bf16.msra.mxu1 %v2744_v20  ;;  %v2746_v22 = vld [vmem:[#allocation8 + $0x10] sm:$0xff]   ;;  %v2747_v23 = vld [vmem:[#allocation8 + $0x18] sm:$0xff]   ;;  %v2748_v24 = vld [vmem:[#allocation8 + $0x20] sm:$0xff]   ;;  %s2252_s25 = sshll.u32 %s3018_s2, 4  ;;  %s2253_s25 = int_to_ptr.vmem [resolvable:$true] %s2252_s25 }
  0x40   :  { %166 = vmatprep.subr.bf16.mxu0 %v3091_v6  ;;  %v3125_v18 = vld [vmem:[#allocation2] sm:$0x3]  ;;  %2547 = vmatprep.subr.bf16.mxu1 %v3016_v1  ;;  %v2749_v25 = vld [vmem:[#allocation8 + $0x28] sm:$0xff]   ;;  %v2750_v26 = vld [vmem:[#allocation8 + $0x30] sm:$0xff]   ;;  %s2978_s26 = scalar_lea.vmem %s2253_s25, 128  ;;  %p2983_p11 = scmp.lt.s32.totalorder %s2253_s25, %s2253_s25 }
  0x41   :  { %v65_v19 = vpack.c.bf16 %v3125_v18, %v3125_v18  ;;  %2561 = vmatprep.mubr.msk.bf16.mxu1 %vm3017_vm0, %v3016_v1  ;;  %v2751_v27 = vld [vmem:[#allocation8 + $0x38] sm:$0xff]   ;;  %v63_v28 = vld [vmem:[#allocation3] sm:$0x7]  ;;  %v2752_v58 = vld [vmem:[#allocation8] sm:$0xff]   ;;  %p2979_p10 = scmp.ne.s32.totalorder %s2253_s25, %s2978_s26  ;;  %p2984_p12 = scmp.lt.s32.totalorder %s2978_s26, %s2978_s26 }
  0x42   :  { %v64_v29 = vunpack.c.l.bf16 %v63_v28  ;;  %v2753_v59 = vld [vmem:[#allocation8 + $0x8] sm:$0xff]   ;;  %v2754_v60 = vld [vmem:[#allocation8 + $0x10] sm:$0xff]   ;;  %v2755_v61 = vld [vmem:[#allocation8 + $0x18] sm:$0xff]  }
  0x43   :  { %167 = vmatpush1.bf16.msra.mxu0 %v3094_v7  ;;  %2548 = vmatpush3.bf16.msra.mxu1 %v2745_v21  ;;  %v2756_v62 = vld [vmem:[#allocation8 + $0x20] sm:$0xff]   ;;  %v2757_v63 = vld [vmem:[#allocation8 + $0x28] sm:$0xff]   ;;  %p2985_p13 = por %p2984_p12, %p2983_p11 }
  0x44   :  { %168 = vmatprep.subr.bf16.mxu0 %v3097_v8  ;;  %2549 = vmatprep.subr.bf16.mxu1 %v3016_v1  ;;  %v211_v30 = vrot.slane %v64_v29, 2  ;;  %v326_v44 = vrot.slane %v64_v29, 4  ;;  %v336_v20 = vld [vmem:[#allocation3 + $0x3] sm:$0x7] }
  0x45   :  { %v337_v21 = vunpack.c.l.bf16 %v336_v20  ;;  %p2986_p0 = pnand %p2985_p13, %p2979_p10 }
  0x47   :  { %169 = vmatpush1.bf16.msra.mxu0 %v3099_v9  ;;  %2550 = vmatpush3.bf16.msra.mxu1 %v2746_v22  ;;  %v483_v22 = vrot.slane %v337_v21, 2 }
  0x48   :  { %170 = vmatprep.subr.bf16.mxu0 %v3102_v10  ;;  %2551 = vmatprep.subr.bf16.mxu1 %v3016_v1 }
  0x4b   :  { %171 = vmatpush1.bf16.msra.mxu0 %v3105_v11  ;;  %2552 = vmatpush3.bf16.msra.mxu1 %v2747_v23 }
  0x4c   :  { %172 = vmatprep.subr.bf16.mxu0 %v3107_v12  ;;  %2553 = vmatprep.subr.bf16.mxu1 %v3016_v1 }
  0x4f   :  { %173 = vmatpush1.bf16.msra.mxu0 %v3111_v13  ;;  %2554 = vmatpush3.bf16.msra.mxu1 %v2748_v24 }
  0x50   :  { %174 = vmatprep.subr.bf16.mxu0 %v3113_v14  ;;  %2555 = vmatprep.subr.bf16.mxu1 %v3016_v1 }
  0x53   :  { %175 = vmatpush1.bf16.msra.mxu0 %v3117_v15  ;;  %2556 = vmatpush3.bf16.msra.mxu1 %v2749_v25 }
  0x54   :  { %176 = vmatprep.subr.bf16.mxu0 %v3119_v16  ;;  %2557 = vmatprep.subr.bf16.mxu1 %v3016_v1 }
  0x57   :  { %177 = vmatpush1.bf16.msra.mxu0 %v3123_v17  ;;  %2558 = vmatpush3.bf16.msra.mxu1 %v2750_v26 }
  0x58   :  { %434 = vmatprep.subr.bf16.mxu0 %v3080_v2  ;;  %2559 = vmatprep.subr.bf16.mxu1 %v3016_v1 }
  0x5a   :  { %195 = vmatmul.mubr.bf16.vlgmr.msra.gmra.mrb[0].mxu0 %v65_v19  ;;  %v2759_v19 = vld [vmem:[#allocation8 + $0x38] sm:$0xff]  }
  0x5b   :  { %435 = vmatpush1.bf16.msra.mxu0 %v3082_v3  ;;  %466 = vmatprep.mubr.bf16.mxu0 %v3015_v0 }
  0x5c   :  { %436 = vmatprep.subr.bf16.mxu0 %v3085_v4  ;;  %2560 = vmatpush3.bf16.msra.mxu1 %v2751_v27 }
  0x5d   :  { %2565 = vmatprep.subr.bf16.mxu1 %v3016_v1 }
  0x5f   :  { %437 = vmatpush1.bf16.msra.mxu0 %v3088_v5 }
  0x60   :  { %438 = vmatprep.subr.bf16.mxu0 %v3091_v6 }
  0x63   :  { %439 = vmatpush1.bf16.msra.mxu0 %v3094_v7 }
  0x64   :  { %440 = vmatprep.subr.bf16.mxu0 %v3097_v8 }
  0x67   :  { %441 = vmatpush1.bf16.msra.mxu0 %v3099_v9 }
  0x68   :  { %442 = vmatprep.subr.bf16.mxu0 %v3102_v10 }
  0x6b   :  { %443 = vmatpush1.bf16.msra.mxu0 %v3105_v11 }
  0x6c   :  { %444 = vmatprep.subr.bf16.mxu0 %v3107_v12 }
  0x6f   :  { %445 = vmatpush1.bf16.msra.mxu0 %v3111_v13 }
  0x70   :  { %446 = vmatprep.subr.bf16.mxu0 %v3113_v14 }
  0x73   :  { %447 = vmatpush1.bf16.msra.mxu0 %v3117_v15 }
  0x74   :  { %448 = vmatprep.subr.bf16.mxu0 %v3119_v16 }
  0x77   :  { %449 = vmatpush1.bf16.msra.mxu0 %v3123_v17 }
  0x78   :  { %707 = vmatprep.subr.bf16.mxu0 %v3080_v2 }
 0x12d   :  { %v196_v31 = vpop.f32.mrb[0].mxu0 }
 0x12e   :  { %v198_v32 = vpop.f32.mrb[1].mxu0  ;;  %v203_v42 = vadd.f32 %v196_v31, %v64_v29 }
 0x12f   :  { %v213_v33 = vadd.f32 %v211_v30, %v198_v32  ;;  %v200_v34 = vpop.f32.mrb[2].mxu0 }
 0x130   :  { %v201_v35 = vpop.f32.mrb[3].mxu0  ;;  %v2281_v43 = vmul.f32 -1.442695, %v203_v42 }
 0x131   :  { %v2282_v36 = vmul.f32 -1.442695, %v213_v33 }
 0x133   :  { %2832 = vpow2.f32 %v2282_v36  ;;  %v598_v36 = vrot.slane %v337_v21, 4 }
 0x13d   :  { %v2833_v37 = vpop.eup %2832 }
 0x13e   :  { %v217_v38 = vadd.f32 1.0, %v2833_v37 }
 0x140   :  { %2834 = vrcp.f32 %v217_v38 }
 0x141   :  { %2836 = vpow2.f32 %v2281_v43 }
 0x14a   :  { %v2835_v39 = vpop.eup %2834 }
 0x14b   :  { %v220_v40 = vmul.f32 %v2835_v39, %v3125_v18  ;;  %v2837_v45 = vpop.eup %2836 }
 0x14c   :  { %v207_v47 = vadd.f32 1.0, %v2837_v45 }
 0x14d   :  { %v221_v41 = vpack.c.bf16 %v220_v40, %v220_v40 }
 0x14f   :  { %2562 = vmatmul.mubr.bf16.vlgmr.msra.gmra.mrb[0].mxu1 %v221_v41 }
 0x150   :  { %2581 = vmatprep.mubr.msk.bf16.mxu1 %vm3017_vm0, %v3016_v1  ;;  %2566 = vmatpush3.bf16.msra.mxu1 %v2752_v58 }
 0x151   :  { %2567 = vmatprep.subr.bf16.mxu1 %v3016_v1 }
 0x154   :  { %2568 = vmatpush3.bf16.msra.mxu1 %v2753_v59 }
 0x155   :  { %2569 = vmatprep.subr.bf16.mxu1 %v3016_v1 }
 0x158   :  { %2570 = vmatpush3.bf16.msra.mxu1 %v2754_v60 }
 0x159   :  { %2571 = vmatprep.subr.bf16.mxu1 %v3016_v1 }
 0x15c   :  { %2572 = vmatpush3.bf16.msra.mxu1 %v2755_v61 }
 0x15d   :  { %2573 = vmatprep.subr.bf16.mxu1 %v3016_v1 }
 0x160   :  { %2574 = vmatpush3.bf16.msra.mxu1 %v2756_v62 }
 0x161   :  { %2575 = vmatprep.subr.bf16.mxu1 %v3016_v1 }
 0x164   :  { %2576 = vmatpush3.bf16.msra.mxu1 %v2757_v63 }
 0x165   :  { %2577 = vmatprep.subr.bf16.mxu1 %v3016_v1 }
 0x222   :  { %v320_v46 = vpop.f32.mrb[0].mxu1 }
 0x223   :  { %v328_v48 = vadd.f32 %v326_v44, %v320_v46  ;;  %v2563_v49 = vpop.f32.mrb[1].mxu1 }
 0x224   :  { %v323_v50 = vpop.f32.mrb[2].mxu1 }
 0x225   :  { %2838 = vtanh.f32 %v328_v48  ;;  %v2564_v51 = vpop.f32.mrb[3].mxu1  ;;  %v2760_v50 = vld [vmem:[#allocation8] sm:$0xff]  }
 0x226   :  { %2840 = vrcp.f32 %v207_v47  ;;  %v2761_v51 = vld [vmem:[#allocation8 + $0x8] sm:$0xff]  }
 0x22f   :  { %v2839_v52 = vpop.eup %2838 }
 0x230   :  { %v330_v53 = vsub.f32 %v3125_v18, %v2839_v52  ;;  %v2841_v54 = vpop.eup %2840  ;;  %v2758_v18 = vld [vmem:[#allocation8 + $0x30] sm:$0xff]  }
 0x231   :  { %2578 = vmatpush3.bf16.msra.mxu1 %v2758_v18 }
 0x232   :  { %v331_v55 = vmul.f32 %v2841_v54, %v330_v53  ;;  %2579 = vmatprep.subr.bf16.mxu1 %v3016_v1  ;;  %v2763_v53 = vld [vmem:[#allocation8 + $0x18] sm:$0xff]   ;;  %v2764_v54 = vld [vmem:[#allocation8 + $0x20] sm:$0xff]  }
 0x234   :  { %v3164_v56 = vadd.f32 %v2839_v52, %v331_v55  ;;  %v2762_v52 = vld [vmem:[#allocation8 + $0x10] sm:$0xff]   ;;  %v2765_v55 = vld [vmem:[#allocation8 + $0x28] sm:$0xff]  }
 0x235   :  { %2580 = vmatpush3.bf16.msra.mxu1 %v2759_v19 }
 0x236   :  { %v333_v57 = vpack.c.bf16 %v3164_v56, %v3164_v56  ;;  %2585 = vmatprep.subr.bf16.mxu1 %v3016_v1 }
 0x238   :  { %334 = vst [vmem:[#allocation9] sm:$0x1] %v333_v57  ;;  %467 = vmatmul.mubr.bf16.vlgmr.msra.gmra.mrb[4].mxu0 %v333_v57  ;;  %v609_v57 = vld [vmem:[#allocation3 + $0x6] sm:$0x7] }
 0x239   :  { %708 = vmatpush1.bf16.msra.mxu0 %v3082_v3  ;;  %739 = vmatprep.mubr.bf16.mxu0 %v3015_v0  ;;  %v610_v58 = vunpack.c.l.bf16 %v609_v57 }
 0x23a   :  { %709 = vmatprep.subr.bf16.mxu0 %v3085_v4 }
 0x23b   :  { %v756_v59 = vrot.slane %v610_v58, 2 }
 0x23d   :  { %710 = vmatpush1.bf16.msra.mxu0 %v3088_v5 }
 0x23e   :  { %711 = vmatprep.subr.bf16.mxu0 %v3091_v6 }
 0x241   :  { %712 = vmatpush1.bf16.msra.mxu0 %v3094_v7 }
 0x242   :  { %713 = vmatprep.subr.bf16.mxu0 %v3097_v8 }
 0x245   :  { %714 = vmatpush1.bf16.msra.mxu0 %v3099_v9 }
 0x246   :  { %715 = vmatprep.subr.bf16.mxu0 %v3102_v10 }
 0x249   :  { %716 = vmatpush1.bf16.msra.mxu0 %v3105_v11 }
 0x24a   :  { %717 = vmatprep.subr.bf16.mxu0 %v3107_v12 }
 0x24d   :  { %718 = vmatpush1.bf16.msra.mxu0 %v3111_v13 }
 0x24e   :  { %719 = vmatprep.subr.bf16.mxu0 %v3113_v14 }
 0x251   :  { %720 = vmatpush1.bf16.msra.mxu0 %v3117_v15 }
 0x252   :  { %721 = vmatprep.subr.bf16.mxu0 %v3119_v16 }
 0x255   :  { %722 = vmatpush1.bf16.msra.mxu0 %v3123_v17 }
 0x256   :  { %980 = vmatprep.subr.bf16.mxu0 %v3080_v2 }
 0x30b   :  { %v468_v23 = vpop.f32.mrb[4].mxu0 }
 0x30c   :  { %v470_v24 = vpop.f32.mrb[5].mxu0  ;;  %v475_v34 = vadd.f32 %v468_v23, %v337_v21 }
 0x30d   :  { %v485_v25 = vadd.f32 %v483_v22, %v470_v24  ;;  %v472_v26 = vpop.f32.mrb[6].mxu0 }
 0x30e   :  { %v473_v27 = vpop.f32.mrb[7].mxu0  ;;  %v2307_v35 = vmul.f32 -1.442695, %v475_v34 }
 0x30f   :  { %v2308_v28 = vmul.f32 -1.442695, %v485_v25  ;;  %v871_v27 = vrot.slane %v610_v58, 4 }
 0x311   :  { %2842 = vpow2.f32 %v2308_v28 }
 0x31b   :  { %v2843_v29 = vpop.eup %2842 }
 0x31c   :  { %v489_v30 = vadd.f32 1.0, %v2843_v29 }
 0x31e   :  { %2844 = vrcp.f32 %v489_v30 }
 0x31f   :  { %2846 = vpow2.f32 %v2307_v35 }
 0x328   :  { %v2845_v31 = vpop.eup %2844 }
 0x329   :  { %v492_v32 = vmul.f32 %v2845_v31, %v3164_v56  ;;  %v2847_v37 = vpop.eup %2846 }
 0x32a   :  { %v479_v39 = vadd.f32 1.0, %v2847_v37 }
 0x32b   :  { %v493_v33 = vpack.c.bf16 %v492_v32, %v492_v32 }
 0x32d   :  { %2582 = vmatmul.mubr.bf16.vlgmr.msra.gmra.mrb[4].mxu1 %v493_v33 }
 0x32e   :  { %2601 = vmatprep.mubr.msk.bf16.mxu1 %vm3017_vm0, %v3016_v1  ;;  %2586 = vmatpush3.bf16.msra.mxu1 %v2760_v50 }
 0x32f   :  { %2587 = vmatprep.subr.bf16.mxu1 %v3016_v1 }
 0x332   :  { %2588 = vmatpush3.bf16.msra.mxu1 %v2761_v51 }
 0x333   :  { %2589 = vmatprep.subr.bf16.mxu1 %v3016_v1 }
 0x336   :  { %2590 = vmatpush3.bf16.msra.mxu1 %v2762_v52 }
 0x337   :  { %2591 = vmatprep.subr.bf16.mxu1 %v3016_v1 }
 0x33a   :  { %2592 = vmatpush3.bf16.msra.mxu1 %v2763_v53 }
 0x33b   :  { %2593 = vmatprep.subr.bf16.mxu1 %v3016_v1 }
 0x33e   :  { %2594 = vmatpush3.bf16.msra.mxu1 %v2764_v54 }
 0x33f   :  { %2595 = vmatprep.subr.bf16.mxu1 %v3016_v1 }
 0x342   :  { %2596 = vmatpush3.bf16.msra.mxu1 %v2765_v55 }
 0x343   :  { %2597 = vmatprep.subr.bf16.mxu1 %v3016_v1 }
 0x400   :  { %v592_v38 = vpop.f32.mrb[4].mxu1 }
 0x401   :  { %v600_v40 = vadd.f32 %v598_v36, %v592_v38  ;;  %v2583_v41 = vpop.f32.mrb[5].mxu1 }
 0x402   :  { %v595_v42 = vpop.f32.mrb[6].mxu1 }
 0x403   :  { %2848 = vtanh.f32 %v600_v40  ;;  %v2584_v43 = vpop.f32.mrb[7].mxu1 }
 0x404   :  { %2850 = vrcp.f32 %v479_v39 }
 0x40d   :  { %v2849_v44 = vpop.eup %2848 }
 0x40e   :  { %v602_v45 = vsub.f32 %v3164_v56, %v2849_v44  ;;  %v2851_v46 = vpop.eup %2850  ;;  %v2767_v56 = vld [vmem:[#allocation8 + $0x38] sm:$0xff]  }
 0x410   :  { %v603_v47 = vmul.f32 %v2851_v46, %v602_v45 }
 0x412   :  { %v3197_v48 = vadd.f32 %v2849_v44, %v603_v47 }
 0x414   :  { %v605_v49 = vpack.c.bf16 %v3197_v48, %v3197_v48 }
 0x416   :  { %607 = vst [vmem:[#allocation9 + $0x1] sm:$0x1] %v605_v49  ;;  %740 = vmatmul.mubr.bf16.vlgmr.msra.gmra.mrb[8].mxu0 %v605_v49 }
 0x417   :  { %981 = vmatpush1.bf16.msra.mxu0 %v3082_v3  ;;  %1012 = vmatprep.mubr.bf16.mxu0 %v3015_v0 }
 0x418   :  { %982 = vmatprep.subr.bf16.mxu0 %v3085_v4 }
 0x41b   :  { %983 = vmatpush1.bf16.msra.mxu0 %v3088_v5 }
 0x41c   :  { %984 = vmatprep.subr.bf16.mxu0 %v3091_v6 }
 0x41f   :  { %985 = vmatpush1.bf16.msra.mxu0 %v3094_v7 }
 0x420   :  { %986 = vmatprep.subr.bf16.mxu0 %v3097_v8 }
 0x423   :  { %987 = vmatpush1.bf16.msra.mxu0 %v3099_v9 }
 0x424   :  { %988 = vmatprep.subr.bf16.mxu0 %v3102_v10 }
 0x427   :  { %989 = vmatpush1.bf16.msra.mxu0 %v3105_v11 }
 0x428   :  { %990 = vmatprep.subr.bf16.mxu0 %v3107_v12 }
 0x42b   :  { %991 = vmatpush1.bf16.msra.mxu0 %v3111_v13 }
 0x42c   :  { %992 = vmatprep.subr.bf16.mxu0 %v3113_v14 }
 0x42f   :  { %993 = vmatpush1.bf16.msra.mxu0 %v3117_v15 }
 0x430   :  { %994 = vmatprep.subr.bf16.mxu0 %v3119_v16 }
 0x433   :  { %995 = vmatpush1.bf16.msra.mxu0 %v3123_v17 }
 0x434   :  { %1253 = vmatprep.subr.bf16.mxu0 %v3080_v2  ;;  %v2766_v2 = vld [vmem:[#allocation8 + $0x30] sm:$0xff]  }
 0x435   :  { %2598 = vmatpush3.bf16.msra.mxu1 %v2766_v2 }
 0x436   :  { %2599 = vmatprep.subr.bf16.mxu1 %v3016_v1 }
 0x439   :  { %2600 = vmatpush3.bf16.msra.mxu1 %v2767_v56 }
 0x43a   :  { %2605 = vmatprep.subr.bf16.mxu1 %v3016_v1 }
 0x4e9   :  { %v741_v60 = vpop.f32.mrb[8].mxu0 }
 0x4ea   :  { %v743_v61 = vpop.f32.mrb[9].mxu0  ;;  %v748_v25 = vadd.f32 %v741_v60, %v610_v58 }
 0x4eb   :  { %v758_v62 = vadd.f32 %v756_v59, %v743_v61  ;;  %v745_v63 = vpop.f32.mrb[10].mxu0 }
 0x4ec   :  { %v746_v18 = vpop.f32.mrb[11].mxu0  ;;  %v2333_v26 = vmul.f32 -1.442695, %v748_v25  ;;  %v2776_v63 = vld [vmem:[#allocation8] sm:$0xff]  }
 0x4ed   :  { %v2334_v19 = vmul.f32 -1.442695, %v758_v62  ;;  %v2777_v18 = vld [vmem:[#allocation8 + $0x8] sm:$0xff]  }
 0x4ee   :  { %v3275_v25 = vld [vmem:[#allocation6] ss:$8 sps:$4 sm:$0xff]  }
 0x4ef   :  { %2852 = vpow2.f32 %v2334_v19  ;;  %v2778_v19 = vld [vmem:[#allocation8 + $0x10] sm:$0xff]  }
 0x4f9   :  { %v2853_v20 = vpop.eup %2852 }
 0x4fa   :  { %v762_v21 = vadd.f32 1.0, %v2853_v20  ;;  %v2779_v20 = vld [vmem:[#allocation8 + $0x18] sm:$0xff]  }
 0x4fc   :  { %2854 = vrcp.f32 %v762_v21  ;;  %v2780_v21 = vld [vmem:[#allocation8 + $0x20] sm:$0xff]  }
 0x4fd   :  { %2856 = vpow2.f32 %v2333_v26  ;;  %v3277_v26 = vld [vmem:[#allocation6 + $0x4] ss:$8 sps:$4 sm:$0xff]  }
 0x506   :  { %v2855_v22 = vpop.eup %2854 }
 0x507   :  { %v765_v23 = vmul.f32 %v2855_v22, %v3197_v48  ;;  %v2857_v28 = vpop.eup %2856  ;;  %v2781_v22 = vld [vmem:[#allocation8 + $0x28] sm:$0xff]  }
 0x508   :  { %v752_v30 = vadd.f32 1.0, %v2857_v28  ;;  %v3283_v28 = vld [vmem:[#allocation6 + $0x10] ss:$8 sps:$4 sm:$0xff]  }
 0x509   :  { %v766_v24 = vpack.c.bf16 %v765_v23, %v765_v23  ;;  %v2782_v23 = vld [vmem:[#allocation8 + $0x30] sm:$0xff]  }
 0x50b   :  { %2602 = vmatmul.mubr.bf16.vlgmr.msra.gmra.mrb[8].mxu1 %v766_v24  ;;  %v2783_v24 = vld [vmem:[#allocation8 + $0x38] sm:$0xff]  }
 0x50c   :  { %2621 = vmatprep.mubr.msk.bf16.mxu1 %vm3017_vm0, %v3016_v1 }
 0x5de   :  { %v865_v29 = vpop.f32.mrb[8].mxu1 }
 0x5df   :  { %v873_v31 = vadd.f32 %v871_v27, %v865_v29  ;;  %v2603_v32 = vpop.f32.mrb[9].mxu1  ;;  %v3279_v27 = vld [vmem:[#allocation6 + $0x14] ss:$8 sps:$4 sm:$0xff]   ;;  %v3286_v29 = vld [vmem:[#allocation6 + $0x24] ss:$8 sps:$4 sm:$0xff]  }
 0x5e0   :  { %v868_v33 = vpop.f32.mrb[10].mxu1 }
 0x5e1   :  { %2858 = vtanh.f32 %v873_v31  ;;  %v2604_v34 = vpop.f32.mrb[11].mxu1  ;;  %v1155_v31 = vld [vmem:[#allocation3 + $0xc] sm:$0x7] }
 0x5e2   :  { %2860 = vrcp.f32 %v752_v30  ;;  %v3289_v30 = vld [vmem:[#allocation6 + $0x20] ss:$8 sps:$4 sm:$0xff]   ;;  %v1156_v32 = vunpack.c.l.bf16 %v1155_v31 }
 0x5e4   :  { %v1302_v33 = vrot.slane %v1156_v32, 2 }
 0x5eb   :  { %v2859_v35 = vpop.eup %2858 }
 0x5ec   :  { %v875_v36 = vsub.f32 %v3197_v48, %v2859_v35  ;;  %v2861_v37 = vpop.eup %2860 }
 0x5ee   :  { %v876_v38 = vmul.f32 %v2861_v37, %v875_v36 }
 0x5f0   :  { %v3230_v39 = vadd.f32 %v2859_v35, %v876_v38 }
 0x5f2   :  { %v878_v40 = vpack.c.bf16 %v3230_v39, %v3230_v39 }
 0x5f4   :  { %880 = vst [vmem:[#allocation9 + $0x2] sm:$0x1] %v878_v40  ;;  %1013 = vmatmul.mubr.bf16.vlgmr.msra.gmra.mrb[12].mxu0 %v878_v40 }
 0x5f5   :  { %1254 = vmatpush1.bf16.msra.mxu0 %v3082_v3  ;;  %1285 = vmatprep.mubr.bf16.mxu0 %v3015_v0  ;;  %v2768_v3 = vld [vmem:[#allocation8] sm:$0xff]  }
 0x5f6   :  { %1255 = vmatprep.subr.bf16.mxu0 %v3085_v4  ;;  %2606 = vmatpush3.bf16.msra.mxu1 %v2768_v3  ;;  %v2769_v4 = vld [vmem:[#allocation8 + $0x8] sm:$0xff]  }
 0x5f7   :  { %2607 = vmatprep.subr.bf16.mxu1 %v3016_v1 }
 0x5f9   :  { %1256 = vmatpush1.bf16.msra.mxu0 %v3088_v5  ;;  %v2770_v5 = vld [vmem:[#allocation8 + $0x10] sm:$0xff]  }
 0x5fa   :  { %1257 = vmatprep.subr.bf16.mxu0 %v3091_v6  ;;  %2608 = vmatpush3.bf16.msra.mxu1 %v2769_v4  ;;  %v2771_v6 = vld [vmem:[#allocation8 + $0x18] sm:$0xff]  }
 0x5fb   :  { %2609 = vmatprep.subr.bf16.mxu1 %v3016_v1 }
 0x5fd   :  { %1258 = vmatpush1.bf16.msra.mxu0 %v3094_v7  ;;  %v2772_v7 = vld [vmem:[#allocation8 + $0x20] sm:$0xff]  }
 0x5fe   :  { %1259 = vmatprep.subr.bf16.mxu0 %v3097_v8  ;;  %2610 = vmatpush3.bf16.msra.mxu1 %v2770_v5  ;;  %v2773_v8 = vld [vmem:[#allocation8 + $0x28] sm:$0xff]  }
 0x5ff   :  { %2611 = vmatprep.subr.bf16.mxu1 %v3016_v1 }
 0x601   :  { %1260 = vmatpush1.bf16.msra.mxu0 %v3099_v9  ;;  %v2774_v9 = vld [vmem:[#allocation8 + $0x30] sm:$0xff]  }
 0x602   :  { %1261 = vmatprep.subr.bf16.mxu0 %v3102_v10  ;;  %2612 = vmatpush3.bf16.msra.mxu1 %v2771_v6  ;;  %v2775_v10 = vld [vmem:[#allocation8 + $0x38] sm:$0xff]  }
 0x603   :  { %2613 = vmatprep.subr.bf16.mxu1 %v3016_v1 }
 0x605   :  { %1262 = vmatpush1.bf16.msra.mxu0 %v3105_v11  ;;  %v882_v11 = vld [vmem:[#allocation3 + $0x9] sm:$0x7] }
 0x606   :  { %1263 = vmatprep.subr.bf16.mxu0 %v3107_v12  ;;  %2614 = vmatpush3.bf16.msra.mxu1 %v2772_v7  ;;  %v883_v12 = vunpack.c.l.bf16 %v882_v11  ;;  %v3296_v7 = vld [vmem:[#allocation6 + $0x34] ss:$8 sps:$4 sm:$0xff]  }
 0x607   :  { %2615 = vmatprep.subr.bf16.mxu1 %v3016_v1  ;;  %v3308_v11 = vld [vmem:[#allocation6 + $0x54] ss:$8 sps:$4 sm:$0xff]  }
 0x608   :  { %v1144_v50 = vrot.slane %v883_v12, 4 }
 0x609   :  { %1264 = vmatpush1.bf16.msra.mxu0 %v3111_v13  ;;  %v1029_v13 = vrot.slane %v883_v12, 2 }
 0x60a   :  { %1265 = vmatprep.subr.bf16.mxu0 %v3113_v14  ;;  %2616 = vmatpush3.bf16.msra.mxu1 %v2773_v8  ;;  %v3298_v8 = vld [vmem:[#allocation6 + $0x30] ss:$8 sps:$4 sm:$0xff]  }
 0x60b   :  { %2617 = vmatprep.subr.bf16.mxu1 %v3016_v1 }
 0x60d   :  { %1266 = vmatpush1.bf16.msra.mxu0 %v3117_v15 }
 0x60e   :  { %1267 = vmatprep.subr.bf16.mxu0 %v3119_v16  ;;  %2618 = vmatpush3.bf16.msra.mxu1 %v2774_v9  ;;  %v3302_v9 = vld [vmem:[#allocation6 + $0x44] ss:$8 sps:$4 sm:$0xff]  }
 0x60f   :  { %2619 = vmatprep.subr.bf16.mxu1 %v3016_v1 }
 0x611   :  { %1268 = vmatpush1.bf16.msra.mxu0 %v3123_v17 }
 0x612   :  { %2620 = vmatpush3.bf16.msra.mxu1 %v2775_v10  ;;  %1526 = vmatprep.subr.bf16.mxu0 %v3277_v26  ;;  %v3304_v10 = vld [vmem:[#allocation6 + $0x40] ss:$8 sps:$4 sm:$0xff]  }
 0x613   :  { %2625 = vmatprep.subr.bf16.mxu1 %v3016_v1 }
 0x6c7   :  { %v1014_v14 = vpop.f32.mrb[12].mxu0 }
 0x6c8   :  { %v1016_v15 = vpop.f32.mrb[13].mxu0  ;;  %v1021_v48 = vadd.f32 %v1014_v14, %v883_v12  ;;  %v3310_v12 = vld [vmem:[#allocation6 + $0x50] ss:$8 sps:$4 sm:$0xff]   ;;  %v3316_v14 = vld [vmem:[#allocation6 + $0x60] ss:$8 sps:$4 sm:$0xff]  }
 0x6c9   :  { %v1031_v16 = vadd.f32 %v1029_v13, %v1016_v15  ;;  %v1018_v17 = vpop.f32.mrb[14].mxu0  ;;  %v3314_v13 = vld [vmem:[#allocation6 + $0x64] ss:$8 sps:$4 sm:$0xff]   ;;  %v3319_v15 = vld [vmem:[#allocation6 + $0x74] ss:$8 sps:$4 sm:$0xff]  }
 0x6ca   :  { %v1019_v41 = vpop.f32.mrb[15].mxu0  ;;  %v2359_v49 = vmul.f32 -1.442695, %v1021_v48 }
 0x6cb   :  { %v2360_v42 = vmul.f32 -1.442695, %v1031_v16  ;;  %v3322_v16 = vld [vmem:[#allocation6 + $0x70] ss:$8 sps:$4 sm:$0xff]  }
 0x6cd   :  { %2862 = vpow2.f32 %v2360_v42  ;;  %v1417_v42 = vrot.slane %v1156_v32, 4 }
 0x6d7   :  { %v2863_v43 = vpop.eup %2862 }
 0x6d8   :  { %v1035_v44 = vadd.f32 1.0, %v2863_v43 }
 0x6da   :  { %2864 = vrcp.f32 %v1035_v44 }
 0x6db   :  { %2866 = vpow2.f32 %v2359_v49 }
 0x6e4   :  { %v2865_v45 = vpop.eup %2864 }
 0x6e5   :  { %v1038_v46 = vmul.f32 %v2865_v45, %v3230_v39  ;;  %v2867_v51 = vpop.eup %2866 }
 0x6e6   :  { %v1025_v53 = vadd.f32 1.0, %v2867_v51 }
 0x6e7   :  { %v1039_v47 = vpack.c.bf16 %v1038_v46, %v1038_v46 }
 0x6e9   :  { %2622 = vmatmul.mubr.bf16.vlgmr.msra.gmra.mrb[12].mxu1 %v1039_v47 }
 0x6ea   :  { %2641 = vmatprep.mubr.msk.bf16.mxu1 %vm3017_vm0, %v3016_v1  ;;  %2626 = vmatpush3.bf16.msra.mxu1 %v2776_v63  ;;  %v1428_v63 = vld [vmem:[#allocation3 + $0xf] sm:$0x7] }
 0x6eb   :  { %2627 = vmatprep.subr.bf16.mxu1 %v3016_v1 }
 0x6ee   :  { %2628 = vmatpush3.bf16.msra.mxu1 %v2777_v18  ;;  %v1429_v18 = vunpack.c.l.bf16 %v1428_v63 }
 0x6ef   :  { %2629 = vmatprep.subr.bf16.mxu1 %v3016_v1 }
 0x6f2   :  { %2630 = vmatpush3.bf16.msra.mxu1 %v2778_v19  ;;  %v1575_v19 = vrot.slane %v1429_v18, 2 }
 0x6f3   :  { %2631 = vmatprep.subr.bf16.mxu1 %v3016_v1 }
 0x6f6   :  { %2632 = vmatpush3.bf16.msra.mxu1 %v2779_v20 }
 0x6f7   :  { %2633 = vmatprep.subr.bf16.mxu1 %v3016_v1 }
 0x6fa   :  { %2634 = vmatpush3.bf16.msra.mxu1 %v2780_v21 }
 0x6fb   :  { %2635 = vmatprep.subr.bf16.mxu1 %v3016_v1 }
 0x6fe   :  { %2636 = vmatpush3.bf16.msra.mxu1 %v2781_v22 }
 0x6ff   :  { %2637 = vmatprep.subr.bf16.mxu1 %v3016_v1 }
 0x702   :  { %2638 = vmatpush3.bf16.msra.mxu1 %v2782_v23 }
 0x703   :  { %2639 = vmatprep.subr.bf16.mxu1 %v3016_v1 }
 0x706   :  { %2640 = vmatpush3.bf16.msra.mxu1 %v2783_v24 }
 0x707   :  { %2645 = vmatprep.subr.bf16.mxu1 %v3016_v1 }
 0x7bc   :  { %v1138_v52 = vpop.f32.mrb[12].mxu1 }
 0x7bd   :  { %v1146_v54 = vadd.f32 %v1144_v50, %v1138_v52  ;;  %v2623_v55 = vpop.f32.mrb[13].mxu1 }
 0x7be   :  { %v1141_v2 = vpop.f32.mrb[14].mxu1 }
 0x7bf   :  { %2868 = vtanh.f32 %v1146_v54  ;;  %v2624_v56 = vpop.f32.mrb[15].mxu1  ;;  %v2808_v2 = vld [vmem:[#allocation8] sm:$0xff]  }
 0x7c0   :  { %2870 = vrcp.f32 %v1025_v53  ;;  %v2809_v56 = vld [vmem:[#allocation8 + $0x8] sm:$0xff]  }
 0x7c9   :  { %v2869_v57 = vpop.eup %2868 }
 0x7ca   :  { %v1148_v58 = vsub.f32 %v3230_v39, %v2869_v57  ;;  %v2871_v59 = vpop.eup %2870 }
 0x7cc   :  { %v1149_v60 = vmul.f32 %v2871_v59, %v1148_v58  ;;  %v2811_v58 = vld [vmem:[#allocation8 + $0x18] sm:$0xff]   ;;  %v2812_v59 = vld [vmem:[#allocation8 + $0x20] sm:$0xff]  }
 0x7ce   :  { %v3262_v61 = vadd.f32 %v2869_v57, %v1149_v60  ;;  %v2810_v57 = vld [vmem:[#allocation8 + $0x10] sm:$0xff]   ;;  %v2813_v60 = vld [vmem:[#allocation8 + $0x28] sm:$0xff]  }
 0x7d0   :  { %v1151_v62 = vpack.c.bf16 %v3262_v61, %v3262_v61 }
 0x7d2   :  { %1153 = vst [vmem:[#allocation9 + $0x3] sm:$0x1] %v1151_v62  ;;  %1286 = vmatmul.mubr.bf16.vlgmr.msra.gmra.mrb[16].mxu0 %v1151_v62  ;;  %v2815_v62 = vld [vmem:[#allocation8 + $0x38] sm:$0xff]  }
 0x7d3   :  { %1558 = vmatprep.mubr.bf16.mxu0 %v3015_v0  ;;  %1527 = vmatpush1.bf16.msra.mxu0 %v3275_v25 }
 0x7d4   :  { %1528 = vmatprep.subr.bf16.mxu0 %v3279_v27 }
 0x7d7   :  { %1529 = vmatpush1.bf16.msra.mxu0 %v3283_v28 }
 0x7d8   :  { %1530 = vmatprep.subr.bf16.mxu0 %v3286_v29 }
 0x7db   :  { %1531 = vmatpush1.bf16.msra.mxu0 %v3289_v30 }
 0x7dc   :  { %1532 = vmatprep.subr.bf16.mxu0 %v3296_v7 }
 0x7df   :  { %1533 = vmatpush1.bf16.msra.mxu0 %v3298_v8 }
 0x7e0   :  { %1534 = vmatprep.subr.bf16.mxu0 %v3302_v9 }
 0x7e3   :  { %1535 = vmatpush1.bf16.msra.mxu0 %v3304_v10 }
 0x7e4   :  { %1536 = vmatprep.subr.bf16.mxu0 %v3308_v11 }
 0x7e7   :  { %1537 = vmatpush1.bf16.msra.mxu0 %v3310_v12 }
 0x7e8   :  { %1538 = vmatprep.subr.bf16.mxu0 %v3314_v13 }
 0x7eb   :  { %1539 = vmatpush1.bf16.msra.mxu0 %v3316_v14 }
 0x7ec   :  { %1540 = vmatprep.subr.bf16.mxu0 %v3319_v15 }
 0x7ef   :  { %1541 = vmatpush1.bf16.msra.mxu0 %v3322_v16 }
 0x7f0   :  { %1799 = vmatprep.subr.bf16.mxu0 %v3277_v26 }
 0x8a5   :  { %v1287_v34 = vpop.f32.mrb[16].mxu0 }
 0x8a6   :  { %v1289_v35 = vpop.f32.mrb[17].mxu0  ;;  %v1294_v17 = vadd.f32 %v1287_v34, %v1156_v32 }
 0x8a7   :  { %v1304_v36 = vadd.f32 %v1302_v33, %v1289_v35  ;;  %v1291_v37 = vpop.f32.mrb[18].mxu0 }
 0x8a8   :  { %v1292_v38 = vpop.f32.mrb[19].mxu0  ;;  %v2385_v41 = vmul.f32 -1.442695, %v1294_v17 }
 0x8a9   :  { %v2386_v39 = vmul.f32 -1.442695, %v1304_v36  ;;  %v1690_v38 = vrot.slane %v1429_v18, 4 }
 0x8ab   :  { %2872 = vpow2.f32 %v2386_v39 }
 0x8b5   :  { %v2873_v40 = vpop.eup %2872 }
 0x8b6   :  { %v1308_v3 = vadd.f32 1.0, %v2873_v40 }
 0x8b8   :  { %2874 = vrcp.f32 %v1308_v3 }
 0x8b9   :  { %2876 = vpow2.f32 %v2385_v41 }
 0x8c2   :  { %v2875_v4 = vpop.eup %2874 }
 0x8c3   :  { %v1311_v5 = vmul.f32 %v2875_v4, %v3262_v61  ;;  %v2877_v43 = vpop.eup %2876 }
 0x8c4   :  { %v1298_v45 = vadd.f32 1.0, %v2877_v43 }
 0x8c5   :  { %v1312_v6 = vpack.c.bf16 %v1311_v5, %v1311_v5 }
 0x8c7   :  { %2642 = vmatmul.mubr.bf16.vlgmr.msra.gmra.mrb[16].mxu1 %v1312_v6 }
 0x8c8   :  { %2661 = vmatprep.mubr.msk.bf16.mxu1 %vm3017_vm0, %v3016_v1  ;;  %2646 = vmatpush3.bf16.msra.mxu1 %v2808_v2 }
 0x8c9   :  { %2647 = vmatprep.subr.bf16.mxu1 %v3016_v1 }
 0x8cc   :  { %2648 = vmatpush3.bf16.msra.mxu1 %v2809_v56 }
 0x8cd   :  { %2649 = vmatprep.subr.bf16.mxu1 %v3016_v1 }
 0x8d0   :  { %2650 = vmatpush3.bf16.msra.mxu1 %v2810_v57 }
 0x8d1   :  { %2651 = vmatprep.subr.bf16.mxu1 %v3016_v1 }
 0x8d4   :  { %2652 = vmatpush3.bf16.msra.mxu1 %v2811_v58 }
 0x8d5   :  { %2653 = vmatprep.subr.bf16.mxu1 %v3016_v1 }
 0x8d8   :  { %2654 = vmatpush3.bf16.msra.mxu1 %v2812_v59 }
 0x8d9   :  { %2655 = vmatprep.subr.bf16.mxu1 %v3016_v1 }
 0x8dc   :  { %2656 = vmatpush3.bf16.msra.mxu1 %v2813_v60 }
 0x8dd   :  { %2657 = vmatprep.subr.bf16.mxu1 %v3016_v1 }
 0x99a   :  { %v1411_v44 = vpop.f32.mrb[16].mxu1 }
 0x99b   :  { %v1419_v46 = vadd.f32 %v1417_v42, %v1411_v44  ;;  %v2643_v47 = vpop.f32.mrb[17].mxu1 }
 0x99c   :  { %v1414_v48 = vpop.f32.mrb[18].mxu1 }
 0x99d   :  { %2878 = vtanh.f32 %v1419_v46  ;;  %v2644_v49 = vpop.f32.mrb[19].mxu1 }
 0x99e   :  { %2880 = vrcp.f32 %v1298_v45 }
 0x9a7   :  { %v2879_v50 = vpop.eup %2878 }
 0x9a8   :  { %v1421_v51 = vsub.f32 %v3262_v61, %v2879_v50  ;;  %v2881_v52 = vpop.eup %2880  ;;  %v2814_v61 = vld [vmem:[#allocation8 + $0x30] sm:$0xff]  }
 0x9a9   :  { %2658 = vmatpush3.bf16.msra.mxu1 %v2814_v61 }
 0x9aa   :  { %v1422_v53 = vmul.f32 %v2881_v52, %v1421_v51  ;;  %2659 = vmatprep.subr.bf16.mxu1 %v3016_v1 }
 0x9ac   :  { %v3328_v54 = vadd.f32 %v2879_v50, %v1422_v53 }
 0x9ad   :  { %2660 = vmatpush3.bf16.msra.mxu1 %v2815_v62 }
 0x9ae   :  { %v1424_v55 = vpack.c.bf16 %v3328_v54, %v3328_v54  ;;  %2665 = vmatprep.subr.bf16.mxu1 %v3016_v1 }
 0x9b0   :  { %1426 = vst [vmem:[#allocation9 + $0x4] sm:$0x1] %v1424_v55  ;;  %1559 = vmatmul.mubr.bf16.vlgmr.msra.gmra.mrb[20].mxu0 %v1424_v55 }
 0x9b1   :  { %1800 = vmatpush1.bf16.msra.mxu0 %v3275_v25  ;;  %1831 = vmatprep.mubr.bf16.mxu0 %v3015_v0 }
 0x9b2   :  { %1801 = vmatprep.subr.bf16.mxu0 %v3279_v27 }
 0x9b5   :  { %1802 = vmatpush1.bf16.msra.mxu0 %v3283_v28 }
 0x9b6   :  { %1803 = vmatprep.subr.bf16.mxu0 %v3286_v29 }
 0x9b9   :  { %1804 = vmatpush1.bf16.msra.mxu0 %v3289_v30 }
 0x9ba   :  { %1805 = vmatprep.subr.bf16.mxu0 %v3296_v7 }
 0x9bd   :  { %1806 = vmatpush1.bf16.msra.mxu0 %v3298_v8 }
 0x9be   :  { %1807 = vmatprep.subr.bf16.mxu0 %v3302_v9 }
 0x9c1   :  { %1808 = vmatpush1.bf16.msra.mxu0 %v3304_v10 }
 0x9c2   :  { %1809 = vmatprep.subr.bf16.mxu0 %v3308_v11 }
 0x9c5   :  { %1810 = vmatpush1.bf16.msra.mxu0 %v3310_v12 }
 0x9c6   :  { %1811 = vmatprep.subr.bf16.mxu0 %v3314_v13 }
 0x9c9   :  { %1812 = vmatpush1.bf16.msra.mxu0 %v3316_v14 }
 0x9ca   :  { %1813 = vmatprep.subr.bf16.mxu0 %v3319_v15 }
 0x9cd   :  { %1814 = vmatpush1.bf16.msra.mxu0 %v3322_v16 }
 0x9ce   :  { %2072 = vmatprep.subr.bf16.mxu0 %v3277_v26 }
 0xa83   :  { %v1560_v20 = vpop.f32.mrb[20].mxu0 }
 0xa84   :  { %v1562_v21 = vpop.f32.mrb[21].mxu0  ;;  %v1567_v36 = vadd.f32 %v1560_v20, %v1429_v18 }
 0xa85   :  { %v1577_v22 = vadd.f32 %v1575_v19, %v1562_v21  ;;  %v1564_v23 = vpop.f32.mrb[22].mxu0 }
 0xa86   :  { %v1565_v24 = vpop.f32.mrb[23].mxu0  ;;  %v2411_v37 = vmul.f32 -1.442695, %v1567_v36  ;;  %v2825_v23 = vld [vmem:[#allocation8 + $0x8] sm:$0xff]  }
 0xa87   :  { %v2412_v26 = vmul.f32 -1.442695, %v1577_v22  ;;  %v2824_v22 = vld [vmem:[#allocation8] sm:$0xff]   ;;  %v2826_v24 = vld [vmem:[#allocation8 + $0x10] sm:$0xff]  }
 0xa89   :  { %2882 = vpow2.f32 %v2412_v26  ;;  %v2827_v26 = vld [vmem:[#allocation8 + $0x18] sm:$0xff]  }
 0xa93   :  { %v2883_v31 = vpop.eup %2882 }
 0xa94   :  { %v1581_v32 = vadd.f32 1.0, %v2883_v31  ;;  %v2828_v31 = vld [vmem:[#allocation8 + $0x20] sm:$0xff]  }
 0xa96   :  { %2884 = vrcp.f32 %v1581_v32  ;;  %v2829_v32 = vld [vmem:[#allocation8 + $0x28] sm:$0xff]  }
 0xa97   :  { %2886 = vpow2.f32 %v2411_v37 }
 0xaa0   :  { %v2885_v33 = vpop.eup %2884 }
 0xaa1   :  { %v1584_v34 = vmul.f32 %v2885_v33, %v3328_v54  ;;  %v2887_v39 = vpop.eup %2886  ;;  %v2830_v33 = vld [vmem:[#allocation8 + $0x30] sm:$0xff]  }
 0xaa2   :  { %v1571_v3 = vadd.f32 1.0, %v2887_v39 }
 0xaa3   :  { %v1585_v35 = vpack.c.bf16 %v1584_v34, %v1584_v34  ;;  %v2831_v34 = vld [vmem:[#allocation8 + $0x38] sm:$0xff]  }
 0xaa5   :  { %2662 = vmatmul.mubr.bf16.vlgmr.msra.gmra.mrb[20].mxu1 %v1585_v35  ;;  %v1974_v35 = vld [vmem:[#allocation3 + $0x15] sm:$0x7] }
 0xaa6   :  { %2681 = vmatprep.mubr.msk.bf16.mxu1 %vm3017_vm0, %v3016_v1  ;;  %v1975_v36 = vunpack.c.l.bf16 %v1974_v35 }
 0xaa8   :  { %v2121_v37 = vrot.slane %v1975_v36, 2 }
 0xb78   :  { %v1684_v40 = vpop.f32.mrb[20].mxu1 }
 0xb79   :  { %v1692_v4 = vadd.f32 %v1690_v38, %v1684_v40  ;;  %v2663_v5 = vpop.f32.mrb[21].mxu1 }
 0xb7a   :  { %v1687_v6 = vpop.f32.mrb[22].mxu1 }
 0xb7b   :  { %2888 = vtanh.f32 %v1692_v4  ;;  %v2664_v17 = vpop.f32.mrb[23].mxu1 }
 0xb7c   :  { %2890 = vrcp.f32 %v1571_v3 }
 0xb85   :  { %v2889_v41 = vpop.eup %2888 }
 0xb86   :  { %v1694_v42 = vsub.f32 %v3328_v54, %v2889_v41  ;;  %v2891_v43 = vpop.eup %2890 }
 0xb88   :  { %v1695_v44 = vmul.f32 %v2891_v43, %v1694_v42 }
 0xb8a   :  { %v3361_v45 = vadd.f32 %v2889_v41, %v1695_v44 }
 0xb8c   :  { %v1697_v46 = vpack.c.bf16 %v3361_v45, %v3361_v45 }
 0xb8e   :  { %1699 = vst [vmem:[#allocation9 + $0x5] sm:$0x1] %v1697_v46  ;;  %1832 = vmatmul.mubr.bf16.vlgmr.msra.gmra.mrb[24].mxu0 %v1697_v46 }
 0xb8f   :  { %2073 = vmatpush1.bf16.msra.mxu0 %v3275_v25  ;;  %2104 = vmatprep.mubr.bf16.mxu0 %v3015_v0  ;;  %v2816_v0 = vld [vmem:[#allocation8] sm:$0xff]   ;;  %v2817_v25 = vld [vmem:[#allocation8 + $0x8] sm:$0xff]  }
 0xb90   :  { %2074 = vmatprep.subr.bf16.mxu0 %v3279_v27  ;;  %2666 = vmatpush3.bf16.msra.mxu1 %v2816_v0  ;;  %v2818_v27 = vld [vmem:[#allocation8 + $0x10] sm:$0xff]  }
 0xb91   :  { %2667 = vmatprep.subr.bf16.mxu1 %v3016_v1 }
 0xb93   :  { %2075 = vmatpush1.bf16.msra.mxu0 %v3283_v28  ;;  %v2819_v28 = vld [vmem:[#allocation8 + $0x18] sm:$0xff]  }
 0xb94   :  { %2076 = vmatprep.subr.bf16.mxu0 %v3286_v29  ;;  %2668 = vmatpush3.bf16.msra.mxu1 %v2817_v25  ;;  %v2820_v29 = vld [vmem:[#allocation8 + $0x20] sm:$0xff]  }
 0xb95   :  { %2669 = vmatprep.subr.bf16.mxu1 %v3016_v1 }
 0xb97   :  { %2077 = vmatpush1.bf16.msra.mxu0 %v3289_v30  ;;  %v2821_v30 = vld [vmem:[#allocation8 + $0x28] sm:$0xff]  }
 0xb98   :  { %2078 = vmatprep.subr.bf16.mxu0 %v3296_v7  ;;  %2670 = vmatpush3.bf16.msra.mxu1 %v2818_v27  ;;  %v2822_v7 = vld [vmem:[#allocation8 + $0x30] sm:$0xff]  }
 0xb99   :  { %2671 = vmatprep.subr.bf16.mxu1 %v3016_v1 }
 0xb9b   :  { %2079 = vmatpush1.bf16.msra.mxu0 %v3298_v8  ;;  %v2823_v8 = vld [vmem:[#allocation8 + $0x38] sm:$0xff]  }
 0xb9c   :  { %2080 = vmatprep.subr.bf16.mxu0 %v3302_v9  ;;  %2672 = vmatpush3.bf16.msra.mxu1 %v2819_v28  ;;  %v1701_v9 = vld [vmem:[#allocation3 + $0x12] sm:$0x7] }
 0xb9d   :  { %2673 = vmatprep.subr.bf16.mxu1 %v3016_v1 }
 0xb9f   :  { %2081 = vmatpush1.bf16.msra.mxu0 %v3304_v10  ;;  %v1702_v10 = vunpack.c.l.bf16 %v1701_v9 }
 0xba0   :  { %2082 = vmatprep.subr.bf16.mxu0 %v3308_v11  ;;  %2674 = vmatpush3.bf16.msra.mxu1 %v2820_v29 }
 0xba1   :  { %2675 = vmatprep.subr.bf16.mxu1 %v3016_v1  ;;  %v1848_v11 = vrot.slane %v1702_v10, 2  ;;  %v1963_v55 = vrot.slane %v1702_v10, 4 }
 0xba3   :  { %2083 = vmatpush1.bf16.msra.mxu0 %v3310_v12 }
 0xba4   :  { %2084 = vmatprep.subr.bf16.mxu0 %v3314_v13  ;;  %2676 = vmatpush3.bf16.msra.mxu1 %v2821_v30 }
 0xba5   :  { %2677 = vmatprep.subr.bf16.mxu1 %v3016_v1 }
 0xba7   :  { %2085 = vmatpush1.bf16.msra.mxu0 %v3316_v14 }
 0xba8   :  { %2086 = vmatprep.subr.bf16.mxu0 %v3319_v15  ;;  %2678 = vmatpush3.bf16.msra.mxu1 %v2822_v7 }
 0xba9   :  { %2679 = vmatprep.subr.bf16.mxu1 %v3016_v1 }
 0xbab   :  { %2087 = vmatpush1.bf16.msra.mxu0 %v3322_v16 }
 0xbac   :  { %2680 = vmatpush3.bf16.msra.mxu1 %v2823_v8 }
 0xbad   :  { %2685 = vmatprep.subr.bf16.mxu1 %v3016_v1 }
 0xc61   :  { %v1833_v12 = vpop.f32.mrb[24].mxu0 }
 0xc62   :  { %v1835_v13 = vpop.f32.mrb[25].mxu0  ;;  %v1840_v53 = vadd.f32 %v1833_v12, %v1702_v10 }
 0xc63   :  { %v1850_v14 = vadd.f32 %v1848_v11, %v1835_v13  ;;  %v1837_v15 = vpop.f32.mrb[26].mxu0 }
 0xc64   :  { %v1838_v16 = vpop.f32.mrb[27].mxu0  ;;  %v2437_v54 = vmul.f32 -1.442695, %v1840_v53 }
 0xc65   :  { %v2438_v47 = vmul.f32 -1.442695, %v1850_v14 }
 0xc67   :  { %2892 = vpow2.f32 %v2438_v47 }
 0xc71   :  { %v2893_v48 = vpop.eup %2892 }
 0xc72   :  { %v1854_v49 = vadd.f32 1.0, %v2893_v48 }
 0xc74   :  { %2894 = vrcp.f32 %v1854_v49 }
 0xc75   :  { %2896 = vpow2.f32 %v2437_v54 }
 0xc7e   :  { %v2895_v50 = vpop.eup %2894 }
 0xc7f   :  { %v1857_v51 = vmul.f32 %v2895_v50, %v3361_v45  ;;  %v2897_v2 = vpop.eup %2896 }
 0xc80   :  { %v1844_v57 = vadd.f32 1.0, %v2897_v2 }
 0xc81   :  { %v1858_v52 = vpack.c.bf16 %v1857_v51, %v1857_v51 }
 0xc83   :  { %2682 = vmatmul.mubr.bf16.vlgmr.msra.gmra.mrb[24].mxu1 %v1858_v52 }
 0xc84   :  { %2701 = vmatprep.mubr.msk.bf16.mxu1 %vm3017_vm0, %v3016_v1  ;;  %2686 = vmatpush3.bf16.msra.mxu1 %v2824_v22 }
 0xc85   :  { %2687 = vmatprep.subr.bf16.mxu1 %v3016_v1 }
 0xc88   :  { %2688 = vmatpush3.bf16.msra.mxu1 %v2825_v23 }
 0xc89   :  { %2689 = vmatprep.subr.bf16.mxu1 %v3016_v1 }
 0xc8c   :  { %2690 = vmatpush3.bf16.msra.mxu1 %v2826_v24 }
 0xc8d   :  { %2691 = vmatprep.subr.bf16.mxu1 %v3016_v1 }
 0xc90   :  { %2692 = vmatpush3.bf16.msra.mxu1 %v2827_v26 }
 0xc91   :  { %2693 = vmatprep.subr.bf16.mxu1 %v3016_v1 }
 0xc94   :  { %2694 = vmatpush3.bf16.msra.mxu1 %v2828_v31 }
 0xc95   :  { %2695 = vmatprep.subr.bf16.mxu1 %v3016_v1 }
 0xc98   :  { %2696 = vmatpush3.bf16.msra.mxu1 %v2829_v32 }
 0xc99   :  { %2697 = vmatprep.subr.bf16.mxu1 %v3016_v1 }
 0xc9c   :  { %2698 = vmatpush3.bf16.msra.mxu1 %v2830_v33 }
 0xc9d   :  { %2699 = vmatprep.subr.bf16.mxu1 %v3016_v1 }
 0xca0   :  { %2700 = vmatpush3.bf16.msra.mxu1 %v2831_v34 }
 0xd56   :  { %v1957_v56 = vpop.f32.mrb[24].mxu1 }
 0xd57   :  { %v1965_v58 = vadd.f32 %v1963_v55, %v1957_v56  ;;  %v2683_v59 = vpop.f32.mrb[25].mxu1 }
 0xd58   :  { %v1960_v60 = vpop.f32.mrb[26].mxu1 }
 0xd59   :  { %2898 = vtanh.f32 %v1965_v58  ;;  %v2684_v61 = vpop.f32.mrb[27].mxu1 }
 0xd5a   :  { %2900 = vrcp.f32 %v1844_v57 }
 0xd63   :  { %v2899_v62 = vpop.eup %2898 }
 0xd64   :  { %v1967_v63 = vsub.f32 %v3361_v45, %v2899_v62  ;;  %v2901_v18 = vpop.eup %2900  ;;  %v2236_v45 = vrot.slane %v1975_v36, 4 }
 0xd66   :  { %v1968_v19 = vmul.f32 %v2901_v18, %v1967_v63 }
 0xd68   :  { %v1969_v20 = vadd.f32 %v2899_v62, %v1968_v19 }
 0xd6a   :  { %v1970_v21 = vpack.c.bf16 %v1969_v20, %v1969_v20 }
 0xd6c   :  { %1972 = vst [vmem:[#allocation9 + $0x6] sm:$0x1] %v1970_v21  ;;  %2105 = vmatmul.mubr.bf16.vlgmr.msra.gmra.mrb[28].mxu0 %v1970_v21 }
 0xe3f   :  { %v2106_v38 = vpop.f32.mrb[28].mxu0 }
 0xe40   :  { %v2108_v39 = vpop.f32.mrb[29].mxu0  ;;  %v2113_v44 = vadd.f32 %v2106_v38, %v1975_v36 }
 0xe41   :  { %v2123_v40 = vadd.f32 %v2121_v37, %v2108_v39  ;;  %v2110_v3 = vpop.f32.mrb[30].mxu0 }
 0xe42   :  { %v2111_v4 = vpop.f32.mrb[31].mxu0  ;;  %v2463_v1 = vmul.f32 -1.442695, %v2113_v44 }
 0xe43   :  { %v2464_v5 = vmul.f32 -1.442695, %v2123_v40 }
 0xe45   :  { %2902 = vpow2.f32 %v2464_v5 }
 0xe4f   :  { %v2903_v6 = vpop.eup %2902 }
 0xe50   :  { %v2127_v17 = vadd.f32 1.0, %v2903_v6 }
 0xe52   :  { %2904 = vrcp.f32 %v2127_v17 }
 0xe53   :  { %2906 = vpow2.f32 %v2463_v1 }
 0xe5c   :  { %v2905_v41 = vpop.eup %2904 }
 0xe5d   :  { %v2130_v42 = vmul.f32 %v2905_v41, %v1969_v20  ;;  %v2907_v46 = vpop.eup %2906 }
 0xe5e   :  { %v2117_v25 = vadd.f32 1.0, %v2907_v46 }
 0xe5f   :  { %v2131_v43 = vpack.c.bf16 %v2130_v42, %v2130_v42 }
 0xe61   :  { %2702 = vmatmul.mubr.bf16.vlgmr.msra.gmra.mrb[28].mxu1 %v2131_v43 }
 0xf34   :  { %v2230_v0 = vpop.f32.mrb[28].mxu1 }
 0xf35   :  { %v2238_v27 = vadd.f32 %v2236_v45, %v2230_v0  ;;  %v2703_v28 = vpop.f32.mrb[29].mxu1 }
 0xf36   :  { %v2233_v29 = vpop.f32.mrb[30].mxu1 }
 0xf37   :  { %2908 = vtanh.f32 %v2238_v27  ;;  %v2704_v30 = vpop.f32.mrb[31].mxu1 }
 0xf38   :  { %2910 = vrcp.f32 %v2117_v25 }
 0xf41   :  { %v2909_v7 = vpop.eup %2908 }
 0xf42   :  { %v2240_v8 = vsub.f32 %v1969_v20, %v2909_v7  ;;  %v2911_v9 = vpop.eup %2910 }
 0xf44   :  { %v2241_v10 = vmul.f32 %v2911_v9, %v2240_v8 }
 0xf46   :  { %v2242_v11 = vadd.f32 %v2909_v7, %v2241_v10 }
 0xf48   :  { %v2243_v12 = vpack.c.bf16 %v2242_v11, %v2242_v11  ;;  %2246 = vst [vmem:[#allocation2] sm:$0x3] %v2242_v11 }
 0xf4a   :  { %2245 = vst [vmem:[#allocation9 + $0x7] sm:$0x1] %v2243_v12 }
 0xf4b   :  { %2989 = shalt.err (!%p2986_p0)
}
 0xf4c   :  { %s2990_s29 = scalar_lea.hbm %s3415_s3, 128 }
 0xf4d   :  { %p2991_p1 = scmp.ne.s32.totalorder %s3415_s3, %s2990_s29  ;;  %p2994_p2 = scmp.lt.u32.totalorder %s2990_s29, %s3415_s3 }
 0xf4f   :  { %p2996_p3 = pnand %p2994_p2, %p2991_p1 }
 0xf51   :  { %2999 = shalt.err (!%p2996_p3)
}
 0xf52   :  { %s3019_s7 = smov 16   ;;  %s3020_s8 = smov 1  }
 0xf53   :  { %2258 = dma.vmem_to_hbm [thread:$0]  %s2253_s25, 128, %s3415_s3, [#allocation5], %s3019_s7, %s3019_s7, %s3020_s8  }
 0xf54   :  { %3004 = dma.done.wait [#allocation5], 128  }
 0xf55   :  { %3005 = vsyncadd [#allocation5], 4294967168 }
 0xf56   :  { %2262 = vsyncpa [#allocation4], 1 }
 0xf57   :  { %2263 = vsyncpa [#allocation7], 1 }
 0xf58   :  { %2264 = vsyncpa [#allocation5], 1 }

// kernel: tpu_custom_call.1
= control target key start
LH: loop header
LB: loop body
LE: loop exit
PB: predicated region body
PF: predicated region fallthrough
CT: control target
= control target key end

     0   :  { %8 = vsyncpa [#allocation4], 0  ;;  %s3412_s0 = inlined_call_operand.hbm [shape: bf16[8,2,384], index: 0, kind: input, shape index: {}]   ;;  %s3413_s1 = inlined_call_operand.hbm [shape: bf16[128,256], index: 1, kind: input, shape index: {}]   ;;  %s3414_s2 = inlined_call_operand.hbm [shape: bf16[128,128], index: 2, kind: input, shape index: {}]   ;;  %s3415_s3 = inlined_call_operand.hbm [shape: bf16[8,2,128], index: 3, kind: output, shape index: {}]  }
   0x1   :  { %9 = vsyncpa [#allocation7], 0 }
   0x2   :  { %10 = vsyncpa [#allocation5], 0  ;;  %s3006_s12 = smov [#allocation6]   ;;  %s2912_s16 = scalar_lea.hbm %s3413_s1, 2048 }
   0x3   :  { %s28_s13 = sshll.u32 %s3006_s12, 4  ;;  %p2913_p0 = scmp.ne.s32.totalorder %s3413_s1, %s2912_s16  ;;  %s29_s13 = int_to_ptr.vmem [resolvable:$true] %s28_s13 }
   0x4   :  { %p2916_p1 = scmp.lt.u32.totalorder %s2912_s16, %s3413_s1 }
   0x6   :  { %p2918_p2 = pnand %p2916_p1, %p2913_p0 }
   0x8   :  { %2921 = shalt.err (!%p2918_p2)
}
   0x9   :  { %s2922_s21 = scalar_lea.vmem %s29_s13, 2048  ;;  %p2927_p4 = scmp.lt.s32.totalorder %s29_s13, %s29_s13 }
   0xa   :  { %p2923_p3 = scmp.ne.s32.totalorder %s29_s13, %s2922_s21  ;;  %p2928_p5 = scmp.lt.s32.totalorder %s2922_s21, %s2922_s21 }
   0xc   :  { %p2929_p6 = por %p2928_p5, %p2927_p4 }
   0xe   :  { %p2930_p7 = pnand %p2929_p6, %p2923_p3 }
  0x10   :  { %2933 = shalt.err (!%p2930_p7)
}
  0x11   :  { %s3007_s22 = smov 128   ;;  %s3008_s23 = smov 8  }
  0x12   :  { %34 = dma.hbm_to_vmem [thread:$0]  %s3413_s1, 2048, %s29_s13, [#allocation7], %s3007_s22, %s3007_s22, %s3008_s23  }
  0x13   :  { %s3009_s26 = smov [#allocation3]   ;;  %s2934_s30 = scalar_lea.hbm %s3412_s0, 384 }
  0x14   :  { %s16_s27 = sshll.u32 %s3009_s26, 4  ;;  %p2935_p8 = scmp.ne.s32.totalorder %s3412_s0, %s2934_s30  ;;  %s17_s27 = int_to_ptr.vmem [resolvable:$true] %s16_s27 }
  0x15   :  { %p2938_p9 = scmp.lt.u32.totalorder %s2934_s30, %s3412_s0 }
  0x17   :  { %p2940_p10 = pnand %p2938_p9, %p2935_p8 }
  0x19   :  { %2943 = shalt.err (!%p2940_p10)
}
  0x1a   :  { %s2944_s8 = scalar_lea.vmem %s17_s27, 384  ;;  %p2949_p12 = scmp.lt.s32.totalorder %s17_s27, %s17_s27 }
  0x1b   :  { %p2945_p11 = scmp.ne.s32.totalorder %s17_s27, %s2944_s8  ;;  %p2950_p13 = scmp.lt.s32.totalorder %s2944_s8, %s2944_s8 }
  0x1d   :  { %p2951_p0 = por %p2950_p13, %p2949_p12 }
  0x1f   :  { %p2952_p1 = pnand %p2951_p0, %p2945_p11 }
  0x21   :  { %2955 = shalt.err (!%p2952_p1)
}
  0x22   :  { %s3010_s1 = smov 48   ;;  %s3011_s9 = smov 3  }
  0x23   :  { %22 = dma.hbm_to_vmem [thread:$0]  %s3412_s0, 384, %s17_s27, [#allocation4], %s3010_s1, %s3010_s1, %s3011_s9  }
  0x24   :  { %s3012_s12 = smov [#allocation8]   ;;  %s2956_s16 = scalar_lea.hbm %s3414_s2, 1024 }
  0x25   :  { %s40_s13 = sshll.u32 %s3012_s12, 4  ;;  %p2957_p2 = scmp.ne.s32.totalorder %s3414_s2, %s2956_s16  ;;  %s41_s13 = int_to_ptr.vmem [resolvable:$true] %s40_s13 }
  0x26   :  { %p2960_p3 = scmp.lt.u32.totalorder %s2956_s16, %s3414_s2 }
  0x28   :  { %p2962_p4 = pnand %p2960_p3, %p2957_p2 }
  0x2a   :  { %2965 = shalt.err (!%p2962_p4)
}
  0x2b   :  { %s2966_s21 = scalar_lea.vmem %s41_s13, 1024  ;;  %p2971_p6 = scmp.lt.s32.totalorder %s41_s13, %s41_s13 }
  0x2c   :  { %p2967_p5 = scmp.ne.s32.totalorder %s41_s13, %s2966_s21  ;;  %p2972_p7 = scmp.lt.s32.totalorder %s2966_s21, %s2966_s21 }
  0x2e   :  { %p2973_p8 = por %p2972_p7, %p2971_p6 }
  0x30   :  { %p2974_p9 = pnand %p2973_p8, %p2967_p5 }
  0x32   :  { %2977 = shalt.err (!%p2974_p9)
}
  0x33   :  { %s3013_s0 = smov 64   ;;  %s3014_s22 = smov 4  }
  0x34   :  { %46 = dma.hbm_to_vmem [thread:$0]  %s3414_s2, 1024, %s41_s13, [#allocation7], %s3013_s0, %s3013_s0, %s3014_s22  }
  0x35   :  { %3000 = dma.done.wait [#allocation4], 384  }
  0x36   :  { %3001 = vsyncadd [#allocation4], 4294966912 }
  0x37   :  { %3002 = dma.done.wait [#allocation7], 3072  }
  0x38   :  { %3003 = vsyncadd [#allocation7], 4294964224  ;;  %v3015_v0 = vmov 0   ;;  %v3016_v1 = vmov 0.0   ;;  %v3080_v2 = vld [vmem:[#allocation6 + $0x4] ss:$8 sps:$4 sm:$0xff]  }
  0x39   :  { %194 = vmatprep.mubr.bf16.mxu0 %v3015_v0  ;;  %61 = vst [vmem:[#allocation2] sm:$0x3] %v3016_v1  ;;  %2545 = vmatprep.subr.bf16.mxu1 %v3016_v1  ;;  %v3082_v3 = vld [vmem:[#allocation6] ss:$8 sps:$4 sm:$0xff]   ;;  %v3085_v4 = vld [vmem:[#allocation6 + $0x14] ss:$8 sps:$4 sm:$0xff]  }
  0x3a   :  { %162 = vmatprep.subr.bf16.mxu0 %v3080_v2  ;;  %v3088_v5 = vld [vmem:[#allocation6 + $0x10] ss:$8 sps:$4 sm:$0xff]   ;;  %v3091_v6 = vld [vmem:[#allocation6 + $0x24] ss:$8 sps:$4 sm:$0xff]   ;;  %v3094_v7 = vld [vmem:[#allocation6 + $0x20] ss:$8 sps:$4 sm:$0xff]  }
  0x3b   :  { %163 = vmatpush1.bf16.msra.mxu0 %v3082_v3  ;;  %v3097_v8 = vld [vmem:[#allocation6 + $0x34] ss:$8 sps:$4 sm:$0xff]   ;;  %v3099_v9 = vld [vmem:[#allocation6 + $0x30] ss:$8 sps:$4 sm:$0xff]   ;;  %v3102_v10 = vld [vmem:[#allocation6 + $0x44] ss:$8 sps:$4 sm:$0xff]  }
  0x3c   :  { %164 = vmatprep.subr.bf16.mxu0 %v3085_v4  ;;  %v3105_v11 = vld [vmem:[#allocation6 + $0x40] ss:$8 sps:$4 sm:$0xff]   ;;  %v3107_v12 = vld [vmem:[#allocation6 + $0x54] ss:$8 sps:$4 sm:$0xff]   ;;  %v3111_v13 = vld [vmem:[#allocation6 + $0x50] ss:$8 sps:$4 sm:$0xff]  }
  0x3d   :  { %v3113_v14 = vld [vmem:[#allocation6 + $0x64] ss:$8 sps:$4 sm:$0xff]   ;;  %v3117_v15 = vld [vmem:[#allocation6 + $0x60] ss:$8 sps:$4 sm:$0xff]   ;;  %v3119_v16 = vld [vmem:[#allocation6 + $0x74] ss:$8 sps:$4 sm:$0xff]  }
  0x3e   :  { %v3123_v17 = vld [vmem:[#allocation6 + $0x70] ss:$8 sps:$4 sm:$0xff]   ;;  %v2744_v20 = vld [vmem:[#allocation8] sm:$0xff]   ;;  %v2745_v21 = vld [vmem:[#allocation8 + $0x8] sm:$0xff]   ;;  %vm3017_vm0 = vmmov 0   ;;  %s3018_s2 = smov [#allocation9]  }
  0x3f   :  { %165 = vmatpush1.bf16.msra.mxu0 %v3088_v5  ;;  %2546 = vmatpush3.bf16.msra.mxu1 %v2744_v20  ;;  %v2746_v22 = vld [vmem:[#allocation8 + $0x10] sm:$0xff]   ;;  %v2747_v23 = vld [vmem:[#allocation8 + $0x18] sm:$0xff]   ;;  %v2748_v24 = vld [vmem:[#allocation8 + $0x20] sm:$0xff]   ;;  %s2252_s25 = sshll.u32 %s3018_s2, 4  ;;  %s2253_s25 = int_to_ptr.vmem [resolvable:$true] %s2252_s25 }
  0x40   :  { %166 = vmatprep.subr.bf16.mxu0 %v3091_v6  ;;  %v3125_v18 = vld [vmem:[#allocation2] sm:$0x3]  ;;  %2547 = vmatprep.subr.bf16.mxu1 %v3016_v1  ;;  %v2749_v25 = vld [vmem:[#allocation8 + $0x28] sm:$0xff]   ;;  %v2750_v26 = vld [vmem:[#allocation8 + $0x30] sm:$0xff]   ;;  %s2978_s26 = scalar_lea.vmem %s2253_s25, 128  ;;  %p2983_p11 = scmp.lt.s32.totalorder %s2253_s25, %s2253_s25 }
  0x41   :  { %v65_v19 = vpack.c.bf16 %v3125_v18, %v3125_v18  ;;  %2561 = vmatprep.mubr.msk.bf16.mxu1 %vm3017_vm0, %v3016_v1  ;;  %v2751_v27 = vld [vmem:[#allocation8 + $0x38] sm:$0xff]   ;;  %v63_v28 = vld [vmem:[#allocation3] sm:$0x7]  ;;  %v2752_v58 = vld [vmem:[#allocation8] sm:$0xff]   ;;  %p2979_p10 = scmp.ne.s32.totalorder %s2253_s25, %s2978_s26  ;;  %p2984_p12 = scmp.lt.s32.totalorder %s2978_s26, %s2978_s26 }
  0x42   :  { %v64_v29 = vunpack.c.l.bf16 %v63_v28  ;;  %v2753_v59 = vld [vmem:[#allocation8 + $0x8] sm:$0xff]   ;;  %v2754_v60 = vld [vmem:[#allocation8 + $0x10] sm:$0xff]   ;;  %v2755_v61 = vld [vmem:[#allocation8 + $0x18] sm:$0xff]  }
  0x43   :  { %167 = vmatpush1.bf16.msra.mxu0 %v3094_v7  ;;  %2548 = vmatpush3.bf16.msra.mxu1 %v2745_v21  ;;  %v2756_v62 = vld [vmem:[#allocation8 + $0x20] sm:$0xff]   ;;  %v2757_v63 = vld [vmem:[#allocation8 + $0x28] sm:$0xff]   ;;  %p2985_p13 = por %p2984_p12, %p2983_p11 }
  0x44   :  { %168 = vmatprep.subr.bf16.mxu0 %v3097_v8  ;;  %2549 = vmatprep.subr.bf16.mxu1 %v3016_v1  ;;  %v211_v30 = vrot.slane %v64_v29, 2  ;;  %v326_v44 = vrot.slane %v64_v29, 4  ;;  %v336_v20 = vld [vmem:[#allocation3 + $0x3] sm:$0x7] }
  0x45   :  { %v337_v21 = vunpack.c.l.bf16 %v336_v20  ;;  %p2986_p0 = pnand %p2985_p13, %p2979_p10 }
  0x47   :  { %169 = vmatpush1.bf16.msra.mxu0 %v3099_v9  ;;  %2550 = vmatpush3.bf16.msra.mxu1 %v2746_v22  ;;  %v483_v22 = vrot.slane %v337_v21, 2 }
  0x48   :  { %170 = vmatprep.subr.bf16.mxu0 %v3102_v10  ;;  %2551 = vmatprep.subr.bf16.mxu1 %v3016_v1 }
  0x4b   :  { %171 = vmatpush1.bf16.msra.mxu0 %v3105_v11  ;;  %2552 = vmatpush3.bf16.msra.mxu1 %v2747_v23 }
  0x4c   :  { %172 = vmatprep.subr.bf16.mxu0 %v3107_v12  ;;  %2553 = vmatprep.subr.bf16.mxu1 %v3016_v1 }
  0x4f   :  { %173 = vmatpush1.bf16.msra.mxu0 %v3111_v13  ;;  %2554 = vmatpush3.bf16.msra.mxu1 %v2748_v24 }
  0x50   :  { %174 = vmatprep.subr.bf16.mxu0 %v3113_v14  ;;  %2555 = vmatprep.subr.bf16.mxu1 %v3016_v1 }
  0x53   :  { %175 = vmatpush1.bf16.msra.mxu0 %v3117_v15  ;;  %2556 = vmatpush3.bf16.msra.mxu1 %v2749_v25 }
  0x54   :  { %176 = vmatprep.subr.bf16.mxu0 %v3119_v16  ;;  %2557 = vmatprep.subr.bf16.mxu1 %v3016_v1 }
  0x57   :  { %177 = vmatpush1.bf16.msra.mxu0 %v3123_v17  ;;  %2558 = vmatpush3.bf16.msra.mxu1 %v2750_v26 }
  0x58   :  { %434 = vmatprep.subr.bf16.mxu0 %v3080_v2  ;;  %2559 = vmatprep.subr.bf16.mxu1 %v3016_v1 }
  0x5a   :  { %195 = vmatmul.mubr.bf16.vlgmr.msra.gmra.mrb[0].mxu0 %v65_v19  ;;  %v2759_v19 = vld [vmem:[#allocation8 + $0x38] sm:$0xff]  }
  0x5b   :  { %435 = vmatpush1.bf16.msra.mxu0 %v3082_v3  ;;  %466 = vmatprep.mubr.bf16.mxu0 %v3015_v0 }
  0x5c   :  { %436 = vmatprep.subr.bf16.mxu0 %v3085_v4  ;;  %2560 = vmatpush3.bf16.msra.mxu1 %v2751_v27 }
  0x5d   :  { %2565 = vmatprep.subr.bf16.mxu1 %v3016_v1 }
  0x5f   :  { %437 = vmatpush1.bf16.msra.mxu0 %v3088_v5 }
  0x60   :  { %438 = vmatprep.subr.bf16.mxu0 %v3091_v6 }
  0x63   :  { %439 = vmatpush1.bf16.msra.mxu0 %v3094_v7 }
  0x64   :  { %440 = vmatprep.subr.bf16.mxu0 %v3097_v8 }
  0x67   :  { %441 = vmatpush1.bf16.msra.mxu0 %v3099_v9 }
  0x68   :  { %442 = vmatprep.subr.bf16.mxu0 %v3102_v10 }
  0x6b   :  { %443 = vmatpush1.bf16.msra.mxu0 %v3105_v11 }
  0x6c   :  { %444 = vmatprep.subr.bf16.mxu0 %v3107_v12 }
  0x6f   :  { %445 = vmatpush1.bf16.msra.mxu0 %v3111_v13 }
  0x70   :  { %446 = vmatprep.subr.bf16.mxu0 %v3113_v14 }
  0x73   :  { %447 = vmatpush1.bf16.msra.mxu0 %v3117_v15 }
  0x74   :  { %448 = vmatprep.subr.bf16.mxu0 %v3119_v16 }
  0x77   :  { %449 = vmatpush1.bf16.msra.mxu0 %v3123_v17 }
  0x78   :  { %707 = vmatprep.subr.bf16.mxu0 %v3080_v2 }
 0x12d   :  { %v196_v31 = vpop.f32.mrb[0].mxu0 }
 0x12e   :  { %v198_v32 = vpop.f32.mrb[1].mxu0  ;;  %v203_v42 = vadd.f32 %v196_v31, %v64_v29 }
 0x12f   :  { %v213_v33 = vadd.f32 %v211_v30, %v198_v32  ;;  %v200_v34 = vpop.f32.mrb[2].mxu0 }
 0x130   :  { %v201_v35 = vpop.f32.mrb[3].mxu0  ;;  %v2281_v43 = vmul.f32 -1.442695, %v203_v42 }
 0x131   :  { %v2282_v36 = vmul.f32 -1.442695, %v213_v33 }
 0x133   :  { %2832 = vpow2.f32 %v2282_v36  ;;  %v598_v36 = vrot.slane %v337_v21, 4 }
 0x13d   :  { %v2833_v37 = vpop.eup %2832 }
 0x13e   :  { %v217_v38 = vadd.f32 1.0, %v2833_v37 }
 0x140   :  { %2834 = vrcp.f32 %v217_v38 }
 0x141   :  { %2836 = vpow2.f32 %v2281_v43 }
 0x14a   :  { %v2835_v39 = vpop.eup %2834 }
 0x14b   :  { %v220_v40 = vmul.f32 %v2835_v39, %v3125_v18  ;;  %v2837_v45 = vpop.eup %2836 }
 0x14c   :  { %v207_v47 = vadd.f32 1.0, %v2837_v45 }
 0x14d   :  { %v221_v41 = vpack.c.bf16 %v220_v40, %v220_v40 }
 0x14f   :  { %2562 = vmatmul.mubr.bf16.vlgmr.msra.gmra.mrb[0].mxu1 %v221_v41 }
 0x150   :  { %2581 = vmatprep.mubr.msk.bf16.mxu1 %vm3017_vm0, %v3016_v1  ;;  %2566 = vmatpush3.bf16.msra.mxu1 %v2752_v58 }
 0x151   :  { %2567 = vmatprep.subr.bf16.mxu1 %v3016_v1 }
 0x154   :  { %2568 = vmatpush3.bf16.msra.mxu1 %v2753_v59 }
 0x155   :  { %2569 = vmatprep.subr.bf16.mxu1 %v3016_v1 }
 0x158   :  { %2570 = vmatpush3.bf16.msra.mxu1 %v2754_v60 }
 0x159   :  { %2571 = vmatprep.subr.bf16.mxu1 %v3016_v1 }
 0x15c   :  { %2572 = vmatpush3.bf16.msra.mxu1 %v2755_v61 }
 0x15d   :  { %2573 = vmatprep.subr.bf16.mxu1 %v3016_v1 }
 0x160   :  { %2574 = vmatpush3.bf16.msra.mxu1 %v2756_v62 }
 0x161   :  { %2575 = vmatprep.subr.bf16.mxu1 %v3016_v1 }
 0x164   :  { %2576 = vmatpush3.bf16.msra.mxu1 %v2757_v63 }
 0x165   :  { %2577 = vmatprep.subr.bf16.mxu1 %v3016_v1 }
 0x222   :  { %v320_v46 = vpop.f32.mrb[0].mxu1 }
 0x223   :  { %v328_v48 = vadd.f32 %v326_v44, %v320_v46  ;;  %v2563_v49 = vpop.f32.mrb[1].mxu1 }
 0x224   :  { %v323_v50 = vpop.f32.mrb[2].mxu1 }
 0x225   :  { %2838 = vtanh.f32 %v328_v48  ;;  %v2564_v51 = vpop.f32.mrb[3].mxu1  ;;  %v2760_v50 = vld [vmem:[#allocation8] sm:$0xff]  }
 0x226   :  { %2840 = vrcp.f32 %v207_v47  ;;  %v2761_v51 = vld [vmem:[#allocation8 + $0x8] sm:$0xff]  }
 0x22f   :  { %v2839_v52 = vpop.eup %2838 }
 0x230   :  { %v330_v53 = vsub.f32 %v3125_v18, %v2839_v52  ;;  %v2841_v54 = vpop.eup %2840  ;;  %v2758_v18 = vld [vmem:[#allocation8 + $0x30] sm:$0xff]  }
 0x231   :  { %2578 = vmatpush3.bf16.msra.mxu1 %v2758_v18 }
 0x232   :  { %v331_v55 = vmul.f32 %v2841_v54, %v330_v53  ;;  %2579 = vmatprep.subr.bf16.mxu1 %v3016_v1  ;;  %v2763_v53 = vld [vmem:[#allocation8 + $0x18] sm:$0xff]   ;;  %v2764_v54 = vld [vmem:[#allocation8 + $0x20] sm:$0xff]  }
 0x234   :  { %v3164_v56 = vadd.f32 %v2839_v52, %v331_v55  ;;  %v2762_v52 = vld [vmem:[#allocation8 + $0x10] sm:$0xff]   ;;  %v2765_v55 = vld [vmem:[#allocation8 + $0x28] sm:$0xff]  }
 0x235   :  { %2580 = vmatpush3.bf16.msra.mxu1 %v2759_v19 }
 0x236   :  { %v333_v57 = vpack.c.bf16 %v3164_v56, %v3164_v56  ;;  %2585 = vmatprep.subr.bf16.mxu1 %v3016_v1 }
 0x238   :  { %334 = vst [vmem:[#allocation9] sm:$0x1] %v333_v57  ;;  %467 = vmatmul.mubr.bf16.vlgmr.msra.gmra.mrb[4].mxu0 %v333_v57  ;;  %v609_v57 = vld [vmem:[#allocation3 + $0x6] sm:$0x7] }
 0x239   :  { %708 = vmatpush1.bf16.msra.mxu0 %v3082_v3  ;;  %739 = vmatprep.mubr.bf16.mxu0 %v3015_v0  ;;  %v610_v58 = vunpack.c.l.bf16 %v609_v57 }
 0x23a   :  { %709 = vmatprep.subr.bf16.mxu0 %v3085_v4 }
 0x23b   :  { %v756_v59 = vrot.slane %v610_v58, 2 }
 0x23d   :  { %710 = vmatpush1.bf16.msra.mxu0 %v3088_v5 }
 0x23e   :  { %711 = vmatprep.subr.bf16.mxu0 %v3091_v6 }
 0x241   :  { %712 = vmatpush1.bf16.msra.mxu0 %v3094_v7 }
 0x242   :  { %713 = vmatprep.subr.bf16.mxu0 %v3097_v8 }
 0x245   :  { %714 = vmatpush1.bf16.msra.mxu0 %v3099_v9 }
 0x246   :  { %715 = vmatprep.subr.bf16.mxu0 %v3102_v10 }
 0x249   :  { %716 = vmatpush1.bf16.msra.mxu0 %v3105_v11 }
 0x24a   :  { %717 = vmatprep.subr.bf16.mxu0 %v3107_v12 }
 0x24d   :  { %718 = vmatpush1.bf16.msra.mxu0 %v3111_v13 }
 0x24e   :  { %719 = vmatprep.subr.bf16.mxu0 %v3113_v14 }
 0x251   :  { %720 = vmatpush1.bf16.msra.mxu0 %v3117_v15 }
 0x252   :  { %721 = vmatprep.subr.bf16.mxu0 %v3119_v16 }
 0x255   :  { %722 = vmatpush1.bf16.msra.mxu0 %v3123_v17 }
 0x256   :  { %980 = vmatprep.subr.bf16.mxu0 %v3080_v2 }
 0x30b   :  { %v468_v23 = vpop.f32.mrb[4].mxu0 }
 0x30c   :  { %v470_v24 = vpop.f32.mrb[5].mxu0  ;;  %v475_v34 = vadd.f32 %v468_v23, %v337_v21 }
 0x30d   :  { %v485_v25 = vadd.f32 %v483_v22, %v470_v24  ;;  %v472_v26 = vpop.f32.mrb[6].mxu0 }
 0x30e   :  { %v473_v27 = vpop.f32.mrb[7].mxu0  ;;  %v2307_v35 = vmul.f32 -1.442695, %v475_v34 }
 0x30f   :  { %v2308_v28 = vmul.f32 -1.442695, %v485_v25  ;;  %v871_v27 = vrot.slane %v610_v58, 4 }
 0x311   :  { %2842 = vpow2.f32 %v2308_v28 }
 0x31b   :  { %v2843_v29 = vpop.eup %2842 }
 0x31c   :  { %v489_v30 = vadd.f32 1.0, %v2843_v29 }
 0x31e   :  { %2844 = vrcp.f32 %v489_v30 }
 0x31f   :  { %2846 = vpow2.f32 %v2307_v35 }
 0x328   :  { %v2845_v31 = vpop.eup %2844 }
 0x329   :  { %v492_v32 = vmul.f32 %v2845_v31, %v3164_v56  ;;  %v2847_v37 = vpop.eup %2846 }
 0x32a   :  { %v479_v39 = vadd.f32 1.0, %v2847_v37 }
 0x32b   :  { %v493_v33 = vpack.c.bf16 %v492_v32, %v492_v32 }
 0x32d   :  { %2582 = vmatmul.mubr.bf16.vlgmr.msra.gmra.mrb[4].mxu1 %v493_v33 }
 0x32e   :  { %2601 = vmatprep.mubr.msk.bf16.mxu1 %vm3017_vm0, %v3016_v1  ;;  %2586 = vmatpush3.bf16.msra.mxu1 %v2760_v50 }
 0x32f   :  { %2587 = vmatprep.subr.bf16.mxu1 %v3016_v1 }
 0x332   :  { %2588 = vmatpush3.bf16.msra.mxu1 %v2761_v51 }
 0x333   :  { %2589 = vmatprep.subr.bf16.mxu1 %v3016_v1 }
 0x336   :  { %2590 = vmatpush3.bf16.msra.mxu1 %v2762_v52 }
 0x337   :  { %2591 = vmatprep.subr.bf16.mxu1 %v3016_v1 }
 0x33a   :  { %2592 = vmatpush3.bf16.msra.mxu1 %v2763_v53 }
 0x33b   :  { %2593 = vmatprep.subr.bf16.mxu1 %v3016_v1 }
 0x33e   :  { %2594 = vmatpush3.bf16.msra.mxu1 %v2764_v54 }
 0x33f   :  { %2595 = vmatprep.subr.bf16.mxu1 %v3016_v1 }
 0x342   :  { %2596 = vmatpush3.bf16.msra.mxu1 %v2765_v55 }
 0x343   :  { %2597 = vmatprep.subr.bf16.mxu1 %v3016_v1 }
 0x400   :  { %v592_v38 = vpop.f32.mrb[4].mxu1 }
 0x401   :  { %v600_v40 = vadd.f32 %v598_v36, %v592_v38  ;;  %v2583_v41 = vpop.f32.mrb[5].mxu1 }
 0x402   :  { %v595_v42 = vpop.f32.mrb[6].mxu1 }
 0x403   :  { %2848 = vtanh.f32 %v600_v40  ;;  %v2584_v43 = vpop.f32.mrb[7].mxu1 }
 0x404   :  { %2850 = vrcp.f32 %v479_v39 }
 0x40d   :  { %v2849_v44 = vpop.eup %2848 }
 0x40e   :  { %v602_v45 = vsub.f32 %v3164_v56, %v2849_v44  ;;  %v2851_v46 = vpop.eup %2850  ;;  %v2767_v56 = vld [vmem:[#allocation8 + $0x38] sm:$0xff]  }
 0x410   :  { %v603_v47 = vmul.f32 %v2851_v46, %v602_v45 }
 0x412   :  { %v3197_v48 = vadd.f32 %v2849_v44, %v603_v47 }
 0x414   :  { %v605_v49 = vpack.c.bf16 %v3197_v48, %v3197_v48 }
 0x416   :  { %607 = vst [vmem:[#allocation9 + $0x1] sm:$0x1] %v605_v49  ;;  %740 = vmatmul.mubr.bf16.vlgmr.msra.gmra.mrb[8].mxu0 %v605_v49 }
 0x417   :  { %981 = vmatpush1.bf16.msra.mxu0 %v3082_v3  ;;  %1012 = vmatprep.mubr.bf16.mxu0 %v3015_v0 }
 0x418   :  { %982 = vmatprep.subr.bf16.mxu0 %v3085_v4 }
 0x41b   :  { %983 = vmatpush1.bf16.msra.mxu0 %v3088_v5 }
 0x41c   :  { %984 = vmatprep.subr.bf16.mxu0 %v3091_v6 }
 0x41f   :  { %985 = vmatpush1.bf16.msra.mxu0 %v3094_v7 }
 0x420   :  { %986 = vmatprep.subr.bf16.mxu0 %v3097_v8 }
 0x423   :  { %987 = vmatpush1.bf16.msra.mxu0 %v3099_v9 }
 0x424   :  { %988 = vmatprep.subr.bf16.mxu0 %v3102_v10 }
 0x427   :  { %989 = vmatpush1.bf16.msra.mxu0 %v3105_v11 }
 0x428   :  { %990 = vmatprep.subr.bf16.mxu0 %v3107_v12 }
 0x42b   :  { %991 = vmatpush1.bf16.msra.mxu0 %v3111_v13 }
 0x42c   :  { %992 = vmatprep.subr.bf16.mxu0 %v3113_v14 }
 0x42f   :  { %993 = vmatpush1.bf16.msra.mxu0 %v3117_v15 }
 0x430   :  { %994 = vmatprep.subr.bf16.mxu0 %v3119_v16 }
 0x433   :  { %995 = vmatpush1.bf16.msra.mxu0 %v3123_v17 }
 0x434   :  { %1253 = vmatprep.subr.bf16.mxu0 %v3080_v2  ;;  %v2766_v2 = vld [vmem:[#allocation8 + $0x30] sm:$0xff]  }
 0x435   :  { %2598 = vmatpush3.bf16.msra.mxu1 %v2766_v2 }
 0x436   :  { %2599 = vmatprep.subr.bf16.mxu1 %v3016_v1 }
 0x439   :  { %2600 = vmatpush3.bf16.msra.mxu1 %v2767_v56 }
 0x43a   :  { %2605 = vmatprep.subr.bf16.mxu1 %v3016_v1 }
 0x4e9   :  { %v741_v60 = vpop.f32.mrb[8].mxu0 }
 0x4ea   :  { %v743_v61 = vpop.f32.mrb[9].mxu0  ;;  %v748_v25 = vadd.f32 %v741_v60, %v610_v58 }
 0x4eb   :  { %v758_v62 = vadd.f32 %v756_v59, %v743_v61  ;;  %v745_v63 = vpop.f32.mrb[10].mxu0 }
 0x4ec   :  { %v746_v18 = vpop.f32.mrb[11].mxu0  ;;  %v2333_v26 = vmul.f32 -1.442695, %v748_v25  ;;  %v2776_v63 = vld [vmem:[#allocation8] sm:$0xff]  }
 0x4ed   :  { %v2334_v19 = vmul.f32 -1.442695, %v758_v62  ;;  %v2777_v18 = vld [vmem:[#allocation8 + $0x8] sm:$0xff]  }
 0x4ee   :  { %v3275_v25 = vld [vmem:[#allocation6] ss:$8 sps:$4 sm:$0xff]  }
 0x4ef   :  { %2852 = vpow2.f32 %v2334_v19  ;;  %v2778_v19 = vld [vmem:[#allocation8 + $0x10] sm:$0xff]  }
 0x4f9   :  { %v2853_v20 = vpop.eup %2852 }
 0x4fa   :  { %v762_v21 = vadd.f32 1.0, %v2853_v20  ;;  %v2779_v20 = vld [vmem:[#allocation8 + $0x18] sm:$0xff]  }
 0x4fc   :  { %2854 = vrcp.f32 %v762_v21  ;;  %v2780_v21 = vld [vmem:[#allocation8 + $0x20] sm:$0xff]  }
 0x4fd   :  { %2856 = vpow2.f32 %v2333_v26  ;;  %v3277_v26 = vld [vmem:[#allocation6 + $0x4] ss:$8 sps:$4 sm:$0xff]  }
 0x506   :  { %v2855_v22 = vpop.eup %2854 }
 0x507   :  { %v765_v23 = vmul.f32 %v2855_v22, %v3197_v48  ;;  %v2857_v28 = vpop.eup %2856  ;;  %v2781_v22 = vld [vmem:[#allocation8 + $0x28] sm:$0xff]  }
 0x508   :  { %v752_v30 = vadd.f32 1.0, %v2857_v28  ;;  %v3283_v28 = vld [vmem:[#allocation6 + $0x10] ss:$8 sps:$4 sm:$0xff]  }
 0x509   :  { %v766_v24 = vpack.c.bf16 %v765_v23, %v765_v23  ;;  %v2782_v23 = vld [vmem:[#allocation8 + $0x30] sm:$0xff]  }
 0x50b   :  { %2602 = vmatmul.mubr.bf16.vlgmr.msra.gmra.mrb[8].mxu1 %v766_v24  ;;  %v2783_v24 = vld [vmem:[#allocation8 + $0x38] sm:$0xff]  }
 0x50c   :  { %2621 = vmatprep.mubr.msk.bf16.mxu1 %vm3017_vm0, %v3016_v1 }
 0x5de   :  { %v865_v29 = vpop.f32.mrb[8].mxu1 }
 0x5df   :  { %v873_v31 = vadd.f32 %v871_v27, %v865_v29  ;;  %v2603_v32 = vpop.f32.mrb[9].mxu1  ;;  %v3279_v27 = vld [vmem:[#allocation6 + $0x14] ss:$8 sps:$4 sm:$0xff]   ;;  %v3286_v29 = vld [vmem:[#allocation6 + $0x24] ss:$8 sps:$4 sm:$0xff]  }
 0x5e0   :  { %v868_v33 = vpop.f32.mrb[10].mxu1 }
 0x5e1   :  { %2858 = vtanh.f32 %v873_v31  ;;  %v2604_v34 = vpop.f32.mrb[11].mxu1  ;;  %v1155_v31 = vld [vmem:[#allocation3 + $0xc] sm:$0x7] }
 0x5e2   :  { %2860 = vrcp.f32 %v752_v30  ;;  %v3289_v30 = vld [vmem:[#allocation6 + $0x20] ss:$8 sps:$4 sm:$0xff]   ;;  %v1156_v32 = vunpack.c.l.bf16 %v1155_v31 }
 0x5e4   :  { %v1302_v33 = vrot.slane %v1156_v32, 2 }
 0x5eb   :  { %v2859_v35 = vpop.eup %2858 }
 0x5ec   :  { %v875_v36 = vsub.f32 %v3197_v48, %v2859_v35  ;;  %v2861_v37 = vpop.eup %2860 }
 0x5ee   :  { %v876_v38 = vmul.f32 %v2861_v37, %v875_v36 }
 0x5f0   :  { %v3230_v39 = vadd.f32 %v2859_v35, %v876_v38 }
 0x5f2   :  { %v878_v40 = vpack.c.bf16 %v3230_v39, %v3230_v39 }
 0x5f4   :  { %880 = vst [vmem:[#allocation9 + $0x2] sm:$0x1] %v878_v40  ;;  %1013 = vmatmul.mubr.bf16.vlgmr.msra.gmra.mrb[12].mxu0 %v878_v40 }
 0x5f5   :  { %1254 = vmatpush1.bf16.msra.mxu0 %v3082_v3  ;;  %1285 = vmatprep.mubr.bf16.mxu0 %v3015_v0  ;;  %v2768_v3 = vld [vmem:[#allocation8] sm:$0xff]  }
 0x5f6   :  { %1255 = vmatprep.subr.bf16.mxu0 %v3085_v4  ;;  %2606 = vmatpush3.bf16.msra.mxu1 %v2768_v3  ;;  %v2769_v4 = vld [vmem:[#allocation8 + $0x8] sm:$0xff]  }
 0x5f7   :  { %2607 = vmatprep.subr.bf16.mxu1 %v3016_v1 }
 0x5f9   :  { %1256 = vmatpush1.bf16.msra.mxu0 %v3088_v5  ;;  %v2770_v5 = vld [vmem:[#allocation8 + $0x10] sm:$0xff]  }
 0x5fa   :  { %1257 = vmatprep.subr.bf16.mxu0 %v3091_v6  ;;  %2608 = vmatpush3.bf16.msra.mxu1 %v2769_v4  ;;  %v2771_v6 = vld [vmem:[#allocation8 + $0x18] sm:$0xff]  }
 0x5fb   :  { %2609 = vmatprep.subr.bf16.mxu1 %v3016_v1 }
 0x5fd   :  { %1258 = vmatpush1.bf16.msra.mxu0 %v3094_v7  ;;  %v2772_v7 = vld [vmem:[#allocation8 + $0x20] sm:$0xff]  }
 0x5fe   :  { %1259 = vmatprep.subr.bf16.mxu0 %v3097_v8  ;;  %2610 = vmatpush3.bf16.msra.mxu1 %v2770_v5  ;;  %v2773_v8 = vld [vmem:[#allocation8 + $0x28] sm:$0xff]  }
 0x5ff   :  { %2611 = vmatprep.subr.bf16.mxu1 %v3016_v1 }
 0x601   :  { %1260 = vmatpush1.bf16.msra.mxu0 %v3099_v9  ;;  %v2774_v9 = vld [vmem:[#allocation8 + $0x30] sm:$0xff]  }
 0x602   :  { %1261 = vmatprep.subr.bf16.mxu0 %v3102_v10  ;;  %2612 = vmatpush3.bf16.msra.mxu1 %v2771_v6  ;;  %v2775_v10 = vld [vmem:[#allocation8 + $0x38] sm:$0xff]  }
 0x603   :  { %2613 = vmatprep.subr.bf16.mxu1 %v3016_v1 }
 0x605   :  { %1262 = vmatpush1.bf16.msra.mxu0 %v3105_v11  ;;  %v882_v11 = vld [vmem:[#allocation3 + $0x9] sm:$0x7] }
 0x606   :  { %1263 = vmatprep.subr.bf16.mxu0 %v3107_v12  ;;  %2614 = vmatpush3.bf16.msra.mxu1 %v2772_v7  ;;  %v883_v12 = vunpack.c.l.bf16 %v882_v11  ;;  %v3296_v7 = vld [vmem:[#allocation6 + $0x34] ss:$8 sps:$4 sm:$0xff]  }
 0x607   :  { %2615 = vmatprep.subr.bf16.mxu1 %v3016_v1  ;;  %v3308_v11 = vld [vmem:[#allocation6 + $0x54] ss:$8 sps:$4 sm:$0xff]  }
 0x608   :  { %v1144_v50 = vrot.slane %v883_v12, 4 }
 0x609   :  { %1264 = vmatpush1.bf16.msra.mxu0 %v3111_v13  ;;  %v1029_v13 = vrot.slane %v883_v12, 2 }
 0x60a   :  { %1265 = vmatprep.subr.bf16.mxu0 %v3113_v14  ;;  %2616 = vmatpush3.bf16.msra.mxu1 %v2773_v8  ;;  %v3298_v8 = vld [vmem:[#allocation6 + $0x30] ss:$8 sps:$4 sm:$0xff]  }
 0x60b   :  { %2617 = vmatprep.subr.bf16.mxu1 %v3016_v1 }
 0x60d   :  { %1266 = vmatpush1.bf16.msra.mxu0 %v3117_v15 }
 0x60e   :  { %1267 = vmatprep.subr.bf16.mxu0 %v3119_v16  ;;  %2618 = vmatpush3.bf16.msra.mxu1 %v2774_v9  ;;  %v3302_v9 = vld [vmem:[#allocation6 + $0x44] ss:$8 sps:$4 sm:$0xff]  }
 0x60f   :  { %2619 = vmatprep.subr.bf16.mxu1 %v3016_v1 }
 0x611   :  { %1268 = vmatpush1.bf16.msra.mxu0 %v3123_v17 }
 0x612   :  { %2620 = vmatpush3.bf16.msra.mxu1 %v2775_v10  ;;  %1526 = vmatprep.subr.bf16.mxu0 %v3277_v26  ;;  %v3304_v10 = vld [vmem:[#allocation6 + $0x40] ss:$8 sps:$4 sm:$0xff]  }
 0x613   :  { %2625 = vmatprep.subr.bf16.mxu1 %v3016_v1 }
 0x6c7   :  { %v1014_v14 = vpop.f32.mrb[12].mxu0 }
 0x6c8   :  { %v1016_v15 = vpop.f32.mrb[13].mxu0  ;;  %v1021_v48 = vadd.f32 %v1014_v14, %v883_v12  ;;  %v3310_v12 = vld [vmem:[#allocation6 + $0x50] ss:$8 sps:$4 sm:$0xff]   ;;  %v3316_v14 = vld [vmem:[#allocation6 + $0x60] ss:$8 sps:$4 sm:$0xff]  }
 0x6c9   :  { %v1031_v16 = vadd.f32 %v1029_v13, %v1016_v15  ;;  %v1018_v17 = vpop.f32.mrb[14].mxu0  ;;  %v3314_v13 = vld [vmem:[#allocation6 + $0x64] ss:$8 sps:$4 sm:$0xff]   ;;  %v3319_v15 = vld [vmem:[#allocation6 + $0x74] ss:$8 sps:$4 sm:$0xff]  }
 0x6ca   :  { %v1019_v41 = vpop.f32.mrb[15].mxu0  ;;  %v2359_v49 = vmul.f32 -1.442695, %v1021_v48 }
 0x6cb   :  { %v2360_v42 = vmul.f32 -1.442695, %v1031_v16  ;;  %v3322_v16 = vld [vmem:[#allocation6 + $0x70] ss:$8 sps:$4 sm:$0xff]  }
 0x6cd   :  { %2862 = vpow2.f32 %v2360_v42  ;;  %v1417_v42 = vrot.slane %v1156_v32, 4 }
 0x6d7   :  { %v2863_v43 = vpop.eup %2862 }
 0x6d8   :  { %v1035_v44 = vadd.f32 1.0, %v2863_v43 }
 0x6da   :  { %2864 = vrcp.f32 %v1035_v44 }
 0x6db   :  { %2866 = vpow2.f32 %v2359_v49 }
 0x6e4   :  { %v2865_v45 = vpop.eup %2864 }
 0x6e5   :  { %v1038_v46 = vmul.f32 %v2865_v45, %v3230_v39  ;;  %v2867_v51 = vpop.eup %2866 }
 0x6e6   :  { %v1025_v53 = vadd.f32 1.0, %v2867_v51 }
 0x6e7   :  { %v1039_v47 = vpack.c.bf16 %v1038_v46, %v1038_v46 }
 0x6e9   :  { %2622 = vmatmul.mubr.bf16.vlgmr.msra.gmra.mrb[12].mxu1 %v1039_v47 }
 0x6ea   :  { %2641 = vmatprep.mubr.msk.bf16.mxu1 %vm3017_vm0, %v3016_v1  ;;  %2626 = vmatpush3.bf16.msra.mxu1 %v2776_v63  ;;  %v1428_v63 = vld [vmem:[#allocation3 + $0xf] sm:$0x7] }
 0x6eb   :  { %2627 = vmatprep.subr.bf16.mxu1 %v3016_v1 }
 0x6ee   :  { %2628 = vmatpush3.bf16.msra.mxu1 %v2777_v18  ;;  %v1429_v18 = vunpack.c.l.bf16 %v1428_v63 }
 0x6ef   :  { %2629 = vmatprep.subr.bf16.mxu1 %v3016_v1 }
 0x6f2   :  { %2630 = vmatpush3.bf16.msra.mxu1 %v2778_v19  ;;  %v1575_v19 = vrot.slane %v1429_v18, 2 }
 0x6f3   :  { %2631 = vmatprep.subr.bf16.mxu1 %v3016_v1 }
 0x6f6   :  { %2632 = vmatpush3.bf16.msra.mxu1 %v2779_v20 }
 0x6f7   :  { %2633 = vmatprep.subr.bf16.mxu1 %v3016_v1 }
 0x6fa   :  { %2634 = vmatpush3.bf16.msra.mxu1 %v2780_v21 }
 0x6fb   :  { %2635 = vmatprep.subr.bf16.mxu1 %v3016_v1 }
 0x6fe   :  { %2636 = vmatpush3.bf16.msra.mxu1 %v2781_v22 }
 0x6ff   :  { %2637 = vmatprep.subr.bf16.mxu1 %v3016_v1 }
 0x702   :  { %2638 = vmatpush3.bf16.msra.mxu1 %v2782_v23 }
 0x703   :  { %2639 = vmatprep.subr.bf16.mxu1 %v3016_v1 }
 0x706   :  { %2640 = vmatpush3.bf16.msra.mxu1 %v2783_v24 }
 0x707   :  { %2645 = vmatprep.subr.bf16.mxu1 %v3016_v1 }
 0x7bc   :  { %v1138_v52 = vpop.f32.mrb[12].mxu1 }
 0x7bd   :  { %v1146_v54 = vadd.f32 %v1144_v50, %v1138_v52  ;;  %v2623_v55 = vpop.f32.mrb[13].mxu1 }
 0x7be   :  { %v1141_v2 = vpop.f32.mrb[14].mxu1 }
 0x7bf   :  { %2868 = vtanh.f32 %v1146_v54  ;;  %v2624_v56 = vpop.f32.mrb[15].mxu1  ;;  %v2808_v2 = vld [vmem:[#allocation8] sm:$0xff]  }
 0x7c0   :  { %2870 = vrcp.f32 %v1025_v53  ;;  %v2809_v56 = vld [vmem:[#allocation8 + $0x8] sm:$0xff]  }
 0x7c9   :  { %v2869_v57 = vpop.eup %2868 }
 0x7ca   :  { %v1148_v58 = vsub.f32 %v3230_v39, %v2869_v57  ;;  %v2871_v59 = vpop.eup %2870 }
 0x7cc   :  { %v1149_v60 = vmul.f32 %v2871_v59, %v1148_v58  ;;  %v2811_v58 = vld [vmem:[#allocation8 + $0x18] sm:$0xff]   ;;  %v2812_v59 = vld [vmem:[#allocation8 + $0x20] sm:$0xff]  }
 0x7ce   :  { %v3262_v61 = vadd.f32 %v2869_v57, %v1149_v60  ;;  %v2810_v57 = vld [vmem:[#allocation8 + $0x10] sm:$0xff]   ;;  %v2813_v60 = vld [vmem:[#allocation8 + $0x28] sm:$0xff]  }
 0x7d0   :  { %v1151_v62 = vpack.c.bf16 %v3262_v61, %v3262_v61 }
 0x7d2   :  { %1153 = vst [vmem:[#allocation9 + $0x3] sm:$0x1] %v1151_v62  ;;  %1286 = vmatmul.mubr.bf16.vlgmr.msra.gmra.mrb[16].mxu0 %v1151_v62  ;;  %v2815_v62 = vld [vmem:[#allocation8 + $0x38] sm:$0xff]  }
 0x7d3   :  { %1558 = vmatprep.mubr.bf16.mxu0 %v3015_v0  ;;  %1527 = vmatpush1.bf16.msra.mxu0 %v3275_v25 }
 0x7d4   :  { %1528 = vmatprep.subr.bf16.mxu0 %v3279_v27 }
 0x7d7   :  { %1529 = vmatpush1.bf16.msra.mxu0 %v3283_v28 }
 0x7d8   :  { %1530 = vmatprep.subr.bf16.mxu0 %v3286_v29 }
 0x7db   :  { %1531 = vmatpush1.bf16.msra.mxu0 %v3289_v30 }
 0x7dc   :  { %1532 = vmatprep.subr.bf16.mxu0 %v3296_v7 }
 0x7df   :  { %1533 = vmatpush1.bf16.msra.mxu0 %v3298_v8 }
 0x7e0   :  { %1534 = vmatprep.subr.bf16.mxu0 %v3302_v9 }
 0x7e3   :  { %1535 = vmatpush1.bf16.msra.mxu0 %v3304_v10 }
 0x7e4   :  { %1536 = vmatprep.subr.bf16.mxu0 %v3308_v11 }
 0x7e7   :  { %1537 = vmatpush1.bf16.msra.mxu0 %v3310_v12 }
 0x7e8   :  { %1538 = vmatprep.subr.bf16.mxu0 %v3314_v13 }
 0x7eb   :  { %1539 = vmatpush1.bf16.msra.mxu0 %v3316_v14 }
 0x7ec   :  { %1540 = vmatprep.subr.bf16.mxu0 %v3319_v15 }
 0x7ef   :  { %1541 = vmatpush1.bf16.msra.mxu0 %v3322_v16 }
 0x7f0   :  { %1799 = vmatprep.subr.bf16.mxu0 %v3277_v26 }
 0x8a5   :  { %v1287_v34 = vpop.f32.mrb[16].mxu0 }
 0x8a6   :  { %v1289_v35 = vpop.f32.mrb[17].mxu0  ;;  %v1294_v17 = vadd.f32 %v1287_v34, %v1156_v32 }
 0x8a7   :  { %v1304_v36 = vadd.f32 %v1302_v33, %v1289_v35  ;;  %v1291_v37 = vpop.f32.mrb[18].mxu0 }
 0x8a8   :  { %v1292_v38 = vpop.f32.mrb[19].mxu0  ;;  %v2385_v41 = vmul.f32 -1.442695, %v1294_v17 }
 0x8a9   :  { %v2386_v39 = vmul.f32 -1.442695, %v1304_v36  ;;  %v1690_v38 = vrot.slane %v1429_v18, 4 }
 0x8ab   :  { %2872 = vpow2.f32 %v2386_v39 }
 0x8b5   :  { %v2873_v40 = vpop.eup %2872 }
 0x8b6   :  { %v1308_v3 = vadd.f32 1.0, %v2873_v40 }
 0x8b8   :  { %2874 = vrcp.f32 %v1308_v3 }
 0x8b9   :  { %2876 = vpow2.f32 %v2385_v41 }
 0x8c2   :  { %v2875_v4 = vpop.eup %2874 }
 0x8c3   :  { %v1311_v5 = vmul.f32 %v2875_v4, %v3262_v61  ;;  %v2877_v43 = vpop.eup %2876 }
 0x8c4   :  { %v1298_v45 = vadd.f32 1.0, %v2877_v43 }
 0x8c5   :  { %v1312_v6 = vpack.c.bf16 %v1311_v5, %v1311_v5 }
 0x8c7   :  { %2642 = vmatmul.mubr.bf16.vlgmr.msra.gmra.mrb[16].mxu1 %v1312_v6 }
 0x8c8   :  { %2661 = vmatprep.mubr.msk.bf16.mxu1 %vm3017_vm0, %v3016_v1  ;;  %2646 = vmatpush3.bf16.msra.mxu1 %v2808_v2 }
 0x8c9   :  { %2647 = vmatprep.subr.bf16.mxu1 %v3016_v1 }
 0x8cc   :  { %2648 = vmatpush3.bf16.msra.mxu1 %v2809_v56 }
 0x8cd   :  { %2649 = vmatprep.subr.bf16.mxu1 %v3016_v1 }
 0x8d0   :  { %2650 = vmatpush3.bf16.msra.mxu1 %v2810_v57 }
 0x8d1   :  { %2651 = vmatprep.subr.bf16.mxu1 %v3016_v1 }
 0x8d4   :  { %2652 = vmatpush3.bf16.msra.mxu1 %v2811_v58 }
 0x8d5   :  { %2653 = vmatprep.subr.bf16.mxu1 %v3016_v1 }
 0x8d8   :  { %2654 = vmatpush3.bf16.msra.mxu1 %v2812_v59 }
 0x8d9   :  { %2655 = vmatprep.subr.bf16.mxu1 %v3016_v1 }
 0x8dc   :  { %2656 = vmatpush3.bf16.msra.mxu1 %v2813_v60 }
 0x8dd   :  { %2657 = vmatprep.subr.bf16.mxu1 %v3016_v1 }
 0x99a   :  { %v1411_v44 = vpop.f32.mrb[16].mxu1 }
 0x99b   :  { %v1419_v46 = vadd.f32 %v1417_v42, %v1411_v44  ;;  %v2643_v47 = vpop.f32.mrb[17].mxu1 }
 0x99c   :  { %v1414_v48 = vpop.f32.mrb[18].mxu1 }
 0x99d   :  { %2878 = vtanh.f32 %v1419_v46  ;;  %v2644_v49 = vpop.f32.mrb[19].mxu1 }
 0x99e   :  { %2880 = vrcp.f32 %v1298_v45 }
 0x9a7   :  { %v2879_v50 = vpop.eup %2878 }
 0x9a8   :  { %v1421_v51 = vsub.f32 %v3262_v61, %v2879_v50  ;;  %v2881_v52 = vpop.eup %2880  ;;  %v2814_v61 = vld [vmem:[#allocation8 + $0x30] sm:$0xff]  }
 0x9a9   :  { %2658 = vmatpush3.bf16.msra.mxu1 %v2814_v61 }
 0x9aa   :  { %v1422_v53 = vmul.f32 %v2881_v52, %v1421_v51  ;;  %2659 = vmatprep.subr.bf16.mxu1 %v3016_v1 }
 0x9ac   :  { %v3328_v54 = vadd.f32 %v2879_v50, %v1422_v53 }
 0x9ad   :  { %2660 = vmatpush3.bf16.msra.mxu1 %v2815_v62 }
 0x9ae   :  { %v1424_v55 = vpack.c.bf16 %v3328_v54, %v3328_v54  ;;  %2665 = vmatprep.subr.bf16.mxu1 %v3016_v1 }
 0x9b0   :  { %1426 = vst [vmem:[#allocation9 + $0x4] sm:$0x1] %v1424_v55  ;;  %1559 = vmatmul.mubr.bf16.vlgmr.msra.gmra.mrb[20].mxu0 %v1424_v55 }
 0x9b1   :  { %1800 = vmatpush1.bf16.msra.mxu0 %v3275_v25  ;;  %1831 = vmatprep.mubr.bf16.mxu0 %v3015_v0 }
 0x9b2   :  { %1801 = vmatprep.subr.bf16.mxu0 %v3279_v27 }
 0x9b5   :  { %1802 = vmatpush1.bf16.msra.mxu0 %v3283_v28 }
 0x9b6   :  { %1803 = vmatprep.subr.bf16.mxu0 %v3286_v29 }
 0x9b9   :  { %1804 = vmatpush1.bf16.msra.mxu0 %v3289_v30 }
 0x9ba   :  { %1805 = vmatprep.subr.bf16.mxu0 %v3296_v7 }
 0x9bd   :  { %1806 = vmatpush1.bf16.msra.mxu0 %v3298_v8 }
 0x9be   :  { %1807 = vmatprep.subr.bf16.mxu0 %v3302_v9 }
 0x9c1   :  { %1808 = vmatpush1.bf16.msra.mxu0 %v3304_v10 }
 0x9c2   :  { %1809 = vmatprep.subr.bf16.mxu0 %v3308_v11 }
 0x9c5   :  { %1810 = vmatpush1.bf16.msra.mxu0 %v3310_v12 }
 0x9c6   :  { %1811 = vmatprep.subr.bf16.mxu0 %v3314_v13 }
 0x9c9   :  { %1812 = vmatpush1.bf16.msra.mxu0 %v3316_v14 }
 0x9ca   :  { %1813 = vmatprep.subr.bf16.mxu0 %v3319_v15 }
 0x9cd   :  { %1814 = vmatpush1.bf16.msra.mxu0 %v3322_v16 }
 0x9ce   :  { %2072 = vmatprep.subr.bf16.mxu0 %v3277_v26 }
 0xa83   :  { %v1560_v20 = vpop.f32.mrb[20].mxu0 }
 0xa84   :  { %v1562_v21 = vpop.f32.mrb[21].mxu0  ;;  %v1567_v36 = vadd.f32 %v1560_v20, %v1429_v18 }
 0xa85   :  { %v1577_v22 = vadd.f32 %v1575_v19, %v1562_v21  ;;  %v1564_v23 = vpop.f32.mrb[22].mxu0 }
 0xa86   :  { %v1565_v24 = vpop.f32.mrb[23].mxu0  ;;  %v2411_v37 = vmul.f32 -1.442695, %v1567_v36  ;;  %v2825_v23 = vld [vmem:[#allocation8 + $0x8] sm:$0xff]  }
 0xa87   :  { %v2412_v26 = vmul.f32 -1.442695, %v1577_v22  ;;  %v2824_v22 = vld [vmem:[#allocation8] sm:$0xff]   ;;  %v2826_v24 = vld [vmem:[#allocation8 + $0x10] sm:$0xff]  }
 0xa89   :  { %2882 = vpow2.f32 %v2412_v26  ;;  %v2827_v26 = vld [vmem:[#allocation8 + $0x18] sm:$0xff]  }
 0xa93   :  { %v2883_v31 = vpop.eup %2882 }
 0xa94   :  { %v1581_v32 = vadd.f32 1.0, %v2883_v31  ;;  %v2828_v31 = vld [vmem:[#allocation8 + $0x20] sm:$0xff]  }
 0xa96   :  { %2884 = vrcp.f32 %v1581_v32  ;;  %v2829_v32 = vld [vmem:[#allocation8 + $0x28] sm:$0xff]  }
 0xa97   :  { %2886 = vpow2.f32 %v2411_v37 }
 0xaa0   :  { %v2885_v33 = vpop.eup %2884 }
 0xaa1   :  { %v1584_v34 = vmul.f32 %v2885_v33, %v3328_v54  ;;  %v2887_v39 = vpop.eup %2886  ;;  %v2830_v33 = vld [vmem:[#allocation8 + $0x30] sm:$0xff]  }
 0xaa2   :  { %v1571_v3 = vadd.f32 1.0, %v2887_v39 }
 0xaa3   :  { %v1585_v35 = vpack.c.bf16 %v1584_v34, %v1584_v34  ;;  %v2831_v34 = vld [vmem:[#allocation8 + $0x38] sm:$0xff]  }
 0xaa5   :  { %2662 = vmatmul.mubr.bf16.vlgmr.msra.gmra.mrb[20].mxu1 %v1585_v35  ;;  %v1974_v35 = vld [vmem:[#allocation3 + $0x15] sm:$0x7] }
 0xaa6   :  { %2681 = vmatprep.mubr.msk.bf16.mxu1 %vm3017_vm0, %v3016_v1  ;;  %v1975_v36 = vunpack.c.l.bf16 %v1974_v35 }
 0xaa8   :  { %v2121_v37 = vrot.slane %v1975_v36, 2 }
 0xb78   :  { %v1684_v40 = vpop.f32.mrb[20].mxu1 }
 0xb79   :  { %v1692_v4 = vadd.f32 %v1690_v38, %v1684_v40  ;;  %v2663_v5 = vpop.f32.mrb[21].mxu1 }
 0xb7a   :  { %v1687_v6 = vpop.f32.mrb[22].mxu1 }
 0xb7b   :  { %2888 = vtanh.f32 %v1692_v4  ;;  %v2664_v17 = vpop.f32.mrb[23].mxu1 }
 0xb7c   :  { %2890 = vrcp.f32 %v1571_v3 }
 0xb85   :  { %v2889_v41 = vpop.eup %2888 }
 0xb86   :  { %v1694_v42 = vsub.f32 %v3328_v54, %v2889_v41  ;;  %v2891_v43 = vpop.eup %2890 }
 0xb88   :  { %v1695_v44 = vmul.f32 %v2891_v43, %v1694_v42 }
 0xb8a   :  { %v3361_v45 = vadd.f32 %v2889_v41, %v1695_v44 }
 0xb8c   :  { %v1697_v46 = vpack.c.bf16 %v3361_v45, %v3361_v45 }
 0xb8e   :  { %1699 = vst [vmem:[#allocation9 + $0x5] sm:$0x1] %v1697_v46  ;;  %1832 = vmatmul.mubr.bf16.vlgmr.msra.gmra.mrb[24].mxu0 %v1697_v46 }
 0xb8f   :  { %2073 = vmatpush1.bf16.msra.mxu0 %v3275_v25  ;;  %2104 = vmatprep.mubr.bf16.mxu0 %v3015_v0  ;;  %v2816_v0 = vld [vmem:[#allocation8] sm:$0xff]   ;;  %v2817_v25 = vld [vmem:[#allocation8 + $0x8] sm:$0xff]  }
 0xb90   :  { %2074 = vmatprep.subr.bf16.mxu0 %v3279_v27  ;;  %2666 = vmatpush3.bf16.msra.mxu1 %v2816_v0  ;;  %v2818_v27 = vld [vmem:[#allocation8 + $0x10] sm:$0xff]  }
 0xb91   :  { %2667 = vmatprep.subr.bf16.mxu1 %v3016_v1 }
 0xb93   :  { %2075 = vmatpush1.bf16.msra.mxu0 %v3283_v28  ;;  %v2819_v28 = vld [vmem:[#allocation8 + $0x18] sm:$0xff]  }
 0xb94   :  { %2076 = vmatprep.subr.bf16.mxu0 %v3286_v29  ;;  %2668 = vmatpush3.bf16.msra.mxu1 %v2817_v25  ;;  %v2820_v29 = vld [vmem:[#allocation8 + $0x20] sm:$0xff]  }
 0xb95   :  { %2669 = vmatprep.subr.bf16.mxu1 %v3016_v1 }
 0xb97   :  { %2077 = vmatpush1.bf16.msra.mxu0 %v3289_v30  ;;  %v2821_v30 = vld [vmem:[#allocation8 + $0x28] sm:$0xff]  }
 0xb98   :  { %2078 = vmatprep.subr.bf16.mxu0 %v3296_v7  ;;  %2670 = vmatpush3.bf16.msra.mxu1 %v2818_v27  ;;  %v2822_v7 = vld [vmem:[#allocation8 + $0x30] sm:$0xff]  }
 0xb99   :  { %2671 = vmatprep.subr.bf16.mxu1 %v3016_v1 }
 0xb9b   :  { %2079 = vmatpush1.bf16.msra.mxu0 %v3298_v8  ;;  %v2823_v8 = vld [vmem:[#allocation8 + $0x38] sm:$0xff]  }
 0xb9c   :  { %2080 = vmatprep.subr.bf16.mxu0 %v3302_v9  ;;  %2672 = vmatpush3.bf16.msra.mxu1 %v2819_v28  ;;  %v1701_v9 = vld [vmem:[#allocation3 + $0x12] sm:$0x7] }
 0xb9d   :  { %2673 = vmatprep.subr.bf16.mxu1 %v3016_v1 }
 0xb9f   :  { %2081 = vmatpush1.bf16.msra.mxu0 %v3304_v10  ;;  %v1702_v10 = vunpack.c.l.bf16 %v1701_v9 }
 0xba0   :  { %2082 = vmatprep.subr.bf16.mxu0 %v3308_v11  ;;  %2674 = vmatpush3.bf16.msra.mxu1 %v2820_v29 }
 0xba1   :  { %2675 = vmatprep.subr.bf16.mxu1 %v3016_v1  ;;  %v1848_v11 = vrot.slane %v1702_v10, 2  ;;  %v1963_v55 = vrot.slane %v1702_v10, 4 }
 0xba3   :  { %2083 = vmatpush1.bf16.msra.mxu0 %v3310_v12 }
 0xba4   :  { %2084 = vmatprep.subr.bf16.mxu0 %v3314_v13  ;;  %2676 = vmatpush3.bf16.msra.mxu1 %v2821_v30 }
 0xba5   :  { %2677 = vmatprep.subr.bf16.mxu1 %v3016_v1 }
 0xba7   :  { %2085 = vmatpush1.bf16.msra.mxu0 %v3316_v14 }
 0xba8   :  { %2086 = vmatprep.subr.bf16.mxu0 %v3319_v15  ;;  %2678 = vmatpush3.bf16.msra.mxu1 %v2822_v7 }
 0xba9   :  { %2679 = vmatprep.subr.bf16.mxu1 %v3016_v1 }
 0xbab   :  { %2087 = vmatpush1.bf16.msra.mxu0 %v3322_v16 }
 0xbac   :  { %2680 = vmatpush3.bf16.msra.mxu1 %v2823_v8 }
 0xbad   :  { %2685 = vmatprep.subr.bf16.mxu1 %v3016_v1 }
 0xc61   :  { %v1833_v12 = vpop.f32.mrb[24].mxu0 }
 0xc62   :  { %v1835_v13 = vpop.f32.mrb[25].mxu0  ;;  %v1840_v53 = vadd.f32 %v1833_v12, %v1702_v10 }
 0xc63   :  { %v1850_v14 = vadd.f32 %v1848_v11, %v1835_v13  ;;  %v1837_v15 = vpop.f32.mrb[26].mxu0 }
 0xc64   :  { %v1838_v16 = vpop.f32.mrb[27].mxu0  ;;  %v2437_v54 = vmul.f32 -1.442695, %v1840_v53 }
 0xc65   :  { %v2438_v47 = vmul.f32 -1.442695, %v1850_v14 }
 0xc67   :  { %2892 = vpow2.f32 %v2438_v47 }
 0xc71   :  { %v2893_v48 = vpop.eup %2892 }
 0xc72   :  { %v1854_v49 = vadd.f32 1.0, %v2893_v48 }
 0xc74   :  { %2894 = vrcp.f32 %v1854_v49 }
 0xc75   :  { %2896 = vpow2.f32 %v2437_v54 }
 0xc7e   :  { %v2895_v50 = vpop.eup %2894 }
 0xc7f   :  { %v1857_v51 = vmul.f32 %v2895_v50, %v3361_v45  ;;  %v2897_v2 = vpop.eup %2896 }
 0xc80   :  { %v1844_v57 = vadd.f32 1.0, %v2897_v2 }
 0xc81   :  { %v1858_v52 = vpack.c.bf16 %v1857_v51, %v1857_v51 }
 0xc83   :  { %2682 = vmatmul.mubr.bf16.vlgmr.msra.gmra.mrb[24].mxu1 %v1858_v52 }
 0xc84   :  { %2701 = vmatprep.mubr.msk.bf16.mxu1 %vm3017_vm0, %v3016_v1  ;;  %2686 = vmatpush3.bf16.msra.mxu1 %v2824_v22 }
 0xc85   :  { %2687 = vmatprep.subr.bf16.mxu1 %v3016_v1 }
 0xc88   :  { %2688 = vmatpush3.bf16.msra.mxu1 %v2825_v23 }
 0xc89   :  { %2689 = vmatprep.subr.bf16.mxu1 %v3016_v1 }
 0xc8c   :  { %2690 = vmatpush3.bf16.msra.mxu1 %v2826_v24 }
 0xc8d   :  { %2691 = vmatprep.subr.bf16.mxu1 %v3016_v1 }
 0xc90   :  { %2692 = vmatpush3.bf16.msra.mxu1 %v2827_v26 }
 0xc91   :  { %2693 = vmatprep.subr.bf16.mxu1 %v3016_v1 }
 0xc94   :  { %2694 = vmatpush3.bf16.msra.mxu1 %v2828_v31 }
 0xc95   :  { %2695 = vmatprep.subr.bf16.mxu1 %v3016_v1 }
 0xc98   :  { %2696 = vmatpush3.bf16.msra.mxu1 %v2829_v32 }
 0xc99   :  { %2697 = vmatprep.subr.bf16.mxu1 %v3016_v1 }
 0xc9c   :  { %2698 = vmatpush3.bf16.msra.mxu1 %v2830_v33 }
 0xc9d   :  { %2699 = vmatprep.subr.bf16.mxu1 %v3016_v1 }
 0xca0   :  { %2700 = vmatpush3.bf16.msra.mxu1 %v2831_v34 }
 0xd56   :  { %v1957_v56 = vpop.f32.mrb[24].mxu1 }
 0xd57   :  { %v1965_v58 = vadd.f32 %v1963_v55, %v1957_v56  ;;  %v2683_v59 = vpop.f32.mrb[25].mxu1 }
 0xd58   :  { %v1960_v60 = vpop.f32.mrb[26].mxu1 }
 0xd59   :  { %2898 = vtanh.f32 %v1965_v58  ;;  %v2684_v61 = vpop.f32.mrb[27].mxu1 }
 0xd5a   :  { %2900 = vrcp.f32 %v1844_v57 }
 0xd63   :  { %v2899_v62 = vpop.eup %2898 }
 0xd64   :  { %v1967_v63 = vsub.f32 %v3361_v45, %v2899_v62  ;;  %v2901_v18 = vpop.eup %2900  ;;  %v2236_v45 = vrot.slane %v1975_v36, 4 }
 0xd66   :  { %v1968_v19 = vmul.f32 %v2901_v18, %v1967_v63 }
 0xd68   :  { %v1969_v20 = vadd.f32 %v2899_v62, %v1968_v19 }
 0xd6a   :  { %v1970_v21 = vpack.c.bf16 %v1969_v20, %v1969_v20 }
 0xd6c   :  { %1972 = vst [vmem:[#allocation9 + $0x6] sm:$0x1] %v1970_v21  ;;  %2105 = vmatmul.mubr.bf16.vlgmr.msra.gmra.mrb[28].mxu0 %v1970_v21 }
 0xe3f   :  { %v2106_v38 = vpop.f32.mrb[28].mxu0 }
 0xe40   :  { %v2108_v39 = vpop.f32.mrb[29].mxu0  ;;  %v2113_v44 = vadd.f32 %v2106_v38, %v1975_v36 }
 0xe41   :  { %v2123_v40 = vadd.f32 %v2121_v37, %v2108_v39  ;;  %v2110_v3 = vpop.f32.mrb[30].mxu0 }
 0xe42   :  { %v2111_v4 = vpop.f32.mrb[31].mxu0  ;;  %v2463_v1 = vmul.f32 -1.442695, %v2113_v44 }
 0xe43   :  { %v2464_v5 = vmul.f32 -1.442695, %v2123_v40 }
 0xe45   :  { %2902 = vpow2.f32 %v2464_v5 }
 0xe4f   :  { %v2903_v6 = vpop.eup %2902 }
 0xe50   :  { %v2127_v17 = vadd.f32 1.0, %v2903_v6 }
 0xe52   :  { %2904 = vrcp.f32 %v2127_v17 }
 0xe53   :  { %2906 = vpow2.f32 %v2463_v1 }
 0xe5c   :  { %v2905_v41 = vpop.eup %2904 }
 0xe5d   :  { %v2130_v42 = vmul.f32 %v2905_v41, %v1969_v20  ;;  %v2907_v46 = vpop.eup %2906 }
 0xe5e   :  { %v2117_v25 = vadd.f32 1.0, %v2907_v46 }
 0xe5f   :  { %v2131_v43 = vpack.c.bf16 %v2130_v42, %v2130_v42 }
 0xe61   :  { %2702 = vmatmul.mubr.bf16.vlgmr.msra.gmra.mrb[28].mxu1 %v2131_v43 }
 0xf34   :  { %v2230_v0 = vpop.f32.mrb[28].mxu1 }
 0xf35   :  { %v2238_v27 = vadd.f32 %v2236_v45, %v2230_v0  ;;  %v2703_v28 = vpop.f32.mrb[29].mxu1 }
 0xf36   :  { %v2233_v29 = vpop.f32.mrb[30].mxu1 }
 0xf37   :  { %2908 = vtanh.f32 %v2238_v27  ;;  %v2704_v30 = vpop.f32.mrb[31].mxu1 }
 0xf38   :  { %2910 = vrcp.f32 %v2117_v25 }
 0xf41   :  { %v2909_v7 = vpop.eup %2908 }
 0xf42   :  { %v2240_v8 = vsub.f32 %v1969_v20, %v2909_v7  ;;  %v2911_v9 = vpop.eup %2910 }
 0xf44   :  { %v2241_v10 = vmul.f32 %v2911_v9, %v2240_v8 }
 0xf46   :  { %v2242_v11 = vadd.f32 %v2909_v7, %v2241_v10 }
 0xf48   :  { %v2243_v12 = vpack.c.bf16 %v2242_v11, %v2242_v11  ;;  %2246 = vst [vmem:[#allocation2] sm:$0x3] %v2242_v11 }
 0xf4a   :  { %2245 = vst [vmem:[#allocation9 + $0x7] sm:$0x1] %v2243_v12 }
 0xf4b   :  { %2989 = shalt.err (!%p2986_p0)
}
 0xf4c   :  { %s2990_s29 = scalar_lea.hbm %s3415_s3, 128 }
 0xf4d   :  { %p2991_p1 = scmp.ne.s32.totalorder %s3415_s3, %s2990_s29  ;;  %p2994_p2 = scmp.lt.u32.totalorder %s2990_s29, %s3415_s3 }
 0xf4f   :  { %p2996_p3 = pnand %p2994_p2, %p2991_p1 }
 0xf51   :  { %2999 = shalt.err (!%p2996_p3)
}
 0xf52   :  { %s3019_s7 = smov 16   ;;  %s3020_s8 = smov 1  }
 0xf53   :  { %2258 = dma.vmem_to_hbm [thread:$0]  %s2253_s25, 128, %s3415_s3, [#allocation5], %s3019_s7, %s3019_s7, %s3020_s8  }
 0xf54   :  { %3004 = dma.done.wait [#allocation5], 128  }
 0xf55   :  { %3005 = vsyncadd [#allocation5], 4294967168 }
 0xf56   :  { %2262 = vsyncpa [#allocation4], 1 }
 0xf57   :  { %2263 = vsyncpa [#allocation7], 1 }
 0xf58   :  { %2264 = vsyncpa [#allocation5], 1 }

</bundles_post_ra>
